<compile_context>
chip_gen: v7x
topology: tpu7x:2x2x1
jax: 0.10.0
libtpu: 0.0.40
codegen_flags: <defaults>
</compile_context>

<pallas_src>
import functools

import numpy as np
import jax
import jax.numpy as jnp
from jax.experimental import pallas as pl
from jax.experimental.pallas import tpu as pltpu

# Module hyper-parameters (from LSTMTrain.__init__ defaults).
H = 20          # lstm_hidden_size
NLAYERS = 3     # lstm_n_layers
OUT = 1         # output_size
NFEAT = 4       # fc_n_features  (= lstm_out(1) + x_dense(3))
NEURONS = 80    # fc_n_neurons  (== 4*H, required by the rows-slab packing)
BN_EPS = 1e-5
LRELU_SLOPE = 0.01


def _sigmoid(x):
    return 1.0 / (1.0 + jnp.exp(-x))


def _lrelu(x):
    return jnp.maximum(x, LRELU_SLOPE * x)


def _bn_train_ref(x, gamma, beta):
    mean = jnp.mean(x, axis=0, keepdims=True)
    var = jnp.mean((x - mean) ** 2, axis=0, keepdims=True)
    return (x - mean) * jax.lax.rsqrt(var + BN_EPS) * gamma + beta


def _bn_train_masked(x, gamma, beta, mask, inv_n):
    """BatchNorm1d (train mode) over the real rows only (mask = 1 for real)."""
    mean = jnp.sum(x * mask, axis=0, keepdims=True) * inv_n
    d = (x - mean) * mask
    var = jnp.sum(d * d, axis=0, keepdims=True) * inv_n
    return (x - mean) * jax.lax.rsqrt(var + BN_EPS) * gamma + beta


def lstm_dense_kernel(
    x_ref,        # (Bp, T)   f32   LSTM input (batch, seq); padded rows are 0
    xd_ref,       # (Bp, 3)   f32   dense features
    lstm_w_ref,   # (5, H, 4H) bf16 [w_hh0, w_ih1, w_hh1, w_ih2, w_hh2], gate
                  #                 order (i,f,o,g), i/f/o columns pre-scaled 0.5
    mlp_w_ref,    # (2, 80, 80) f32 fc2, fc3
    rows_ref,     # (22, 80)  f32   packed row parameters (see pack_params)
    out_ref,      # (Bp, OUT) f32
    *, b_real,
):
    Bp = x_ref.shape[0]
    T = x_ref.shape[1]

    # ---- unpack the row slab once ----
    rows = rows_ref[...]
    w1d = rows[0:3, :]                                 # fc1 rows, dense cols
    w1l = rows[3:4, :]                                 # fc1 row, lstm col
    b1 = rows[4:5, :]
    wih0 = rows[5:6, :]                                # layer-0 input->gates (prescaled)
    b_l = [rows[6 + l:7 + l, :] for l in range(NLAYERS)]   # fused, prescaled biases
    b2 = rows[9:10, :]
    b3 = rows[10:11, :]
    bng = [rows[11:12, :], rows[13:14, :], rows[15:16, :]]
    bnb = [rows[12:13, :], rows[14:15, :], rows[16:17, :]]
    ps = rows[17:18, :]                                # gate post-scale (0.5|0.5|0.5|1)
    pb = rows[18:19, :]                                # gate post-shift (0.5|0.5|0.5|0)
    w4 = rows[19:20, :]                                # fc4 weight row (1, 80)
    wfc = rows[20:21, 0:H]                             # fc_lstm weight row (1, H)
    bfc = rows[21:22, 0:1]                             # fc_lstm bias scalar
    b4 = rows[21:22, 1:2]                              # fc4 bias scalar

    # ---- LSTM gate weights (bf16, read once, no per-step slicing) ----
    w0h = lstm_w_ref[0]
    wih = [None, lstm_w_ref[1], lstm_w_ref[3]]
    whh = [None, lstm_w_ref[2], lstm_w_ref[4]]

    # Hoist the layer-0 input contribution out of the recurrence (input_size==1):
    # x[:, t] * wih0 -> (Bp, 4H); no dependency on h/c, so off the serial chain.
    xw = [x_ref[:, t:t + 1] * wih0 for t in range(T)]

    h = [jnp.zeros((Bp, H), jnp.float32) for _ in range(NLAYERS)]
    c = [jnp.zeros((Bp, H), jnp.float32) for _ in range(NLAYERS)]

    # ---- LSTM recurrence; full Python unroll so the (t,l) wavefront is visible ----
    for t in range(T):
        for l in range(NLAYERS):
            if l == 0:
                pre = (xw[t]
                       + jnp.dot(h[0].astype(jnp.bfloat16), w0h,
                                 preferred_element_type=jnp.float32)
                       + b_l[0])
            else:
                # Two independent bf16 dots (overlap on MXU) instead of a lane
                # concat + one fused dot -> no XLU merge on the critical path.
                pre = (jnp.dot(h[l - 1].astype(jnp.bfloat16), wih[l],
                               preferred_element_type=jnp.float32)
                       + jnp.dot(h[l].astype(jnp.bfloat16), whh[l],
                                 preferred_element_type=jnp.float32)
                       + b_l[l])
            # Single full-width tanh: sigmoid(x) = 0.5*tanh(x/2)+0.5 on the
            # i/f/o lanes (the /2 is pre-folded into weights/biases), tanh on g.
            act = jnp.tanh(pre) * ps + pb
            i_g = act[:, 0:H]
            f_g = act[:, H:2 * H]
            o_g = act[:, 2 * H:3 * H]
            g_g = act[:, 3 * H:4 * H]
            c[l] = f_g * c[l] + i_g * g_g
            h[l] = o_g * jnp.tanh(c[l])

    # ---- fc_lstm(out[:, -1, :]) as a lane reduction (no 1-lane weight tile) ----
    lstm_out = jnp.sum(h[-1] * wfc, axis=1, keepdims=True) + bfc

    # ---- dense tail on cat([lstm_out, x_dense], 1); fc1 split per column group ----
    mask = (jax.lax.broadcasted_iota(jnp.int32, (Bp, 1), 0) < b_real
            ).astype(jnp.float32)
    inv_n = 1.0 / float(b_real)

    a = _lrelu(lstm_out)                               # (Bp, 1)
    d = _lrelu(xd_ref[...])                            # (Bp, 3)

    z = a * w1l + jnp.dot(d, w1d, preferred_element_type=jnp.float32) + b1
    z = _lrelu(_bn_train_masked(z, bng[0], bnb[0], mask, inv_n))
    z = jnp.dot(z, mlp_w_ref[0], preferred_element_type=jnp.float32) + b2
    z = _lrelu(_bn_train_masked(z, bng[1], bnb[1], mask, inv_n))
    z = jnp.dot(z, mlp_w_ref[1], preferred_element_type=jnp.float32) + b3
    z = _lrelu(_bn_train_masked(z, bng[2], bnb[2], mask, inv_n))
    z = jnp.sum(z * w4, axis=1, keepdims=True) + b4
    out_ref[...] = _lrelu(z)


def lstm_train_forward(x_lstm, x_dense, packed):
    """x_lstm: (B, T) f32, x_dense: (B, NFEAT-OUT) f32  ->  (B, OUT) f32."""
    B, T = x_lstm.shape
    b_pad = max(8, -(-B // 8) * 8)                     # full sublane occupancy
    pad = b_pad - B
    if pad:
        x_lstm = jnp.pad(x_lstm, ((0, pad), (0, 0)))
        x_dense = jnp.pad(x_dense, ((0, pad), (0, 0)))

    kern = functools.partial(lstm_dense_kernel, b_real=B)
    out = pl.pallas_call(
        kern,
        out_shape=jax.ShapeDtypeStruct((b_pad, OUT), jnp.float32),
        in_specs=[pl.BlockSpec(memory_space=pltpu.MemorySpace.VMEM)] * 5,
        out_specs=pl.BlockSpec(memory_space=pltpu.MemorySpace.VMEM),
    )(x_lstm, x_dense, packed["lstm_w"], packed["mlp_w"], packed["rows"])
    return out[:B]


# ------------------------- parameters (torch layout) -------------------------

def make_params(key):
    """Torch-shaped parameters: LSTM gate order (i,f,g,o), Linear W as (out,in)."""
    ks = iter(jax.random.split(key, 28))

    def u(shape, fan):
        bound = 1.0 / float(np.sqrt(fan))
        return jax.random.uniform(next(ks), shape, jnp.float32, -bound, bound)

    lstm = []
    for l in range(NLAYERS):
        in_size = 1 if l == 0 else H
        lstm.append({
            "w_ih": u((4 * H, in_size), H),
            "w_hh": u((4 * H, H), H),
            "b_ih": u((4 * H,), H),
            "b_hh": u((4 * H,), H),
        })

    p = {
        "lstm": lstm,
        "fc_lstm_w": u((OUT, H), H), "fc_lstm_b": u((OUT,), H),
        "fc1_w": u((NEURONS, NFEAT), NFEAT), "fc1_b": u((NEURONS,), NFEAT),
        "fc2_w": u((NEURONS, NEURONS), NEURONS), "fc2_b": u((NEURONS,), NEURONS),
        "fc3_w": u((NEURONS, NEURONS), NEURONS), "fc3_b": u((NEURONS,), NEURONS),
        "fc4_w": u((OUT, NEURONS), NEURONS), "fc4_b": u((OUT,), NEURONS),
    }
    for i in (1, 2, 3):
        p[f"bn{i}_g"] = jax.random.uniform(next(ks), (NEURONS,), jnp.float32, 0.5, 1.5)
        p[f"bn{i}_b"] = jax.random.uniform(next(ks), (NEURONS,), jnp.float32, -0.1, 0.1)
    return p


def _reorder_gates(x):
    """Torch gate order (i, f, g, o) -> kernel order (i, f, o, g) along axis 0."""
    return jnp.concatenate(
        [x[0:H], x[H:2 * H], x[3 * H:4 * H], x[2 * H:3 * H]], axis=0)


def pack_params(p):
    """Pack torch-layout params into the 3 slabs the kernel consumes."""
    assert NEURONS == 4 * H, "rows slab packing assumes fc_n_neurons == 4*hidden"

    # 0.5 prescale on i/f/o gate columns (sigmoid(x) = 0.5*tanh(x/2)+0.5).
    prescale = jnp.concatenate(
        [jnp.full((3 * H,), 0.5, jnp.float32), jnp.ones((H,), jnp.float32)])

    def gate_cols(w):   # (4H, K) torch layout -> (K, 4H) kernel layout, prescaled
        return _reorder_gates(w).T * prescale[None, :]

    def gate_block(w):  # bf16 MXU operand
        return gate_cols(w).astype(jnp.bfloat16)

    lstm_w = jnp.stack([
        gate_block(p["lstm"][0]["w_hh"]),
        gate_block(p["lstm"][1]["w_ih"]), gate_block(p["lstm"][1]["w_hh"]),
        gate_block(p["lstm"][2]["w_ih"]), gate_block(p["lstm"][2]["w_hh"]),
    ])                                                   # (5, H, 4H) bf16

    wih0 = gate_cols(p["lstm"][0]["w_ih"])               # (1, 4H) f32, prescaled
    lstm_b = [( _reorder_gates(p["lstm"][l]["b_ih"] + p["lstm"][l]["b_hh"])
                * prescale)[None, :] for l in range(NLAYERS)]   # each (1, 4H)

    ps_row = jnp.concatenate(
        [jnp.full((1, 3 * H), 0.5, jnp.float32), jnp.ones((1, H), jnp.float32)], axis=1)
    pb_row = jnp.concatenate(
        [jnp.full((1, 3 * H), 0.5, jnp.float32), jnp.zeros((1, H), jnp.float32)], axis=1)

    scal = jnp.zeros((1, NEURONS), jnp.float32)
    scal = scal.at[0, 0].set(p["fc_lstm_b"][0]).at[0, 1].set(p["fc4_b"][0])

    rows = jnp.concatenate([
        p["fc1_w"][:, OUT:].T,                            # rows 0-2 : fc1 (dense cols)
        p["fc1_w"][:, 0:OUT].T,                           # row  3   : fc1 (lstm col)
        p["fc1_b"][None, :],                              # row  4
        wih0,                                             # row  5
        lstm_b[0], lstm_b[1], lstm_b[2],                  # rows 6-8
        p["fc2_b"][None, :], p["fc3_b"][None, :],         # rows 9-10
        p["bn1_g"][None, :], p["bn1_b"][None, :],         # rows 11-12
        p["bn2_g"][None, :], p["bn2_b"][None, :],         # rows 13-14
        p["bn3_g"][None, :], p["bn3_b"][None, :],         # rows 15-16
        ps_row, pb_row,                                   # rows 17-18
        p["fc4_w"].reshape(1, NEURONS),                   # row  19
        jnp.pad(p["fc_lstm_w"], ((0, 0), (0, NEURONS - H))),  # row 20
        scal,                                             # row  21
    ], axis=0)                                            # (22, NEURONS)

    mlp_w = jnp.stack([p["fc2_w"].T, p["fc3_w"].T])       # (2, NEURONS, NEURONS) f32

    return {"lstm_w": lstm_w, "mlp_w": mlp_w, "rows": rows}


# ------------------------------ pure-JAX reference ---------------------------

def reference_forward(x_lstm, x_dense, p):
    """Pure-JAX f32 reference mirroring torch semantics on torch-layout params."""
    B, T = x_lstm.shape
    h = [jnp.zeros((B, H), jnp.float32) for _ in range(NLAYERS)]
    c = [jnp.zeros((B, H), jnp.float32) for _ in range(NLAYERS)]
    for t in range(T):
        inp = x_lstm[:, t:t + 1]
        for l in range(NLAYERS):
            lp = p["lstm"][l]
            gates = (inp @ lp["w_ih"].T + h[l] @ lp["w_hh"].T
                     + lp["b_ih"] + lp["b_hh"])
            i_g = _sigmoid(gates[:, 0:H])
            f_g = _sigmoid(gates[:, H:2 * H])
            g_g = jnp.tanh(gates[:, 2 * H:3 * H])
            o_g = _sigmoid(gates[:, 3 * H:4 * H])
            c[l] = f_g * c[l] + i_g * g_g
            h[l] = o_g * jnp.tanh(c[l])
            inp = h[l]
    lstm_out = h[-1] @ p["fc_lstm_w"].T + p["fc_lstm_b"]
    x = _lrelu(jnp.concatenate([lstm_out, x_dense], axis=1))
    x = x @ p["fc1_w"].T + p["fc1_b"]
    x = _lrelu(_bn_train_ref(x, p["bn1_g"][None, :], p["bn1_b"][None, :]))
    x = x @ p["fc2_w"].T + p["fc2_b"]
    x = _lrelu(_bn_train_ref(x, p["bn2_g"][None, :], p["bn2_b"][None, :]))
    x = x @ p["fc3_w"].T + p["fc3_b"]
    x = _lrelu(_bn_train_ref(x, p["bn3_g"][None, :], p["bn3_b"][None, :]))
    x = x @ p["fc4_w"].T + p["fc4_b"]
    return _lrelu(x)


if __name__ == "__main__":
    key = jax.random.PRNGKey(0)
    kx, kd, kp = jax.random.split(key, 3)

    B, T = 4, 8
    x_lstm = jax.random.normal(kx, (B, T), jnp.float32)           # (batch, seq)
    x_dense = jax.random.normal(kd, (B, NFEAT - OUT), jnp.float32)
    params = make_params(kp)
    packed = pack_params(params)

    out = lstm_train_forward(x_lstm, x_dense, packed)
    out = jax.block_until_ready(out)
    assert out.shape == (B, OUT)

    ref = reference_forward(x_lstm, x_dense, params)
    # Tolerance covers bf16 MXU inputs on the recurrent gate matmuls.
    np.testing.assert_allclose(np.asarray(out), np.asarray(ref),
                               rtol=2e-2, atol=2e-2)
    print("KERNEL_OK")
</pallas_src>

<mosaic_0001>
module attributes {stable_mosaic.version = 11 : i64} {
  func.func @lstm_dense_kernel(%arg0: memref<8x8xf32, #tpu.memory_space<vmem>>, %arg1: memref<8x3xf32, #tpu.memory_space<vmem>>, %arg2: memref<5x20x80xbf16, #tpu.memory_space<vmem>>, %arg3: memref<2x80x80xf32, #tpu.memory_space<vmem>>, %arg4: memref<22x80xf32, #tpu.memory_space<vmem>>, %arg5: memref<8x1xf32, #tpu.memory_space<vmem>>) attributes {dimension_semantics = [], scalar_prefetch = 0 : i64, scratch_operands = 0 : i64, tpu.core_type = #tpu.core_type<tc>} {
    %c0 = arith.constant 0 : index
    %c0_0 = arith.constant 0 : index
    %0 = vector.load %arg4[%c0, %c0_0] : memref<22x80xf32, #tpu.memory_space<vmem>>, vector<22x80xf32>
    %1 = vector.extract_strided_slice %0 {offsets = [0, 0], sizes = [3, 80], strides = [1, 1]} : vector<22x80xf32> to vector<3x80xf32>
    %2 = vector.extract_strided_slice %0 {offsets = [3, 0], sizes = [1, 80], strides = [1, 1]} : vector<22x80xf32> to vector<1x80xf32>
    %3 = vector.extract_strided_slice %0 {offsets = [4, 0], sizes = [1, 80], strides = [1, 1]} : vector<22x80xf32> to vector<1x80xf32>
    %4 = vector.extract_strided_slice %0 {offsets = [5, 0], sizes = [1, 80], strides = [1, 1]} : vector<22x80xf32> to vector<1x80xf32>
    %5 = vector.extract_strided_slice %0 {offsets = [6, 0], sizes = [1, 80], strides = [1, 1]} : vector<22x80xf32> to vector<1x80xf32>
    %6 = vector.extract_strided_slice %0 {offsets = [7, 0], sizes = [1, 80], strides = [1, 1]} : vector<22x80xf32> to vector<1x80xf32>
    %7 = vector.extract_strided_slice %0 {offsets = [8, 0], sizes = [1, 80], strides = [1, 1]} : vector<22x80xf32> to vector<1x80xf32>
    %8 = vector.extract_strided_slice %0 {offsets = [9, 0], sizes = [1, 80], strides = [1, 1]} : vector<22x80xf32> to vector<1x80xf32>
    %9 = vector.extract_strided_slice %0 {offsets = [10, 0], sizes = [1, 80], strides = [1, 1]} : vector<22x80xf32> to vector<1x80xf32>
    %10 = vector.extract_strided_slice %0 {offsets = [11, 0], sizes = [1, 80], strides = [1, 1]} : vector<22x80xf32> to vector<1x80xf32>
    %11 = vector.extract_strided_slice %0 {offsets = [13, 0], sizes = [1, 80], strides = [1, 1]} : vector<22x80xf32> to vector<1x80xf32>
    %12 = vector.extract_strided_slice %0 {offsets = [15, 0], sizes = [1, 80], strides = [1, 1]} : vector<22x80xf32> to vector<1x80xf32>
    %13 = vector.extract_strided_slice %0 {offsets = [12, 0], sizes = [1, 80], strides = [1, 1]} : vector<22x80xf32> to vector<1x80xf32>
    %14 = vector.extract_strided_slice %0 {offsets = [14, 0], sizes = [1, 80], strides = [1, 1]} : vector<22x80xf32> to vector<1x80xf32>
    %15 = vector.extract_strided_slice %0 {offsets = [16, 0], sizes = [1, 80], strides = [1, 1]} : vector<22x80xf32> to vector<1x80xf32>
    %16 = vector.extract_strided_slice %0 {offsets = [17, 0], sizes = [1, 80], strides = [1, 1]} : vector<22x80xf32> to vector<1x80xf32>
    %17 = vector.extract_strided_slice %0 {offsets = [18, 0], sizes = [1, 80], strides = [1, 1]} : vector<22x80xf32> to vector<1x80xf32>
    %18 = vector.extract_strided_slice %0 {offsets = [19, 0], sizes = [1, 80], strides = [1, 1]} : vector<22x80xf32> to vector<1x80xf32>
    %19 = vector.extract_strided_slice %0 {offsets = [20, 0], sizes = [1, 20], strides = [1, 1]} : vector<22x80xf32> to vector<1x20xf32>
    %20 = vector.extract_strided_slice %0 {offsets = [21, 0], sizes = [1, 1], strides = [1, 1]} : vector<22x80xf32> to vector<1x1xf32>
    %21 = vector.extract_strided_slice %0 {offsets = [21, 1], sizes = [1, 1], strides = [1, 1]} : vector<22x80xf32> to vector<1x1xf32>
    %c0_1 = arith.constant 0 : index
    %c0_2 = arith.constant 0 : index
    %c0_3 = arith.constant 0 : index
    %22 = vector.load %arg2[%c0_1, %c0_2, %c0_3] : memref<5x20x80xbf16, #tpu.memory_space<vmem>>, vector<1x20x80xbf16>
    %23 = vector.shape_cast %22 : vector<1x20x80xbf16> to vector<20x80xbf16>
    %c1 = arith.constant 1 : index
    %c0_4 = arith.constant 0 : index
    %c0_5 = arith.constant 0 : index
    %24 = vector.load %arg2[%c1, %c0_4, %c0_5] : memref<5x20x80xbf16, #tpu.memory_space<vmem>>, vector<1x20x80xbf16>
    %25 = vector.shape_cast %24 : vector<1x20x80xbf16> to vector<20x80xbf16>
    %c3 = arith.constant 3 : index
    %c0_6 = arith.constant 0 : index
    %c0_7 = arith.constant 0 : index
    %26 = vector.load %arg2[%c3, %c0_6, %c0_7] : memref<5x20x80xbf16, #tpu.memory_space<vmem>>, vector<1x20x80xbf16>
    %27 = vector.shape_cast %26 : vector<1x20x80xbf16> to vector<20x80xbf16>
    %c2 = arith.constant 2 : index
    %c0_8 = arith.constant 0 : index
    %c0_9 = arith.constant 0 : index
    %28 = vector.load %arg2[%c2, %c0_8, %c0_9] : memref<5x20x80xbf16, #tpu.memory_space<vmem>>, vector<1x20x80xbf16>
    %29 = vector.shape_cast %28 : vector<1x20x80xbf16> to vector<20x80xbf16>
    %c4 = arith.constant 4 : index
    %c0_10 = arith.constant 0 : index
    %c0_11 = arith.constant 0 : index
    %30 = vector.load %arg2[%c4, %c0_10, %c0_11] : memref<5x20x80xbf16, #tpu.memory_space<vmem>>, vector<1x20x80xbf16>
    %31 = vector.shape_cast %30 : vector<1x20x80xbf16> to vector<20x80xbf16>
    %c0_12 = arith.constant 0 : index
    %c0_13 = arith.constant 0 : index
    %32 = vector.load %arg0[%c0_12, %c0_13] : memref<8x8xf32, #tpu.memory_space<vmem>>, vector<8x1xf32>
    %33 = vector.broadcast %32 : vector<8x1xf32> to vector<8x80xf32>
    %34 = vector.broadcast %4 : vector<1x80xf32> to vector<8x80xf32>
    %35 = arith.mulf %33, %34 : vector<8x80xf32>
    %c0_14 = arith.constant 0 : index
    %c1_15 = arith.constant 1 : index
    %36 = vector.load %arg0[%c0_14, %c1_15] : memref<8x8xf32, #tpu.memory_space<vmem>>, vector<8x1xf32>
    %37 = vector.broadcast %36 : vector<8x1xf32> to vector<8x80xf32>
    %38 = vector.broadcast %4 : vector<1x80xf32> to vector<8x80xf32>
    %39 = arith.mulf %37, %38 : vector<8x80xf32>
    %c0_16 = arith.constant 0 : index
    %c2_17 = arith.constant 2 : index
    %40 = vector.load %arg0[%c0_16, %c2_17] : memref<8x8xf32, #tpu.memory_space<vmem>>, vector<8x1xf32>
    %41 = vector.broadcast %40 : vector<8x1xf32> to vector<8x80xf32>
    %42 = vector.broadcast %4 : vector<1x80xf32> to vector<8x80xf32>
    %43 = arith.mulf %41, %42 : vector<8x80xf32>
    %c0_18 = arith.constant 0 : index
    %c3_19 = arith.constant 3 : index
    %44 = vector.load %arg0[%c0_18, %c3_19] : memref<8x8xf32, #tpu.memory_space<vmem>>, vector<8x1xf32>
    %45 = vector.broadcast %44 : vector<8x1xf32> to vector<8x80xf32>
    %46 = vector.broadcast %4 : vector<1x80xf32> to vector<8x80xf32>
    %47 = arith.mulf %45, %46 : vector<8x80xf32>
    %c0_20 = arith.constant 0 : index
    %c4_21 = arith.constant 4 : index
    %48 = vector.load %arg0[%c0_20, %c4_21] : memref<8x8xf32, #tpu.memory_space<vmem>>, vector<8x1xf32>
    %49 = vector.broadcast %48 : vector<8x1xf32> to vector<8x80xf32>
    %50 = vector.broadcast %4 : vector<1x80xf32> to vector<8x80xf32>
    %51 = arith.mulf %49, %50 : vector<8x80xf32>
    %c0_22 = arith.constant 0 : index
    %c5 = arith.constant 5 : index
    %52 = vector.load %arg0[%c0_22, %c5] : memref<8x8xf32, #tpu.memory_space<vmem>>, vector<8x1xf32>
    %53 = vector.broadcast %52 : vector<8x1xf32> to vector<8x80xf32>
    %54 = vector.broadcast %4 : vector<1x80xf32> to vector<8x80xf32>
    %55 = arith.mulf %53, %54 : vector<8x80xf32>
    %c0_23 = arith.constant 0 : index
    %c6 = arith.constant 6 : index
    %56 = vector.load %arg0[%c0_23, %c6] : memref<8x8xf32, #tpu.memory_space<vmem>>, vector<8x1xf32>
    %57 = vector.broadcast %56 : vector<8x1xf32> to vector<8x80xf32>
    %58 = vector.broadcast %4 : vector<1x80xf32> to vector<8x80xf32>
    %59 = arith.mulf %57, %58 : vector<8x80xf32>
    %c0_24 = arith.constant 0 : index
    %c7 = arith.constant 7 : index
    %60 = vector.load %arg0[%c0_24, %c7] : memref<8x8xf32, #tpu.memory_space<vmem>>, vector<8x1xf32>
    %61 = vector.broadcast %60 : vector<8x1xf32> to vector<8x80xf32>
    %62 = vector.broadcast %4 : vector<1x80xf32> to vector<8x80xf32>
    %63 = arith.mulf %61, %62 : vector<8x80xf32>
    %cst = arith.constant 0.000000e+00 : f32
    %64 = vector.broadcast %cst : f32 to vector<8x20xf32>
    %cst_25 = arith.constant 0.000000e+00 : f32
    %65 = vector.broadcast %cst_25 : f32 to vector<8x20xf32>
    %cst_26 = arith.constant 0.000000e+00 : f32
    %66 = vector.broadcast %cst_26 : f32 to vector<8x20xf32>
    %cst_27 = arith.constant 0.000000e+00 : f32
    %67 = vector.broadcast %cst_27 : f32 to vector<8x20xf32>
    %cst_28 = arith.constant 0.000000e+00 : f32
    %68 = vector.broadcast %cst_28 : f32 to vector<8x20xf32>
    %cst_29 = arith.constant 0.000000e+00 : f32
    %69 = vector.broadcast %cst_29 : f32 to vector<8x20xf32>
    %70 = arith.truncf %64 : vector<8x20xf32> to vector<8x20xbf16>
    %cst_30 = arith.constant dense<0.000000e+00> : vector<8x80xf32>
    %71 = tpu.matmul %70, %23, %cst_30 {dimension_numbers = #tpu.dot_dimension_numbers<[1], [0], [0], [1], [0, 0, 1, 1], [], []>} : vector<8x20xbf16>, vector<20x80xbf16>, vector<8x80xf32> -> vector<8x80xf32>
    %72 = arith.addf %35, %71 : vector<8x80xf32>
    %73 = vector.broadcast %5 : vector<1x80xf32> to vector<8x80xf32>
    %74 = arith.addf %72, %73 : vector<8x80xf32>
    %75 = math.tanh %74 : vector<8x80xf32>
    %76 = vector.broadcast %16 : vector<1x80xf32> to vector<8x80xf32>
    %77 = arith.mulf %75, %76 : vector<8x80xf32>
    %78 = vector.broadcast %17 : vector<1x80xf32> to vector<8x80xf32>
    %79 = arith.addf %77, %78 : vector<8x80xf32>
    %80 = vector.extract_strided_slice %79 {offsets = [0, 0], sizes = [8, 20], strides = [1, 1]} : vector<8x80xf32> to vector<8x20xf32>
    %81 = vector.extract_strided_slice %79 {offsets = [0, 20], sizes = [8, 20], strides = [1, 1]} : vector<8x80xf32> to vector<8x20xf32>
    %82 = vector.extract_strided_slice %79 {offsets = [0, 40], sizes = [8, 20], strides = [1, 1]} : vector<8x80xf32> to vector<8x20xf32>
    %83 = vector.extract_strided_slice %79 {offsets = [0, 60], sizes = [8, 20], strides = [1, 1]} : vector<8x80xf32> to vector<8x20xf32>
    %84 = arith.mulf %81, %67 : vector<8x20xf32>
    %85 = arith.mulf %80, %83 : vector<8x20xf32>
    %86 = arith.addf %84, %85 : vector<8x20xf32>
    %87 = math.tanh %86 : vector<8x20xf32>
    %88 = arith.mulf %82, %87 : vector<8x20xf32>
    %89 = arith.truncf %88 : vector<8x20xf32> to vector<8x20xbf16>
    %cst_31 = arith.constant dense<0.000000e+00> : vector<8x80xf32>
    %90 = tpu.matmul %89, %25, %cst_31 {dimension_numbers = #tpu.dot_dimension_numbers<[1], [0], [0], [1], [0, 0, 1, 1], [], []>} : vector<8x20xbf16>, vector<20x80xbf16>, vector<8x80xf32> -> vector<8x80xf32>
    %91 = arith.truncf %65 : vector<8x20xf32> to vector<8x20xbf16>
    %cst_32 = arith.constant dense<0.000000e+00> : vector<8x80xf32>
    %92 = tpu.matmul %91, %29, %cst_32 {dimension_numbers = #tpu.dot_dimension_numbers<[1], [0], [0], [1], [0, 0, 1, 1], [], []>} : vector<8x20xbf16>, vector<20x80xbf16>, vector<8x80xf32> -> vector<8x80xf32>
    %93 = arith.addf %90, %92 : vector<8x80xf32>
    %94 = vector.broadcast %6 : vector<1x80xf32> to vector<8x80xf32>
    %95 = arith.addf %93, %94 : vector<8x80xf32>
    %96 = math.tanh %95 : vector<8x80xf32>
    %97 = vector.broadcast %16 : vector<1x80xf32> to vector<8x80xf32>
    %98 = arith.mulf %96, %97 : vector<8x80xf32>
    %99 = vector.broadcast %17 : vector<1x80xf32> to vector<8x80xf32>
    %100 = arith.addf %98, %99 : vector<8x80xf32>
    %101 = vector.extract_strided_slice %100 {offsets = [0, 0], sizes = [8, 20], strides = [1, 1]} : vector<8x80xf32> to vector<8x20xf32>
    %102 = vector.extract_strided_slice %100 {offsets = [0, 20], sizes = [8, 20], strides = [1, 1]} : vector<8x80xf32> to vector<8x20xf32>
    %103 = vector.extract_strided_slice %100 {offsets = [0, 40], sizes = [8, 20], strides = [1, 1]} : vector<8x80xf32> to vector<8x20xf32>
    %104 = vector.extract_strided_slice %100 {offsets = [0, 60], sizes = [8, 20], strides = [1, 1]} : vector<8x80xf32> to vector<8x20xf32>
    %105 = arith.mulf %102, %68 : vector<8x20xf32>
    %106 = arith.mulf %101, %104 : vector<8x20xf32>
    %107 = arith.addf %105, %106 : vector<8x20xf32>
    %108 = math.tanh %107 : vector<8x20xf32>
    %109 = arith.mulf %103, %108 : vector<8x20xf32>
    %110 = arith.truncf %109 : vector<8x20xf32> to vector<8x20xbf16>
    %cst_33 = arith.constant dense<0.000000e+00> : vector<8x80xf32>
    %111 = tpu.matmul %110, %27, %cst_33 {dimension_numbers = #tpu.dot_dimension_numbers<[1], [0], [0], [1], [0, 0, 1, 1], [], []>} : vector<8x20xbf16>, vector<20x80xbf16>, vector<8x80xf32> -> vector<8x80xf32>
    %112 = arith.truncf %66 : vector<8x20xf32> to vector<8x20xbf16>
    %cst_34 = arith.constant dense<0.000000e+00> : vector<8x80xf32>
    %113 = tpu.matmul %112, %31, %cst_34 {dimension_numbers = #tpu.dot_dimension_numbers<[1], [0], [0], [1], [0, 0, 1, 1], [], []>} : vector<8x20xbf16>, vector<20x80xbf16>, vector<8x80xf32> -> vector<8x80xf32>
    %114 = arith.addf %111, %113 : vector<8x80xf32>
    %115 = vector.broadcast %7 : vector<1x80xf32> to vector<8x80xf32>
    %116 = arith.addf %114, %115 : vector<8x80xf32>
    %117 = math.tanh %116 : vector<8x80xf32>
    %118 = vector.broadcast %16 : vector<1x80xf32> to vector<8x80xf32>
    %119 = arith.mulf %117, %118 : vector<8x80xf32>
    %120 = vector.broadcast %17 : vector<1x80xf32> to vector<8x80xf32>
    %121 = arith.addf %119, %120 : vector<8x80xf32>
    %122 = vector.extract_strided_slice %121 {offsets = [0, 0], sizes = [8, 20], strides = [1, 1]} : vector<8x80xf32> to vector<8x20xf32>
    %123 = vector.extract_strided_slice %121 {offsets = [0, 20], sizes = [8, 20], strides = [1, 1]} : vector<8x80xf32> to vector<8x20xf32>
    %124 = vector.extract_strided_slice %121 {offsets = [0, 40], sizes = [8, 20], strides = [1, 1]} : vector<8x80xf32> to vector<8x20xf32>
    %125 = vector.extract_strided_slice %121 {offsets = [0, 60], sizes = [8, 20], strides = [1, 1]} : vector<8x80xf32> to vector<8x20xf32>
    %126 = arith.mulf %123, %69 : vector<8x20xf32>
    %127 = arith.mulf %122, %125 : vector<8x20xf32>
    %128 = arith.addf %126, %127 : vector<8x20xf32>
    %129 = math.tanh %128 : vector<8x20xf32>
    %130 = arith.mulf %124, %129 : vector<8x20xf32>
    %131 = arith.truncf %88 : vector<8x20xf32> to vector<8x20xbf16>
    %cst_35 = arith.constant dense<0.000000e+00> : vector<8x80xf32>
    %132 = tpu.matmul %131, %23, %cst_35 {dimension_numbers = #tpu.dot_dimension_numbers<[1], [0], [0], [1], [0, 0, 1, 1], [], []>} : vector<8x20xbf16>, vector<20x80xbf16>, vector<8x80xf32> -> vector<8x80xf32>
    %133 = arith.addf %39, %132 : vector<8x80xf32>
    %134 = vector.broadcast %5 : vector<1x80xf32> to vector<8x80xf32>
    %135 = arith.addf %133, %134 : vector<8x80xf32>
    %136 = math.tanh %135 : vector<8x80xf32>
    %137 = vector.broadcast %16 : vector<1x80xf32> to vector<8x80xf32>
    %138 = arith.mulf %136, %137 : vector<8x80xf32>
    %139 = vector.broadcast %17 : vector<1x80xf32> to vector<8x80xf32>
    %140 = arith.addf %138, %139 : vector<8x80xf32>
    %141 = vector.extract_strided_slice %140 {offsets = [0, 0], sizes = [8, 20], strides = [1, 1]} : vector<8x80xf32> to vector<8x20xf32>
    %142 = vector.extract_strided_slice %140 {offsets = [0, 20], sizes = [8, 20], strides = [1, 1]} : vector<8x80xf32> to vector<8x20xf32>
    %143 = vector.extract_strided_slice %140 {offsets = [0, 40], sizes = [8, 20], strides = [1, 1]} : vector<8x80xf32> to vector<8x20xf32>
    %144 = vector.extract_strided_slice %140 {offsets = [0, 60], sizes = [8, 20], strides = [1, 1]} : vector<8x80xf32> to vector<8x20xf32>
    %145 = arith.mulf %142, %86 : vector<8x20xf32>
    %146 = arith.mulf %141, %144 : vector<8x20xf32>
    %147 = arith.addf %145, %146 : vector<8x20xf32>
    %148 = math.tanh %147 : vector<8x20xf32>
    %149 = arith.mulf %143, %148 : vector<8x20xf32>
    %150 = arith.truncf %149 : vector<8x20xf32> to vector<8x20xbf16>
    %cst_36 = arith.constant dense<0.000000e+00> : vector<8x80xf32>
    %151 = tpu.matmul %150, %25, %cst_36 {dimension_numbers = #tpu.dot_dimension_numbers<[1], [0], [0], [1], [0, 0, 1, 1], [], []>} : vector<8x20xbf16>, vector<20x80xbf16>, vector<8x80xf32> -> vector<8x80xf32>
    %152 = arith.truncf %109 : vector<8x20xf32> to vector<8x20xbf16>
    %cst_37 = arith.constant dense<0.000000e+00> : vector<8x80xf32>
    %153 = tpu.matmul %152, %29, %cst_37 {dimension_numbers = #tpu.dot_dimension_numbers<[1], [0], [0], [1], [0, 0, 1, 1], [], []>} : vector<8x20xbf16>, vector<20x80xbf16>, vector<8x80xf32> -> vector<8x80xf32>
    %154 = arith.addf %151, %153 : vector<8x80xf32>
    %155 = vector.broadcast %6 : vector<1x80xf32> to vector<8x80xf32>
    %156 = arith.addf %154, %155 : vector<8x80xf32>
    %157 = math.tanh %156 : vector<8x80xf32>
    %158 = vector.broadcast %16 : vector<1x80xf32> to vector<8x80xf32>
    %159 = arith.mulf %157, %158 : vector<8x80xf32>
    %160 = vector.broadcast %17 : vector<1x80xf32> to vector<8x80xf32>
    %161 = arith.addf %159, %160 : vector<8x80xf32>
    %162 = vector.extract_strided_slice %161 {offsets = [0, 0], sizes = [8, 20], strides = [1, 1]} : vector<8x80xf32> to vector<8x20xf32>
    %163 = vector.extract_strided_slice %161 {offsets = [0, 20], sizes = [8, 20], strides = [1, 1]} : vector<8x80xf32> to vector<8x20xf32>
    %164 = vector.extract_strided_slice %161 {offsets = [0, 40], sizes = [8, 20], strides = [1, 1]} : vector<8x80xf32> to vector<8x20xf32>
    %165 = vector.extract_strided_slice %161 {offsets = [0, 60], sizes = [8, 20], strides = [1, 1]} : vector<8x80xf32> to vector<8x20xf32>
    %166 = arith.mulf %163, %107 : vector<8x20xf32>
    %167 = arith.mulf %162, %165 : vector<8x20xf32>
    %168 = arith.addf %166, %167 : vector<8x20xf32>
    %169 = math.tanh %168 : vector<8x20xf32>
    %170 = arith.mulf %164, %169 : vector<8x20xf32>
    %171 = arith.truncf %170 : vector<8x20xf32> to vector<8x20xbf16>
    %cst_38 = arith.constant dense<0.000000e+00> : vector<8x80xf32>
    %172 = tpu.matmul %171, %27, %cst_38 {dimension_numbers = #tpu.dot_dimension_numbers<[1], [0], [0], [1], [0, 0, 1, 1], [], []>} : vector<8x20xbf16>, vector<20x80xbf16>, vector<8x80xf32> -> vector<8x80xf32>
    %173 = arith.truncf %130 : vector<8x20xf32> to vector<8x20xbf16>
    %cst_39 = arith.constant dense<0.000000e+00> : vector<8x80xf32>
    %174 = tpu.matmul %173, %31, %cst_39 {dimension_numbers = #tpu.dot_dimension_numbers<[1], [0], [0], [1], [0, 0, 1, 1], [], []>} : vector<8x20xbf16>, vector<20x80xbf16>, vector<8x80xf32> -> vector<8x80xf32>
    %175 = arith.addf %172, %174 : vector<8x80xf32>
    %176 = vector.broadcast %7 : vector<1x80xf32> to vector<8x80xf32>
    %177 = arith.addf %175, %176 : vector<8x80xf32>
    %178 = math.tanh %177 : vector<8x80xf32>
    %179 = vector.broadcast %16 : vector<1x80xf32> to vector<8x80xf32>
    %180 = arith.mulf %178, %179 : vector<8x80xf32>
    %181 = vector.broadcast %17 : vector<1x80xf32> to vector<8x80xf32>
    %182 = arith.addf %180, %181 : vector<8x80xf32>
    %183 = vector.extract_strided_slice %182 {offsets = [0, 0], sizes = [8, 20], strides = [1, 1]} : vector<8x80xf32> to vector<8x20xf32>
    %184 = vector.extract_strided_slice %182 {offsets = [0, 20], sizes = [8, 20], strides = [1, 1]} : vector<8x80xf32> to vector<8x20xf32>
    %185 = vector.extract_strided_slice %182 {offsets = [0, 40], sizes = [8, 20], strides = [1, 1]} : vector<8x80xf32> to vector<8x20xf32>
    %186 = vector.extract_strided_slice %182 {offsets = [0, 60], sizes = [8, 20], strides = [1, 1]} : vector<8x80xf32> to vector<8x20xf32>
    %187 = arith.mulf %184, %128 : vector<8x20xf32>
    %188 = arith.mulf %183, %186 : vector<8x20xf32>
    %189 = arith.addf %187, %188 : vector<8x20xf32>
    %190 = math.tanh %189 : vector<8x20xf32>
    %191 = arith.mulf %185, %190 : vector<8x20xf32>
    %192 = arith.truncf %149 : vector<8x20xf32> to vector<8x20xbf16>
    %cst_40 = arith.constant dense<0.000000e+00> : vector<8x80xf32>
    %193 = tpu.matmul %192, %23, %cst_40 {dimension_numbers = #tpu.dot_dimension_numbers<[1], [0], [0], [1], [0, 0, 1, 1], [], []>} : vector<8x20xbf16>, vector<20x80xbf16>, vector<8x80xf32> -> vector<8x80xf32>
    %194 = arith.addf %43, %193 : vector<8x80xf32>
    %195 = vector.broadcast %5 : vector<1x80xf32> to vector<8x80xf32>
    %196 = arith.addf %194, %195 : vector<8x80xf32>
    %197 = math.tanh %196 : vector<8x80xf32>
    %198 = vector.broadcast %16 : vector<1x80xf32> to vector<8x80xf32>
    %199 = arith.mulf %197, %198 : vector<8x80xf32>
    %200 = vector.broadcast %17 : vector<1x80xf32> to vector<8x80xf32>
    %201 = arith.addf %199, %200 : vector<8x80xf32>
    %202 = vector.extract_strided_slice %201 {offsets = [0, 0], sizes = [8, 20], strides = [1, 1]} : vector<8x80xf32> to vector<8x20xf32>
    %203 = vector.extract_strided_slice %201 {offsets = [0, 20], sizes = [8, 20], strides = [1, 1]} : vector<8x80xf32> to vector<8x20xf32>
    %204 = vector.extract_strided_slice %201 {offsets = [0, 40], sizes = [8, 20], strides = [1, 1]} : vector<8x80xf32> to vector<8x20xf32>
    %205 = vector.extract_strided_slice %201 {offsets = [0, 60], sizes = [8, 20], strides = [1, 1]} : vector<8x80xf32> to vector<8x20xf32>
    %206 = arith.mulf %203, %147 : vector<8x20xf32>
    %207 = arith.mulf %202, %205 : vector<8x20xf32>
    %208 = arith.addf %206, %207 : vector<8x20xf32>
    %209 = math.tanh %208 : vector<8x20xf32>
    %210 = arith.mulf %204, %209 : vector<8x20xf32>
    %211 = arith.truncf %210 : vector<8x20xf32> to vector<8x20xbf16>
    %cst_41 = arith.constant dense<0.000000e+00> : vector<8x80xf32>
    %212 = tpu.matmul %211, %25, %cst_41 {dimension_numbers = #tpu.dot_dimension_numbers<[1], [0], [0], [1], [0, 0, 1, 1], [], []>} : vector<8x20xbf16>, vector<20x80xbf16>, vector<8x80xf32> -> vector<8x80xf32>
    %213 = arith.truncf %170 : vector<8x20xf32> to vector<8x20xbf16>
    %cst_42 = arith.constant dense<0.000000e+00> : vector<8x80xf32>
    %214 = tpu.matmul %213, %29, %cst_42 {dimension_numbers = #tpu.dot_dimension_numbers<[1], [0], [0], [1], [0, 0, 1, 1], [], []>} : vector<8x20xbf16>, vector<20x80xbf16>, vector<8x80xf32> -> vector<8x80xf32>
    %215 = arith.addf %212, %214 : vector<8x80xf32>
    %216 = vector.broadcast %6 : vector<1x80xf32> to vector<8x80xf32>
    %217 = arith.addf %215, %216 : vector<8x80xf32>
    %218 = math.tanh %217 : vector<8x80xf32>
    %219 = vector.broadcast %16 : vector<1x80xf32> to vector<8x80xf32>
    %220 = arith.mulf %218, %219 : vector<8x80xf32>
    %221 = vector.broadcast %17 : vector<1x80xf32> to vector<8x80xf32>
    %222 = arith.addf %220, %221 : vector<8x80xf32>
    %223 = vector.extract_strided_slice %222 {offsets = [0, 0], sizes = [8, 20], strides = [1, 1]} : vector<8x80xf32> to vector<8x20xf32>
    %224 = vector.extract_strided_slice %222 {offsets = [0, 20], sizes = [8, 20], strides = [1, 1]} : vector<8x80xf32> to vector<8x20xf32>
    %225 = vector.extract_strided_slice %222 {offsets = [0, 40], sizes = [8, 20], strides = [1, 1]} : vector<8x80xf32> to vector<8x20xf32>
    %226 = vector.extract_strided_slice %222 {offsets = [0, 60], sizes = [8, 20], strides = [1, 1]} : vector<8x80xf32> to vector<8x20xf32>
    %227 = arith.mulf %224, %168 : vector<8x20xf32>
    %228 = arith.mulf %223, %226 : vector<8x20xf32>
    %229 = arith.addf %227, %228 : vector<8x20xf32>
    %230 = math.tanh %229 : vector<8x20xf32>
    %231 = arith.mulf %225, %230 : vector<8x20xf32>
    %232 = arith.truncf %231 : vector<8x20xf32> to vector<8x20xbf16>
    %cst_43 = arith.constant dense<0.000000e+00> : vector<8x80xf32>
    %233 = tpu.matmul %232, %27, %cst_43 {dimension_numbers = #tpu.dot_dimension_numbers<[1], [0], [0], [1], [0, 0, 1, 1], [], []>} : vector<8x20xbf16>, vector<20x80xbf16>, vector<8x80xf32> -> vector<8x80xf32>
    %234 = arith.truncf %191 : vector<8x20xf32> to vector<8x20xbf16>
    %cst_44 = arith.constant dense<0.000000e+00> : vector<8x80xf32>
    %235 = tpu.matmul %234, %31, %cst_44 {dimension_numbers = #tpu.dot_dimension_numbers<[1], [0], [0], [1], [0, 0, 1, 1], [], []>} : vector<8x20xbf16>, vector<20x80xbf16>, vector<8x80xf32> -> vector<8x80xf32>
    %236 = arith.addf %233, %235 : vector<8x80xf32>
    %237 = vector.broadcast %7 : vector<1x80xf32> to vector<8x80xf32>
    %238 = arith.addf %236, %237 : vector<8x80xf32>
    %239 = math.tanh %238 : vector<8x80xf32>
    %240 = vector.broadcast %16 : vector<1x80xf32> to vector<8x80xf32>
    %241 = arith.mulf %239, %240 : vector<8x80xf32>
    %242 = vector.broadcast %17 : vector<1x80xf32> to vector<8x80xf32>
    %243 = arith.addf %241, %242 : vector<8x80xf32>
    %244 = vector.extract_strided_slice %243 {offsets = [0, 0], sizes = [8, 20], strides = [1, 1]} : vector<8x80xf32> to vector<8x20xf32>
    %245 = vector.extract_strided_slice %243 {offsets = [0, 20], sizes = [8, 20], strides = [1, 1]} : vector<8x80xf32> to vector<8x20xf32>
    %246 = vector.extract_strided_slice %243 {offsets = [0, 40], sizes = [8, 20], strides = [1, 1]} : vector<8x80xf32> to vector<8x20xf32>
    %247 = vector.extract_strided_slice %243 {offsets = [0, 60], sizes = [8, 20], strides = [1, 1]} : vector<8x80xf32> to vector<8x20xf32>
    %248 = arith.mulf %245, %189 : vector<8x20xf32>
    %249 = arith.mulf %244, %247 : vector<8x20xf32>
    %250 = arith.addf %248, %249 : vector<8x20xf32>
    %251 = math.tanh %250 : vector<8x20xf32>
    %252 = arith.mulf %246, %251 : vector<8x20xf32>
    %253 = arith.truncf %210 : vector<8x20xf32> to vector<8x20xbf16>
    %cst_45 = arith.constant dense<0.000000e+00> : vector<8x80xf32>
    %254 = tpu.matmul %253, %23, %cst_45 {dimension_numbers = #tpu.dot_dimension_numbers<[1], [0], [0], [1], [0, 0, 1, 1], [], []>} : vector<8x20xbf16>, vector<20x80xbf16>, vector<8x80xf32> -> vector<8x80xf32>
    %255 = arith.addf %47, %254 : vector<8x80xf32>
    %256 = vector.broadcast %5 : vector<1x80xf32> to vector<8x80xf32>
    %257 = arith.addf %255, %256 : vector<8x80xf32>
    %258 = math.tanh %257 : vector<8x80xf32>
    %259 = vector.broadcast %16 : vector<1x80xf32> to vector<8x80xf32>
    %260 = arith.mulf %258, %259 : vector<8x80xf32>
    %261 = vector.broadcast %17 : vector<1x80xf32> to vector<8x80xf32>
    %262 = arith.addf %260, %261 : vector<8x80xf32>
    %263 = vector.extract_strided_slice %262 {offsets = [0, 0], sizes = [8, 20], strides = [1, 1]} : vector<8x80xf32> to vector<8x20xf32>
    %264 = vector.extract_strided_slice %262 {offsets = [0, 20], sizes = [8, 20], strides = [1, 1]} : vector<8x80xf32> to vector<8x20xf32>
    %265 = vector.extract_strided_slice %262 {offsets = [0, 40], sizes = [8, 20], strides = [1, 1]} : vector<8x80xf32> to vector<8x20xf32>
    %266 = vector.extract_strided_slice %262 {offsets = [0, 60], sizes = [8, 20], strides = [1, 1]} : vector<8x80xf32> to vector<8x20xf32>
    %267 = arith.mulf %264, %208 : vector<8x20xf32>
    %268 = arith.mulf %263, %266 : vector<8x20xf32>
    %269 = arith.addf %267, %268 : vector<8x20xf32>
    %270 = math.tanh %269 : vector<8x20xf32>
    %271 = arith.mulf %265, %270 : vector<8x20xf32>
    %272 = arith.truncf %271 : vector<8x20xf32> to vector<8x20xbf16>
    %cst_46 = arith.constant dense<0.000000e+00> : vector<8x80xf32>
    %273 = tpu.matmul %272, %25, %cst_46 {dimension_numbers = #tpu.dot_dimension_numbers<[1], [0], [0], [1], [0, 0, 1, 1], [], []>} : vector<8x20xbf16>, vector<20x80xbf16>, vector<8x80xf32> -> vector<8x80xf32>
    %274 = arith.truncf %231 : vector<8x20xf32> to vector<8x20xbf16>
    %cst_47 = arith.constant dense<0.000000e+00> : vector<8x80xf32>
    %275 = tpu.matmul %274, %29, %cst_47 {dimension_numbers = #tpu.dot_dimension_numbers<[1], [0], [0], [1], [0, 0, 1, 1], [], []>} : vector<8x20xbf16>, vector<20x80xbf16>, vector<8x80xf32> -> vector<8x80xf32>
    %276 = arith.addf %273, %275 : vector<8x80xf32>
    %277 = vector.broadcast %6 : vector<1x80xf32> to vector<8x80xf32>
    %278 = arith.addf %276, %277 : vector<8x80xf32>
    %279 = math.tanh %278 : vector<8x80xf32>
    %280 = vector.broadcast %16 : vector<1x80xf32> to vector<8x80xf32>
    %281 = arith.mulf %279, %280 : vector<8x80xf32>
    %282 = vector.broadcast %17 : vector<1x80xf32> to vector<8x80xf32>
    %283 = arith.addf %281, %282 : vector<8x80xf32>
    %284 = vector.extract_strided_slice %283 {offsets = [0, 0], sizes = [8, 20], strides = [1, 1]} : vector<8x80xf32> to vector<8x20xf32>
    %285 = vector.extract_strided_slice %283 {offsets = [0, 20], sizes = [8, 20], strides = [1, 1]} : vector<8x80xf32> to vector<8x20xf32>
    %286 = vector.extract_strided_slice %283 {offsets = [0, 40], sizes = [8, 20], strides = [1, 1]} : vector<8x80xf32> to vector<8x20xf32>
    %287 = vector.extract_strided_slice %283 {offsets = [0, 60], sizes = [8, 20], strides = [1, 1]} : vector<8x80xf32> to vector<8x20xf32>
    %288 = arith.mulf %285, %229 : vector<8x20xf32>
    %289 = arith.mulf %284, %287 : vector<8x20xf32>
    %290 = arith.addf %288, %289 : vector<8x20xf32>
    %291 = math.tanh %290 : vector<8x20xf32>
    %292 = arith.mulf %286, %291 : vector<8x20xf32>
    %293 = arith.truncf %292 : vector<8x20xf32> to vector<8x20xbf16>
    %cst_48 = arith.constant dense<0.000000e+00> : vector<8x80xf32>
    %294 = tpu.matmul %293, %27, %cst_48 {dimension_numbers = #tpu.dot_dimension_numbers<[1], [0], [0], [1], [0, 0, 1, 1], [], []>} : vector<8x20xbf16>, vector<20x80xbf16>, vector<8x80xf32> -> vector<8x80xf32>
    %295 = arith.truncf %252 : vector<8x20xf32> to vector<8x20xbf16>
    %cst_49 = arith.constant dense<0.000000e+00> : vector<8x80xf32>
    %296 = tpu.matmul %295, %31, %cst_49 {dimension_numbers = #tpu.dot_dimension_numbers<[1], [0], [0], [1], [0, 0, 1, 1], [], []>} : vector<8x20xbf16>, vector<20x80xbf16>, vector<8x80xf32> -> vector<8x80xf32>
    %297 = arith.addf %294, %296 : vector<8x80xf32>
    %298 = vector.broadcast %7 : vector<1x80xf32> to vector<8x80xf32>
    %299 = arith.addf %297, %298 : vector<8x80xf32>
    %300 = math.tanh %299 : vector<8x80xf32>
    %301 = vector.broadcast %16 : vector<1x80xf32> to vector<8x80xf32>
    %302 = arith.mulf %300, %301 : vector<8x80xf32>
    %303 = vector.broadcast %17 : vector<1x80xf32> to vector<8x80xf32>
    %304 = arith.addf %302, %303 : vector<8x80xf32>
    %305 = vector.extract_strided_slice %304 {offsets = [0, 0], sizes = [8, 20], strides = [1, 1]} : vector<8x80xf32> to vector<8x20xf32>
    %306 = vector.extract_strided_slice %304 {offsets = [0, 20], sizes = [8, 20], strides = [1, 1]} : vector<8x80xf32> to vector<8x20xf32>
    %307 = vector.extract_strided_slice %304 {offsets = [0, 40], sizes = [8, 20], strides = [1, 1]} : vector<8x80xf32> to vector<8x20xf32>
    %308 = vector.extract_strided_slice %304 {offsets = [0, 60], sizes = [8, 20], strides = [1, 1]} : vector<8x80xf32> to vector<8x20xf32>
    %309 = arith.mulf %306, %250 : vector<8x20xf32>
    %310 = arith.mulf %305, %308 : vector<8x20xf32>
    %311 = arith.addf %309, %310 : vector<8x20xf32>
    %312 = math.tanh %311 : vector<8x20xf32>
    %313 = arith.mulf %307, %312 : vector<8x20xf32>
    %314 = arith.truncf %271 : vector<8x20xf32> to vector<8x20xbf16>
    %cst_50 = arith.constant dense<0.000000e+00> : vector<8x80xf32>
    %315 = tpu.matmul %314, %23, %cst_50 {dimension_numbers = #tpu.dot_dimension_numbers<[1], [0], [0], [1], [0, 0, 1, 1], [], []>} : vector<8x20xbf16>, vector<20x80xbf16>, vector<8x80xf32> -> vector<8x80xf32>
    %316 = arith.addf %51, %315 : vector<8x80xf32>
    %317 = vector.broadcast %5 : vector<1x80xf32> to vector<8x80xf32>
    %318 = arith.addf %316, %317 : vector<8x80xf32>
    %319 = math.tanh %318 : vector<8x80xf32>
    %320 = vector.broadcast %16 : vector<1x80xf32> to vector<8x80xf32>
    %321 = arith.mulf %319, %320 : vector<8x80xf32>
    %322 = vector.broadcast %17 : vector<1x80xf32> to vector<8x80xf32>
    %323 = arith.addf %321, %322 : vector<8x80xf32>
    %324 = vector.extract_strided_slice %323 {offsets = [0, 0], sizes = [8, 20], strides = [1, 1]} : vector<8x80xf32> to vector<8x20xf32>
    %325 = vector.extract_strided_slice %323 {offsets = [0, 20], sizes = [8, 20], strides = [1, 1]} : vector<8x80xf32> to vector<8x20xf32>
    %326 = vector.extract_strided_slice %323 {offsets = [0, 40], sizes = [8, 20], strides = [1, 1]} : vector<8x80xf32> to vector<8x20xf32>
    %327 = vector.extract_strided_slice %323 {offsets = [0, 60], sizes = [8, 20], strides = [1, 1]} : vector<8x80xf32> to vector<8x20xf32>
    %328 = arith.mulf %325, %269 : vector<8x20xf32>
    %329 = arith.mulf %324, %327 : vector<8x20xf32>
    %330 = arith.addf %328, %329 : vector<8x20xf32>
    %331 = math.tanh %330 : vector<8x20xf32>
    %332 = arith.mulf %326, %331 : vector<8x20xf32>
    %333 = arith.truncf %332 : vector<8x20xf32> to vector<8x20xbf16>
    %cst_51 = arith.constant dense<0.000000e+00> : vector<8x80xf32>
    %334 = tpu.matmul %333, %25, %cst_51 {dimension_numbers = #tpu.dot_dimension_numbers<[1], [0], [0], [1], [0, 0, 1, 1], [], []>} : vector<8x20xbf16>, vector<20x80xbf16>, vector<8x80xf32> -> vector<8x80xf32>
    %335 = arith.truncf %292 : vector<8x20xf32> to vector<8x20xbf16>
    %cst_52 = arith.constant dense<0.000000e+00> : vector<8x80xf32>
    %336 = tpu.matmul %335, %29, %cst_52 {dimension_numbers = #tpu.dot_dimension_numbers<[1], [0], [0], [1], [0, 0, 1, 1], [], []>} : vector<8x20xbf16>, vector<20x80xbf16>, vector<8x80xf32> -> vector<8x80xf32>
    %337 = arith.addf %334, %336 : vector<8x80xf32>
    %338 = vector.broadcast %6 : vector<1x80xf32> to vector<8x80xf32>
    %339 = arith.addf %337, %338 : vector<8x80xf32>
    %340 = math.tanh %339 : vector<8x80xf32>
    %341 = vector.broadcast %16 : vector<1x80xf32> to vector<8x80xf32>
    %342 = arith.mulf %340, %341 : vector<8x80xf32>
    %343 = vector.broadcast %17 : vector<1x80xf32> to vector<8x80xf32>
    %344 = arith.addf %342, %343 : vector<8x80xf32>
    %345 = vector.extract_strided_slice %344 {offsets = [0, 0], sizes = [8, 20], strides = [1, 1]} : vector<8x80xf32> to vector<8x20xf32>
    %346 = vector.extract_strided_slice %344 {offsets = [0, 20], sizes = [8, 20], strides = [1, 1]} : vector<8x80xf32> to vector<8x20xf32>
    %347 = vector.extract_strided_slice %344 {offsets = [0, 40], sizes = [8, 20], strides = [1, 1]} : vector<8x80xf32> to vector<8x20xf32>
    %348 = vector.extract_strided_slice %344 {offsets = [0, 60], sizes = [8, 20], strides = [1, 1]} : vector<8x80xf32> to vector<8x20xf32>
    %349 = arith.mulf %346, %290 : vector<8x20xf32>
    %350 = arith.mulf %345, %348 : vector<8x20xf32>
    %351 = arith.addf %349, %350 : vector<8x20xf32>
    %352 = math.tanh %351 : vector<8x20xf32>
    %353 = arith.mulf %347, %352 : vector<8x20xf32>
    %354 = arith.truncf %353 : vector<8x20xf32> to vector<8x20xbf16>
    %cst_53 = arith.constant dense<0.000000e+00> : vector<8x80xf32>
    %355 = tpu.matmul %354, %27, %cst_53 {dimension_numbers = #tpu.dot_dimension_numbers<[1], [0], [0], [1], [0, 0, 1, 1], [], []>} : vector<8x20xbf16>, vector<20x80xbf16>, vector<8x80xf32> -> vector<8x80xf32>
    %356 = arith.truncf %313 : vector<8x20xf32> to vector<8x20xbf16>
    %cst_54 = arith.constant dense<0.000000e+00> : vector<8x80xf32>
    %357 = tpu.matmul %356, %31, %cst_54 {dimension_numbers = #tpu.dot_dimension_numbers<[1], [0], [0], [1], [0, 0, 1, 1], [], []>} : vector<8x20xbf16>, vector<20x80xbf16>, vector<8x80xf32> -> vector<8x80xf32>
    %358 = arith.addf %355, %357 : vector<8x80xf32>
    %359 = vector.broadcast %7 : vector<1x80xf32> to vector<8x80xf32>
    %360 = arith.addf %358, %359 : vector<8x80xf32>
    %361 = math.tanh %360 : vector<8x80xf32>
    %362 = vector.broadcast %16 : vector<1x80xf32> to vector<8x80xf32>
    %363 = arith.mulf %361, %362 : vector<8x80xf32>
    %364 = vector.broadcast %17 : vector<1x80xf32> to vector<8x80xf32>
    %365 = arith.addf %363, %364 : vector<8x80xf32>
    %366 = vector.extract_strided_slice %365 {offsets = [0, 0], sizes = [8, 20], strides = [1, 1]} : vector<8x80xf32> to vector<8x20xf32>
    %367 = vector.extract_strided_slice %365 {offsets = [0, 20], sizes = [8, 20], strides = [1, 1]} : vector<8x80xf32> to vector<8x20xf32>
    %368 = vector.extract_strided_slice %365 {offsets = [0, 40], sizes = [8, 20], strides = [1, 1]} : vector<8x80xf32> to vector<8x20xf32>
    %369 = vector.extract_strided_slice %365 {offsets = [0, 60], sizes = [8, 20], strides = [1, 1]} : vector<8x80xf32> to vector<8x20xf32>
    %370 = arith.mulf %367, %311 : vector<8x20xf32>
    %371 = arith.mulf %366, %369 : vector<8x20xf32>
    %372 = arith.addf %370, %371 : vector<8x20xf32>
    %373 = math.tanh %372 : vector<8x20xf32>
    %374 = arith.mulf %368, %373 : vector<8x20xf32>
    %375 = arith.truncf %332 : vector<8x20xf32> to vector<8x20xbf16>
    %cst_55 = arith.constant dense<0.000000e+00> : vector<8x80xf32>
    %376 = tpu.matmul %375, %23, %cst_55 {dimension_numbers = #tpu.dot_dimension_numbers<[1], [0], [0], [1], [0, 0, 1, 1], [], []>} : vector<8x20xbf16>, vector<20x80xbf16>, vector<8x80xf32> -> vector<8x80xf32>
    %377 = arith.addf %55, %376 : vector<8x80xf32>
    %378 = vector.broadcast %5 : vector<1x80xf32> to vector<8x80xf32>
    %379 = arith.addf %377, %378 : vector<8x80xf32>
    %380 = math.tanh %379 : vector<8x80xf32>
    %381 = vector.broadcast %16 : vector<1x80xf32> to vector<8x80xf32>
    %382 = arith.mulf %380, %381 : vector<8x80xf32>
    %383 = vector.broadcast %17 : vector<1x80xf32> to vector<8x80xf32>
    %384 = arith.addf %382, %383 : vector<8x80xf32>
    %385 = vector.extract_strided_slice %384 {offsets = [0, 0], sizes = [8, 20], strides = [1, 1]} : vector<8x80xf32> to vector<8x20xf32>
    %386 = vector.extract_strided_slice %384 {offsets = [0, 20], sizes = [8, 20], strides = [1, 1]} : vector<8x80xf32> to vector<8x20xf32>
    %387 = vector.extract_strided_slice %384 {offsets = [0, 40], sizes = [8, 20], strides = [1, 1]} : vector<8x80xf32> to vector<8x20xf32>
    %388 = vector.extract_strided_slice %384 {offsets = [0, 60], sizes = [8, 20], strides = [1, 1]} : vector<8x80xf32> to vector<8x20xf32>
    %389 = arith.mulf %386, %330 : vector<8x20xf32>
    %390 = arith.mulf %385, %388 : vector<8x20xf32>
    %391 = arith.addf %389, %390 : vector<8x20xf32>
    %392 = math.tanh %391 : vector<8x20xf32>
    %393 = arith.mulf %387, %392 : vector<8x20xf32>
    %394 = arith.truncf %393 : vector<8x20xf32> to vector<8x20xbf16>
    %cst_56 = arith.constant dense<0.000000e+00> : vector<8x80xf32>
    %395 = tpu.matmul %394, %25, %cst_56 {dimension_numbers = #tpu.dot_dimension_numbers<[1], [0], [0], [1], [0, 0, 1, 1], [], []>} : vector<8x20xbf16>, vector<20x80xbf16>, vector<8x80xf32> -> vector<8x80xf32>
    %396 = arith.truncf %353 : vector<8x20xf32> to vector<8x20xbf16>
    %cst_57 = arith.constant dense<0.000000e+00> : vector<8x80xf32>
    %397 = tpu.matmul %396, %29, %cst_57 {dimension_numbers = #tpu.dot_dimension_numbers<[1], [0], [0], [1], [0, 0, 1, 1], [], []>} : vector<8x20xbf16>, vector<20x80xbf16>, vector<8x80xf32> -> vector<8x80xf32>
    %398 = arith.addf %395, %397 : vector<8x80xf32>
    %399 = vector.broadcast %6 : vector<1x80xf32> to vector<8x80xf32>
    %400 = arith.addf %398, %399 : vector<8x80xf32>
    %401 = math.tanh %400 : vector<8x80xf32>
    %402 = vector.broadcast %16 : vector<1x80xf32> to vector<8x80xf32>
    %403 = arith.mulf %401, %402 : vector<8x80xf32>
    %404 = vector.broadcast %17 : vector<1x80xf32> to vector<8x80xf32>
    %405 = arith.addf %403, %404 : vector<8x80xf32>
    %406 = vector.extract_strided_slice %405 {offsets = [0, 0], sizes = [8, 20], strides = [1, 1]} : vector<8x80xf32> to vector<8x20xf32>
    %407 = vector.extract_strided_slice %405 {offsets = [0, 20], sizes = [8, 20], strides = [1, 1]} : vector<8x80xf32> to vector<8x20xf32>
    %408 = vector.extract_strided_slice %405 {offsets = [0, 40], sizes = [8, 20], strides = [1, 1]} : vector<8x80xf32> to vector<8x20xf32>
    %409 = vector.extract_strided_slice %405 {offsets = [0, 60], sizes = [8, 20], strides = [1, 1]} : vector<8x80xf32> to vector<8x20xf32>
    %410 = arith.mulf %407, %351 : vector<8x20xf32>
    %411 = arith.mulf %406, %409 : vector<8x20xf32>
    %412 = arith.addf %410, %411 : vector<8x20xf32>
    %413 = math.tanh %412 : vector<8x20xf32>
    %414 = arith.mulf %408, %413 : vector<8x20xf32>
    %415 = arith.truncf %414 : vector<8x20xf32> to vector<8x20xbf16>
    %cst_58 = arith.constant dense<0.000000e+00> : vector<8x80xf32>
    %416 = tpu.matmul %415, %27, %cst_58 {dimension_numbers = #tpu.dot_dimension_numbers<[1], [0], [0], [1], [0, 0, 1, 1], [], []>} : vector<8x20xbf16>, vector<20x80xbf16>, vector<8x80xf32> -> vector<8x80xf32>
    %417 = arith.truncf %374 : vector<8x20xf32> to vector<8x20xbf16>
    %cst_59 = arith.constant dense<0.000000e+00> : vector<8x80xf32>
    %418 = tpu.matmul %417, %31, %cst_59 {dimension_numbers = #tpu.dot_dimension_numbers<[1], [0], [0], [1], [0, 0, 1, 1], [], []>} : vector<8x20xbf16>, vector<20x80xbf16>, vector<8x80xf32> -> vector<8x80xf32>
    %419 = arith.addf %416, %418 : vector<8x80xf32>
    %420 = vector.broadcast %7 : vector<1x80xf32> to vector<8x80xf32>
    %421 = arith.addf %419, %420 : vector<8x80xf32>
    %422 = math.tanh %421 : vector<8x80xf32>
    %423 = vector.broadcast %16 : vector<1x80xf32> to vector<8x80xf32>
    %424 = arith.mulf %422, %423 : vector<8x80xf32>
    %425 = vector.broadcast %17 : vector<1x80xf32> to vector<8x80xf32>
    %426 = arith.addf %424, %425 : vector<8x80xf32>
    %427 = vector.extract_strided_slice %426 {offsets = [0, 0], sizes = [8, 20], strides = [1, 1]} : vector<8x80xf32> to vector<8x20xf32>
    %428 = vector.extract_strided_slice %426 {offsets = [0, 20], sizes = [8, 20], strides = [1, 1]} : vector<8x80xf32> to vector<8x20xf32>
    %429 = vector.extract_strided_slice %426 {offsets = [0, 40], sizes = [8, 20], strides = [1, 1]} : vector<8x80xf32> to vector<8x20xf32>
    %430 = vector.extract_strided_slice %426 {offsets = [0, 60], sizes = [8, 20], strides = [1, 1]} : vector<8x80xf32> to vector<8x20xf32>
    %431 = arith.mulf %428, %372 : vector<8x20xf32>
    %432 = arith.mulf %427, %430 : vector<8x20xf32>
    %433 = arith.addf %431, %432 : vector<8x20xf32>
    %434 = math.tanh %433 : vector<8x20xf32>
    %435 = arith.mulf %429, %434 : vector<8x20xf32>
    %436 = arith.truncf %393 : vector<8x20xf32> to vector<8x20xbf16>
    %cst_60 = arith.constant dense<0.000000e+00> : vector<8x80xf32>
    %437 = tpu.matmul %436, %23, %cst_60 {dimension_numbers = #tpu.dot_dimension_numbers<[1], [0], [0], [1], [0, 0, 1, 1], [], []>} : vector<8x20xbf16>, vector<20x80xbf16>, vector<8x80xf32> -> vector<8x80xf32>
    %438 = arith.addf %59, %437 : vector<8x80xf32>
    %439 = vector.broadcast %5 : vector<1x80xf32> to vector<8x80xf32>
    %440 = arith.addf %438, %439 : vector<8x80xf32>
    %441 = math.tanh %440 : vector<8x80xf32>
    %442 = vector.broadcast %16 : vector<1x80xf32> to vector<8x80xf32>
    %443 = arith.mulf %441, %442 : vector<8x80xf32>
    %444 = vector.broadcast %17 : vector<1x80xf32> to vector<8x80xf32>
    %445 = arith.addf %443, %444 : vector<8x80xf32>
    %446 = vector.extract_strided_slice %445 {offsets = [0, 0], sizes = [8, 20], strides = [1, 1]} : vector<8x80xf32> to vector<8x20xf32>
    %447 = vector.extract_strided_slice %445 {offsets = [0, 20], sizes = [8, 20], strides = [1, 1]} : vector<8x80xf32> to vector<8x20xf32>
    %448 = vector.extract_strided_slice %445 {offsets = [0, 40], sizes = [8, 20], strides = [1, 1]} : vector<8x80xf32> to vector<8x20xf32>
    %449 = vector.extract_strided_slice %445 {offsets = [0, 60], sizes = [8, 20], strides = [1, 1]} : vector<8x80xf32> to vector<8x20xf32>
    %450 = arith.mulf %447, %391 : vector<8x20xf32>
    %451 = arith.mulf %446, %449 : vector<8x20xf32>
    %452 = arith.addf %450, %451 : vector<8x20xf32>
    %453 = math.tanh %452 : vector<8x20xf32>
    %454 = arith.mulf %448, %453 : vector<8x20xf32>
    %455 = arith.truncf %454 : vector<8x20xf32> to vector<8x20xbf16>
    %cst_61 = arith.constant dense<0.000000e+00> : vector<8x80xf32>
    %456 = tpu.matmul %455, %25, %cst_61 {dimension_numbers = #tpu.dot_dimension_numbers<[1], [0], [0], [1], [0, 0, 1, 1], [], []>} : vector<8x20xbf16>, vector<20x80xbf16>, vector<8x80xf32> -> vector<8x80xf32>
    %457 = arith.truncf %414 : vector<8x20xf32> to vector<8x20xbf16>
    %cst_62 = arith.constant dense<0.000000e+00> : vector<8x80xf32>
    %458 = tpu.matmul %457, %29, %cst_62 {dimension_numbers = #tpu.dot_dimension_numbers<[1], [0], [0], [1], [0, 0, 1, 1], [], []>} : vector<8x20xbf16>, vector<20x80xbf16>, vector<8x80xf32> -> vector<8x80xf32>
    %459 = arith.addf %456, %458 : vector<8x80xf32>
    %460 = vector.broadcast %6 : vector<1x80xf32> to vector<8x80xf32>
    %461 = arith.addf %459, %460 : vector<8x80xf32>
    %462 = math.tanh %461 : vector<8x80xf32>
    %463 = vector.broadcast %16 : vector<1x80xf32> to vector<8x80xf32>
    %464 = arith.mulf %462, %463 : vector<8x80xf32>
    %465 = vector.broadcast %17 : vector<1x80xf32> to vector<8x80xf32>
    %466 = arith.addf %464, %465 : vector<8x80xf32>
    %467 = vector.extract_strided_slice %466 {offsets = [0, 0], sizes = [8, 20], strides = [1, 1]} : vector<8x80xf32> to vector<8x20xf32>
    %468 = vector.extract_strided_slice %466 {offsets = [0, 20], sizes = [8, 20], strides = [1, 1]} : vector<8x80xf32> to vector<8x20xf32>
    %469 = vector.extract_strided_slice %466 {offsets = [0, 40], sizes = [8, 20], strides = [1, 1]} : vector<8x80xf32> to vector<8x20xf32>
    %470 = vector.extract_strided_slice %466 {offsets = [0, 60], sizes = [8, 20], strides = [1, 1]} : vector<8x80xf32> to vector<8x20xf32>
    %471 = arith.mulf %468, %412 : vector<8x20xf32>
    %472 = arith.mulf %467, %470 : vector<8x20xf32>
    %473 = arith.addf %471, %472 : vector<8x20xf32>
    %474 = math.tanh %473 : vector<8x20xf32>
    %475 = arith.mulf %469, %474 : vector<8x20xf32>
    %476 = arith.truncf %475 : vector<8x20xf32> to vector<8x20xbf16>
    %cst_63 = arith.constant dense<0.000000e+00> : vector<8x80xf32>
    %477 = tpu.matmul %476, %27, %cst_63 {dimension_numbers = #tpu.dot_dimension_numbers<[1], [0], [0], [1], [0, 0, 1, 1], [], []>} : vector<8x20xbf16>, vector<20x80xbf16>, vector<8x80xf32> -> vector<8x80xf32>
    %478 = arith.truncf %435 : vector<8x20xf32> to vector<8x20xbf16>
    %cst_64 = arith.constant dense<0.000000e+00> : vector<8x80xf32>
    %479 = tpu.matmul %478, %31, %cst_64 {dimension_numbers = #tpu.dot_dimension_numbers<[1], [0], [0], [1], [0, 0, 1, 1], [], []>} : vector<8x20xbf16>, vector<20x80xbf16>, vector<8x80xf32> -> vector<8x80xf32>
    %480 = arith.addf %477, %479 : vector<8x80xf32>
    %481 = vector.broadcast %7 : vector<1x80xf32> to vector<8x80xf32>
    %482 = arith.addf %480, %481 : vector<8x80xf32>
    %483 = math.tanh %482 : vector<8x80xf32>
    %484 = vector.broadcast %16 : vector<1x80xf32> to vector<8x80xf32>
    %485 = arith.mulf %483, %484 : vector<8x80xf32>
    %486 = vector.broadcast %17 : vector<1x80xf32> to vector<8x80xf32>
    %487 = arith.addf %485, %486 : vector<8x80xf32>
    %488 = vector.extract_strided_slice %487 {offsets = [0, 0], sizes = [8, 20], strides = [1, 1]} : vector<8x80xf32> to vector<8x20xf32>
    %489 = vector.extract_strided_slice %487 {offsets = [0, 20], sizes = [8, 20], strides = [1, 1]} : vector<8x80xf32> to vector<8x20xf32>
    %490 = vector.extract_strided_slice %487 {offsets = [0, 40], sizes = [8, 20], strides = [1, 1]} : vector<8x80xf32> to vector<8x20xf32>
    %491 = vector.extract_strided_slice %487 {offsets = [0, 60], sizes = [8, 20], strides = [1, 1]} : vector<8x80xf32> to vector<8x20xf32>
    %492 = arith.mulf %489, %433 : vector<8x20xf32>
    %493 = arith.mulf %488, %491 : vector<8x20xf32>
    %494 = arith.addf %492, %493 : vector<8x20xf32>
    %495 = math.tanh %494 : vector<8x20xf32>
    %496 = arith.mulf %490, %495 : vector<8x20xf32>
    %497 = arith.truncf %454 : vector<8x20xf32> to vector<8x20xbf16>
    %cst_65 = arith.constant dense<0.000000e+00> : vector<8x80xf32>
    %498 = tpu.matmul %497, %23, %cst_65 {dimension_numbers = #tpu.dot_dimension_numbers<[1], [0], [0], [1], [0, 0, 1, 1], [], []>} : vector<8x20xbf16>, vector<20x80xbf16>, vector<8x80xf32> -> vector<8x80xf32>
    %499 = arith.addf %63, %498 : vector<8x80xf32>
    %500 = vector.broadcast %5 : vector<1x80xf32> to vector<8x80xf32>
    %501 = arith.addf %499, %500 : vector<8x80xf32>
    %502 = math.tanh %501 : vector<8x80xf32>
    %503 = vector.broadcast %16 : vector<1x80xf32> to vector<8x80xf32>
    %504 = arith.mulf %502, %503 : vector<8x80xf32>
    %505 = vector.broadcast %17 : vector<1x80xf32> to vector<8x80xf32>
    %506 = arith.addf %504, %505 : vector<8x80xf32>
    %507 = vector.extract_strided_slice %506 {offsets = [0, 0], sizes = [8, 20], strides = [1, 1]} : vector<8x80xf32> to vector<8x20xf32>
    %508 = vector.extract_strided_slice %506 {offsets = [0, 20], sizes = [8, 20], strides = [1, 1]} : vector<8x80xf32> to vector<8x20xf32>
    %509 = vector.extract_strided_slice %506 {offsets = [0, 40], sizes = [8, 20], strides = [1, 1]} : vector<8x80xf32> to vector<8x20xf32>
    %510 = vector.extract_strided_slice %506 {offsets = [0, 60], sizes = [8, 20], strides = [1, 1]} : vector<8x80xf32> to vector<8x20xf32>
    %511 = arith.mulf %508, %452 : vector<8x20xf32>
    %512 = arith.mulf %507, %510 : vector<8x20xf32>
    %513 = arith.addf %511, %512 : vector<8x20xf32>
    %514 = math.tanh %513 : vector<8x20xf32>
    %515 = arith.mulf %509, %514 : vector<8x20xf32>
    %516 = arith.truncf %515 : vector<8x20xf32> to vector<8x20xbf16>
    %cst_66 = arith.constant dense<0.000000e+00> : vector<8x80xf32>
    %517 = tpu.matmul %516, %25, %cst_66 {dimension_numbers = #tpu.dot_dimension_numbers<[1], [0], [0], [1], [0, 0, 1, 1], [], []>} : vector<8x20xbf16>, vector<20x80xbf16>, vector<8x80xf32> -> vector<8x80xf32>
    %518 = arith.truncf %475 : vector<8x20xf32> to vector<8x20xbf16>
    %cst_67 = arith.constant dense<0.000000e+00> : vector<8x80xf32>
    %519 = tpu.matmul %518, %29, %cst_67 {dimension_numbers = #tpu.dot_dimension_numbers<[1], [0], [0], [1], [0, 0, 1, 1], [], []>} : vector<8x20xbf16>, vector<20x80xbf16>, vector<8x80xf32> -> vector<8x80xf32>
    %520 = arith.addf %517, %519 : vector<8x80xf32>
    %521 = vector.broadcast %6 : vector<1x80xf32> to vector<8x80xf32>
    %522 = arith.addf %520, %521 : vector<8x80xf32>
    %523 = math.tanh %522 : vector<8x80xf32>
    %524 = vector.broadcast %16 : vector<1x80xf32> to vector<8x80xf32>
    %525 = arith.mulf %523, %524 : vector<8x80xf32>
    %526 = vector.broadcast %17 : vector<1x80xf32> to vector<8x80xf32>
    %527 = arith.addf %525, %526 : vector<8x80xf32>
    %528 = vector.extract_strided_slice %527 {offsets = [0, 0], sizes = [8, 20], strides = [1, 1]} : vector<8x80xf32> to vector<8x20xf32>
    %529 = vector.extract_strided_slice %527 {offsets = [0, 20], sizes = [8, 20], strides = [1, 1]} : vector<8x80xf32> to vector<8x20xf32>
    %530 = vector.extract_strided_slice %527 {offsets = [0, 40], sizes = [8, 20], strides = [1, 1]} : vector<8x80xf32> to vector<8x20xf32>
    %531 = vector.extract_strided_slice %527 {offsets = [0, 60], sizes = [8, 20], strides = [1, 1]} : vector<8x80xf32> to vector<8x20xf32>
    %532 = arith.mulf %529, %473 : vector<8x20xf32>
    %533 = arith.mulf %528, %531 : vector<8x20xf32>
    %534 = arith.addf %532, %533 : vector<8x20xf32>
    %535 = math.tanh %534 : vector<8x20xf32>
    %536 = arith.mulf %530, %535 : vector<8x20xf32>
    %537 = arith.truncf %536 : vector<8x20xf32> to vector<8x20xbf16>
    %cst_68 = arith.constant dense<0.000000e+00> : vector<8x80xf32>
    %538 = tpu.matmul %537, %27, %cst_68 {dimension_numbers = #tpu.dot_dimension_numbers<[1], [0], [0], [1], [0, 0, 1, 1], [], []>} : vector<8x20xbf16>, vector<20x80xbf16>, vector<8x80xf32> -> vector<8x80xf32>
    %539 = arith.truncf %496 : vector<8x20xf32> to vector<8x20xbf16>
    %cst_69 = arith.constant dense<0.000000e+00> : vector<8x80xf32>
    %540 = tpu.matmul %539, %31, %cst_69 {dimension_numbers = #tpu.dot_dimension_numbers<[1], [0], [0], [1], [0, 0, 1, 1], [], []>} : vector<8x20xbf16>, vector<20x80xbf16>, vector<8x80xf32> -> vector<8x80xf32>
    %541 = arith.addf %538, %540 : vector<8x80xf32>
    %542 = vector.broadcast %7 : vector<1x80xf32> to vector<8x80xf32>
    %543 = arith.addf %541, %542 : vector<8x80xf32>
    %544 = math.tanh %543 : vector<8x80xf32>
    %545 = vector.broadcast %16 : vector<1x80xf32> to vector<8x80xf32>
    %546 = arith.mulf %544, %545 : vector<8x80xf32>
    %547 = vector.broadcast %17 : vector<1x80xf32> to vector<8x80xf32>
    %548 = arith.addf %546, %547 : vector<8x80xf32>
    %549 = vector.extract_strided_slice %548 {offsets = [0, 0], sizes = [8, 20], strides = [1, 1]} : vector<8x80xf32> to vector<8x20xf32>
    %550 = vector.extract_strided_slice %548 {offsets = [0, 20], sizes = [8, 20], strides = [1, 1]} : vector<8x80xf32> to vector<8x20xf32>
    %551 = vector.extract_strided_slice %548 {offsets = [0, 40], sizes = [8, 20], strides = [1, 1]} : vector<8x80xf32> to vector<8x20xf32>
    %552 = vector.extract_strided_slice %548 {offsets = [0, 60], sizes = [8, 20], strides = [1, 1]} : vector<8x80xf32> to vector<8x20xf32>
    %553 = arith.mulf %550, %494 : vector<8x20xf32>
    %554 = arith.mulf %549, %552 : vector<8x20xf32>
    %555 = arith.addf %553, %554 : vector<8x20xf32>
    %556 = math.tanh %555 : vector<8x20xf32>
    %557 = arith.mulf %551, %556 : vector<8x20xf32>
    %558 = vector.broadcast %19 : vector<1x20xf32> to vector<8x20xf32>
    %559 = arith.mulf %557, %558 : vector<8x20xf32>
    %cst_70 = arith.constant dense<0.000000e+00> : vector<8xf32>
    %560 = vector.multi_reduction <add>, %559, %cst_70 [1] : vector<8x20xf32> to vector<8xf32>
    %561 = vector.shape_cast %560 : vector<8xf32> to vector<8x1xf32>
    %562 = vector.broadcast %20 : vector<1x1xf32> to vector<8x1xf32>
    %563 = arith.addf %561, %562 : vector<8x1xf32>
    %564 = tpu.iota {dimensions = array<i32: 0>} : vector<8x1xi32>
    %c4_i32 = arith.constant 4 : i32
    %565 = vector.broadcast %c4_i32 : i32 to vector<8x1xi32>
    %566 = arith.cmpi slt, %564, %565 : vector<8x1xi32>
    %567 = arith.extui %566 : vector<8x1xi1> to vector<8x1xi32>
    %568 = arith.sitofp %567 : vector<8x1xi32> to vector<8x1xf32>
    %cst_71 = arith.constant 0.00999999977 : f32
    %569 = vector.broadcast %cst_71 : f32 to vector<8x1xf32>
    %570 = arith.mulf %569, %563 : vector<8x1xf32>
    %571 = arith.maximumf %563, %570 : vector<8x1xf32>
    %c0_72 = arith.constant 0 : index
    %c0_73 = arith.constant 0 : index
    %572 = vector.load %arg1[%c0_72, %c0_73] : memref<8x3xf32, #tpu.memory_space<vmem>>, vector<8x3xf32>
    %cst_74 = arith.constant 0.00999999977 : f32
    %573 = vector.broadcast %cst_74 : f32 to vector<8x3xf32>
    %574 = arith.mulf %573, %572 : vector<8x3xf32>
    %575 = arith.maximumf %572, %574 : vector<8x3xf32>
    %576 = vector.broadcast %571 : vector<8x1xf32> to vector<8x80xf32>
    %577 = vector.broadcast %2 : vector<1x80xf32> to vector<8x80xf32>
    %578 = arith.mulf %576, %577 : vector<8x80xf32>
    %cst_75 = arith.constant dense<0.000000e+00> : vector<8x80xf32>
    %579 = tpu.matmul %575, %1, %cst_75 {dimension_numbers = #tpu.dot_dimension_numbers<[1], [0], [0], [1], [0, 0, 1, 1], [], []>} : vector<8x3xf32>, vector<3x80xf32>, vector<8x80xf32> -> vector<8x80xf32>
    %580 = arith.addf %578, %579 : vector<8x80xf32>
    %581 = vector.broadcast %3 : vector<1x80xf32> to vector<8x80xf32>
    %582 = arith.addf %580, %581 : vector<8x80xf32>
    %583 = vector.broadcast %568 : vector<8x1xf32> to vector<8x80xf32>
    %584 = arith.mulf %582, %583 : vector<8x80xf32>
    %cst_76 = arith.constant dense<0.000000e+00> : vector<80xf32>
    %585 = vector.multi_reduction <add>, %584, %cst_76 [0] : vector<8x80xf32> to vector<80xf32>
    %586 = vector.shape_cast %585 : vector<80xf32> to vector<1x80xf32>
    %cst_77 = arith.constant 2.500000e-01 : f32
    %587 = vector.broadcast %cst_77 : f32 to vector<1x80xf32>
    %588 = arith.mulf %586, %587 : vector<1x80xf32>
    %589 = vector.broadcast %588 : vector<1x80xf32> to vector<8x80xf32>
    %590 = arith.subf %582, %589 : vector<8x80xf32>
    %591 = vector.broadcast %568 : vector<8x1xf32> to vector<8x80xf32>
    %592 = arith.mulf %590, %591 : vector<8x80xf32>
    %593 = arith.mulf %592, %592 : vector<8x80xf32>
    %cst_78 = arith.constant dense<0.000000e+00> : vector<80xf32>
    %594 = vector.multi_reduction <add>, %593, %cst_78 [0] : vector<8x80xf32> to vector<80xf32>
    %595 = vector.shape_cast %594 : vector<80xf32> to vector<1x80xf32>
    %cst_79 = arith.constant 2.500000e-01 : f32
    %596 = vector.broadcast %cst_79 : f32 to vector<1x80xf32>
    %597 = arith.mulf %595, %596 : vector<1x80xf32>
    %598 = vector.broadcast %588 : vector<1x80xf32> to vector<8x80xf32>
    %599 = arith.subf %582, %598 : vector<8x80xf32>
    %cst_80 = arith.constant 9.99999974E-6 : f32
    %600 = vector.broadcast %cst_80 : f32 to vector<1x80xf32>
    %601 = arith.addf %597, %600 : vector<1x80xf32>
    %602 = math.rsqrt %601 : vector<1x80xf32>
    %603 = vector.broadcast %602 : vector<1x80xf32> to vector<8x80xf32>
    %604 = arith.mulf %599, %603 : vector<8x80xf32>
    %605 = vector.broadcast %10 : vector<1x80xf32> to vector<8x80xf32>
    %606 = arith.mulf %604, %605 : vector<8x80xf32>
    %607 = vector.broadcast %13 : vector<1x80xf32> to vector<8x80xf32>
    %608 = arith.addf %606, %607 : vector<8x80xf32>
    %cst_81 = arith.constant 0.00999999977 : f32
    %609 = vector.broadcast %cst_81 : f32 to vector<8x80xf32>
    %610 = arith.mulf %609, %608 : vector<8x80xf32>
    %611 = arith.maximumf %608, %610 : vector<8x80xf32>
    %c0_82 = arith.constant 0 : index
    %c0_83 = arith.constant 0 : index
    %c0_84 = arith.constant 0 : index
    %612 = vector.load %arg3[%c0_82, %c0_83, %c0_84] : memref<2x80x80xf32, #tpu.memory_space<vmem>>, vector<1x80x80xf32>
    %613 = vector.shape_cast %612 : vector<1x80x80xf32> to vector<80x80xf32>
    %cst_85 = arith.constant dense<0.000000e+00> : vector<8x80xf32>
    %614 = tpu.matmul %611, %613, %cst_85 {dimension_numbers = #tpu.dot_dimension_numbers<[1], [0], [0], [1], [0, 0, 1, 1], [], []>} : vector<8x80xf32>, vector<80x80xf32>, vector<8x80xf32> -> vector<8x80xf32>
    %615 = vector.broadcast %8 : vector<1x80xf32> to vector<8x80xf32>
    %616 = arith.addf %614, %615 : vector<8x80xf32>
    %617 = vector.broadcast %568 : vector<8x1xf32> to vector<8x80xf32>
    %618 = arith.mulf %616, %617 : vector<8x80xf32>
    %cst_86 = arith.constant dense<0.000000e+00> : vector<80xf32>
    %619 = vector.multi_reduction <add>, %618, %cst_86 [0] : vector<8x80xf32> to vector<80xf32>
    %620 = vector.shape_cast %619 : vector<80xf32> to vector<1x80xf32>
    %cst_87 = arith.constant 2.500000e-01 : f32
    %621 = vector.broadcast %cst_87 : f32 to vector<1x80xf32>
    %622 = arith.mulf %620, %621 : vector<1x80xf32>
    %623 = vector.broadcast %622 : vector<1x80xf32> to vector<8x80xf32>
    %624 = arith.subf %616, %623 : vector<8x80xf32>
    %625 = vector.broadcast %568 : vector<8x1xf32> to vector<8x80xf32>
    %626 = arith.mulf %624, %625 : vector<8x80xf32>
    %627 = arith.mulf %626, %626 : vector<8x80xf32>
    %cst_88 = arith.constant dense<0.000000e+00> : vector<80xf32>
    %628 = vector.multi_reduction <add>, %627, %cst_88 [0] : vector<8x80xf32> to vector<80xf32>
    %629 = vector.shape_cast %628 : vector<80xf32> to vector<1x80xf32>
    %cst_89 = arith.constant 2.500000e-01 : f32
    %630 = vector.broadcast %cst_89 : f32 to vector<1x80xf32>
    %631 = arith.mulf %629, %630 : vector<1x80xf32>
    %632 = vector.broadcast %622 : vector<1x80xf32> to vector<8x80xf32>
    %633 = arith.subf %616, %632 : vector<8x80xf32>
    %cst_90 = arith.constant 9.99999974E-6 : f32
    %634 = vector.broadcast %cst_90 : f32 to vector<1x80xf32>
    %635 = arith.addf %631, %634 : vector<1x80xf32>
    %636 = math.rsqrt %635 : vector<1x80xf32>
    %637 = vector.broadcast %636 : vector<1x80xf32> to vector<8x80xf32>
    %638 = arith.mulf %633, %637 : vector<8x80xf32>
    %639 = vector.broadcast %11 : vector<1x80xf32> to vector<8x80xf32>
    %640 = arith.mulf %638, %639 : vector<8x80xf32>
    %641 = vector.broadcast %14 : vector<1x80xf32> to vector<8x80xf32>
    %642 = arith.addf %640, %641 : vector<8x80xf32>
    %cst_91 = arith.constant 0.00999999977 : f32
    %643 = vector.broadcast %cst_91 : f32 to vector<8x80xf32>
    %644 = arith.mulf %643, %642 : vector<8x80xf32>
    %645 = arith.maximumf %642, %644 : vector<8x80xf32>
    %c1_92 = arith.constant 1 : index
    %c0_93 = arith.constant 0 : index
    %c0_94 = arith.constant 0 : index
    %646 = vector.load %arg3[%c1_92, %c0_93, %c0_94] : memref<2x80x80xf32, #tpu.memory_space<vmem>>, vector<1x80x80xf32>
    %647 = vector.shape_cast %646 : vector<1x80x80xf32> to vector<80x80xf32>
    %cst_95 = arith.constant dense<0.000000e+00> : vector<8x80xf32>
    %648 = tpu.matmul %645, %647, %cst_95 {dimension_numbers = #tpu.dot_dimension_numbers<[1], [0], [0], [1], [0, 0, 1, 1], [], []>} : vector<8x80xf32>, vector<80x80xf32>, vector<8x80xf32> -> vector<8x80xf32>
    %649 = vector.broadcast %9 : vector<1x80xf32> to vector<8x80xf32>
    %650 = arith.addf %648, %649 : vector<8x80xf32>
    %651 = vector.broadcast %568 : vector<8x1xf32> to vector<8x80xf32>
    %652 = arith.mulf %650, %651 : vector<8x80xf32>
    %cst_96 = arith.constant dense<0.000000e+00> : vector<80xf32>
    %653 = vector.multi_reduction <add>, %652, %cst_96 [0] : vector<8x80xf32> to vector<80xf32>
    %654 = vector.shape_cast %653 : vector<80xf32> to vector<1x80xf32>
    %cst_97 = arith.constant 2.500000e-01 : f32
    %655 = vector.broadcast %cst_97 : f32 to vector<1x80xf32>
    %656 = arith.mulf %654, %655 : vector<1x80xf32>
    %657 = vector.broadcast %656 : vector<1x80xf32> to vector<8x80xf32>
    %658 = arith.subf %650, %657 : vector<8x80xf32>
    %659 = vector.broadcast %568 : vector<8x1xf32> to vector<8x80xf32>
    %660 = arith.mulf %658, %659 : vector<8x80xf32>
    %661 = arith.mulf %660, %660 : vector<8x80xf32>
    %cst_98 = arith.constant dense<0.000000e+00> : vector<80xf32>
    %662 = vector.multi_reduction <add>, %661, %cst_98 [0] : vector<8x80xf32> to vector<80xf32>
    %663 = vector.shape_cast %662 : vector<80xf32> to vector<1x80xf32>
    %cst_99 = arith.constant 2.500000e-01 : f32
    %664 = vector.broadcast %cst_99 : f32 to vector<1x80xf32>
    %665 = arith.mulf %663, %664 : vector<1x80xf32>
    %666 = vector.broadcast %656 : vector<1x80xf32> to vector<8x80xf32>
    %667 = arith.subf %650, %666 : vector<8x80xf32>
    %cst_100 = arith.constant 9.99999974E-6 : f32
    %668 = vector.broadcast %cst_100 : f32 to vector<1x80xf32>
    %669 = arith.addf %665, %668 : vector<1x80xf32>
    %670 = math.rsqrt %669 : vector<1x80xf32>
    %671 = vector.broadcast %670 : vector<1x80xf32> to vector<8x80xf32>
    %672 = arith.mulf %667, %671 : vector<8x80xf32>
    %673 = vector.broadcast %12 : vector<1x80xf32> to vector<8x80xf32>
    %674 = arith.mulf %672, %673 : vector<8x80xf32>
    %675 = vector.broadcast %15 : vector<1x80xf32> to vector<8x80xf32>
    %676 = arith.addf %674, %675 : vector<8x80xf32>
    %cst_101 = arith.constant 0.00999999977 : f32
    %677 = vector.broadcast %cst_101 : f32 to vector<8x80xf32>
    %678 = arith.mulf %677, %676 : vector<8x80xf32>
    %679 = arith.maximumf %676, %678 : vector<8x80xf32>
    %680 = vector.broadcast %18 : vector<1x80xf32> to vector<8x80xf32>
    %681 = arith.mulf %679, %680 : vector<8x80xf32>
    %cst_102 = arith.constant dense<0.000000e+00> : vector<8xf32>
    %682 = vector.multi_reduction <add>, %681, %cst_102 [1] : vector<8x80xf32> to vector<8xf32>
    %683 = vector.shape_cast %682 : vector<8xf32> to vector<8x1xf32>
    %684 = vector.broadcast %21 : vector<1x1xf32> to vector<8x1xf32>
    %685 = arith.addf %683, %684 : vector<8x1xf32>
    %cst_103 = arith.constant 0.00999999977 : f32
    %686 = vector.broadcast %cst_103 : f32 to vector<8x1xf32>
    %687 = arith.mulf %686, %685 : vector<8x1xf32>
    %688 = arith.maximumf %685, %687 : vector<8x1xf32>
    %c0_104 = arith.constant 0 : index
    %c0_105 = arith.constant 0 : index
    %689 = vector.load %arg5[%c0_104, %c0_105] : memref<8x1xf32, #tpu.memory_space<vmem>>, vector<8x1xf32>
    tpu.vector_store %arg5[%c0_104, %c0_105], %688 {strides = array<i32>} : memref<8x1xf32, #tpu.memory_space<vmem>>, vector<8x1xf32>,
    return
  }
}

</mosaic_0001>

<bundles_post_ra>
// kernel: tpu_custom_call.1
= control target key start
LH: loop header
LB: loop body
LE: loop exit
PB: predicated region body
PF: predicated region fallthrough
CT: control target
= control target key end

     0   :  { %10 = vsyncpa [#allocation3], 0  ;;  %s4584_s0 = inlined_call_operand.hbm [shape: f32[8,8], index: 0, kind: input, shape index: {}]   ;;  %s4585_s1 = inlined_call_operand.vmem [shape: f32[8,3], index: 1, kind: input, shape index: {}]   ;;  %s4586_s2 = inlined_call_operand.hbm [shape: bf16[5,20,80], index: 2, kind: input, shape index: {}]   ;;  %s4587_s3 = inlined_call_operand.hbm [shape: f32[2,80,80], index: 3, kind: input, shape index: {}]   ;;  %s4588_s4 = inlined_call_operand.vmem [shape: f32[22,80], index: 4, kind: input, shape index: {}]   ;;  %s4589_s5 = inlined_call_operand.vmem [shape: f32[8,1], index: 5, kind: output, shape index: {}]  }
   0x1   :  { %11 = vsyncpa [#allocation5], 0  ;;  %s3735_s18 = smov [#allocation4]   ;;  %s3665_s22 = scalar_lea.hbm %s4586_s2, 960 }
   0x2   :  { %s29_s19 = sshll.u32 %s3735_s18, 4  ;;  %p3666_p0 = scmp.ne.s32.totalorder %s4586_s2, %s3665_s22  ;;  %s30_s19 = int_to_ptr.vmem [resolvable:$true] %s29_s19 }
   0x3   :  { %p3669_p1 = scmp.lt.u32.totalorder %s3665_s22, %s4586_s2 }
   0x5   :  { %p3671_p2 = pnand %p3669_p1, %p3666_p0 }
   0x7   :  { %3674 = shalt.err (!%p3671_p2)
}
   0x8   :  { %s3675_s27 = scalar_lea.vmem %s30_s19, 960  ;;  %p3680_p4 = scmp.lt.s32.totalorder %s30_s19, %s30_s19 }
   0x9   :  { %p3676_p3 = scmp.ne.s32.totalorder %s30_s19, %s3675_s27  ;;  %p3681_p5 = scmp.lt.s32.totalorder %s3675_s27, %s3675_s27 }
   0xb   :  { %p3682_p6 = por %p3681_p5, %p3680_p4 }
   0xd   :  { %p3683_p7 = pnand %p3682_p6, %p3676_p3 }
   0xf   :  { %3686 = shalt.err (!%p3683_p7)
}
  0x10   :  { %s3736_s28 = smov 64   ;;  %s3737_s29 = smov 4  }
  0x11   :  { %35 = dma.hbm_to_vmem [thread:$0]  %s4586_s2, 960, %s30_s19, [#allocation5], %s3736_s28, %s3736_s28, %s3737_s29  }
  0x12   :  { %s3738_s7 = smov [#allocation2]   ;;  %s3739_s9 = smov [#allocation6]  }
  0x13   :  { %s18_s8 = sshll.u32 %s3738_s7, 4  ;;  %s41_s10 = sshll.u32 %s3739_s9, 4  ;;  %s19_s8 = int_to_ptr.vmem [resolvable:$true] %s18_s8  ;;  %s42_s10 = int_to_ptr.vmem [resolvable:$true] %s41_s10 }
  0x14   :  { %s3687_s13 = scalar_lea.hbm %s4584_s0, 128 }
  0x15   :  { %p3688_p8 = scmp.ne.s32.totalorder %s4584_s0, %s3687_s13  ;;  %p3691_p9 = scmp.lt.u32.totalorder %s3687_s13, %s4584_s0 }
  0x17   :  { %p3693_p10 = pnand %p3691_p9, %p3688_p8 }
  0x19   :  { %3696 = shalt.err (!%p3693_p10)
}
  0x1a   :  { %s3697_s2 = scalar_lea.vmem %s19_s8, 128  ;;  %p3702_p12 = scmp.lt.s32.totalorder %s19_s8, %s19_s8 }
  0x1b   :  { %p3698_p11 = scmp.ne.s32.totalorder %s19_s8, %s3697_s2  ;;  %p3703_p13 = scmp.lt.s32.totalorder %s3697_s2, %s3697_s2 }
  0x1d   :  { %p3704_p0 = por %p3703_p13, %p3702_p12 }
  0x1f   :  { %p3705_p1 = pnand %p3704_p0, %p3698_p11 }
  0x21   :  { %3708 = shalt.err (!%p3705_p1)
}
  0x22   :  { %21 = dma.hbm_to_vmem [thread:$0]  %s4584_s0, 128, %s19_s8, [#allocation3]  }
  0x23   :  { %s3709_s22 = scalar_lea.hbm %s4587_s3, 2560 }
  0x24   :  { %p3710_p2 = scmp.ne.s32.totalorder %s4587_s3, %s3709_s22  ;;  %p3713_p3 = scmp.lt.u32.totalorder %s3709_s22, %s4587_s3 }
  0x26   :  { %p3715_p4 = pnand %p3713_p3, %p3710_p2 }
  0x28   :  { %3718 = shalt.err (!%p3715_p4)
}
  0x29   :  { %s3719_s27 = scalar_lea.vmem %s42_s10, 2560  ;;  %p3724_p6 = scmp.lt.s32.totalorder %s42_s10, %s42_s10 }
  0x2a   :  { %p3720_p5 = scmp.ne.s32.totalorder %s42_s10, %s3719_s27  ;;  %p3725_p7 = scmp.lt.s32.totalorder %s3719_s27, %s3719_s27 }
  0x2c   :  { %p3726_p8 = por %p3725_p7, %p3724_p6 }
  0x2e   :  { %p3727_p9 = pnand %p3726_p8, %p3720_p5 }
  0x30   :  { %3730 = shalt.err (!%p3727_p9)
}
  0x31   :  { %s3740_s0 = smov 128   ;;  %s3741_s28 = smov 8  }
  0x32   :  { %47 = dma.hbm_to_vmem [thread:$0]  %s4587_s3, 2560, %s42_s10, [#allocation5], %s3740_s0, %s3740_s0, %s3741_s28  }
  0x33   :  { %3731 = dma.done.wait [#allocation3], 128  }
  0x34   :  { %3732 = vsyncadd [#allocation3], 4294967168 }
  0x35   :  { %3733 = dma.done.wait [#allocation5], 3520  }
  0x36   :  { %3734 = vsyncadd [#allocation5], 4294963776  ;;  %v3742_v0 = vmov 0.0   ;;  %vm3743_vm0 = vmmov 0   ;;  %v3744_v1 = vmov 0   ;;  %v3831_v2 = vld [vmem:[#allocation4] sm:$0xff]   ;;  %v88_v6 = vlaneseq }
  0x37   :  { %3111 = vmatprep.subr.bf16.mxu0 %v3742_v0  ;;  %3115 = vmatprep.mubr.msk.bf16.mxu0 %vm3743_vm0, %v3742_v0  ;;  %vm141_vm1 = vcmask 1041408   ;;  %v3545_v3 = vld [vmem:[#allocation4 + $0x8] ss:$0 sps:$4 sm:$0x33]   ;;  %v3833_v4 = vld [vmem:[#allocation2] sm:$0xff]  ;;  %s3745_s9 = smov 68  }
  0x38   :  { %3535 = vset.pattern.permute.xlu0 %v3744_v1  ;;  %3119 = vmatprep.subr.bf16.mxu1 %v3742_v0  ;;  %v3839_v5 = vsel %vm141_vm1, %v3545_v3, 0  ;;  %v3846_v7 = vshrl.u32 %v88_v6, 7  ;;  %v3854_v9 = vld [vmem:[%s4588_s4] sm:$0xff]  ;;  %v62_v22 = vld [vmem:[%s4588_s4 + $0x10] sm:$0x3f]  ;;  %s3746_s10 = smov 20  }
  0x39   :  { %3123 = vmatprep.mubr.msk.bf16.mxu1 %vm3743_vm0, %v3742_v0  ;;  %3112 = vmatpush3.bf16.msra.mxu0 %v3831_v2  ;;  %v3888_v34 = vld [vmem:[#allocation4 + $0x18] sm:$0xff]   ;;  %v3547_v35 = vld [vmem:[#allocation4 + $0x20] ss:$0 sps:$4 sm:$0x33]   ;;  %v3890_v36 = vld [vmem:[#allocation4 + $0xc] sm:$0xff]   ;;  %v3747_v44 = vmov 1  }
  0x3a   :  { %85 = vperm.xlu0 %3535, %v3833_v4   ;;  %3113 = vmatprep.subr.bf16.mxu0 %v3742_v0  ;;  %v3849_v8 = vsub.s32 5, %v3846_v7  ;;  %v188_v12 = vsub.s32 6, %v3846_v7  ;;  %v194_v21 = vsub.s32 1, %v3846_v7  ;;  %v199_v23 = vsub.s32 2, %v3846_v7  ;;  %v3903_v40 = vld [vmem:[#allocation4 + $0x30] sm:$0xff]   ;;  %s3748_s11 = smov 88  }
  0x3b   :  { %3120 = vmatpush3.bf16.msra.mxu1 %v3888_v34  ;;  %v3551_v37 = vld [vmem:[#allocation4 + $0x14] ss:$0 sps:$4 sm:$0x33]   ;;  %v3895_v38 = vsel %vm141_vm1, %v3547_v35, 0  ;;  %3536 = vset.pattern.permute.xlu1 %v3747_v44  ;;  %vm137_vm2 = vcmask 162816   ;;  %v332_v58 = vsub.s32 7, %v3846_v7 }
  0x3c   :  { %v3858_v10 = vrot.slane %v3854_v9, %v3849_v8  ;;  %v3865_v14 = vrot.slane %v3854_v9, %v188_v12  ;;  %v3875_v24 = vrot.slane %v62_v22, %v194_v21  ;;  %v3879_v25 = vrot.slane %v62_v22, %v199_v23  ;;  %3121 = vmatprep.subr.bf16.mxu1 %v3742_v0  ;;  %v3549_v41 = vld [vmem:[#allocation4 + $0x38] ss:$0 sps:$4 sm:$0x33]   ;;  %s3755_s16 = smov 40  }
  0x3d   :  { %3114 = vmatpush3.bf16.msra.mxu0 %v3839_v5  ;;  %v3900_v39 = vsel %vm141_vm1, %v3551_v37, 0  ;;  %v3915_v43 = vsel %vm141_vm1, %v3549_v41, 0  ;;  %v3945_v60 = vrot.slane %v3854_v9, %v332_v58  ;;  %vm2531_vm3 = vcmask 1042432  }
  0x3e   :  { %3127 = vmatprep.subr.bf16.mxu0 %v3742_v0  ;;  %vm2527_vm4 = vcmask 23552   ;;  %vm2509_vm5 = vcmp.lt.s32.totalorder %v3846_v7, 4  ;;  %vm2612_vm6 = vcmask 654336   ;;  %vm2907_vm7 = vcmask 7168  }
  0x3f   :  { %3122 = vmatpush3.bf16.msra.mxu1 %v3895_v38 }
  0x40   :  { %3116 = vmatmul.mubr.bf16.vlgmr.msra.gmra.mrb[0].mxu0 %v3744_v1  ;;  %3135 = vmatprep.subr.bf16.mxu1 %v3742_v0 }
  0x41   :  { %3131 = vmatprep.mubr.msk.bf16.mxu0 %vm3743_vm0, %v3742_v0  ;;  %3128 = vmatpush3.bf16.msra.mxu0 %v3890_v36 }
  0x42   :  { %3129 = vmatprep.subr.bf16.mxu0 %v3742_v0  ;;  %3124 = vmatmul.mubr.bf16.vlgmr.msra.gmra.mrb[0].mxu1 %v3744_v1 }
  0x43   :  { %3136 = vmatpush3.bf16.msra.mxu1 %v3903_v40  ;;  %3139 = vmatprep.mubr.msk.bf16.mxu1 %vm3743_vm0, %v3742_v0 }
  0x44   :  { %3137 = vmatprep.subr.bf16.mxu1 %v3742_v0 }
  0x45   :  { %3130 = vmatpush3.bf16.msra.mxu0 %v3900_v39 }
  0x46   :  { %3143 = vmatprep.subr.bf16.mxu0 %v3742_v0 }
  0x47   :  { %3138 = vmatpush3.bf16.msra.mxu1 %v3915_v43 }
  0x48   :  { %3151 = vmatprep.subr.bf16.mxu1 %v3742_v0 }
  0x4a   :  { %3140 = vmatmul.mubr.bf16.vlgmr.msra.gmra.mrb[4].mxu1 %v3744_v1 }
  0x4b   :  { %3152 = vmatpush3.bf16.msra.mxu1 %v3831_v2  ;;  %3155 = vmatprep.mubr.msk.bf16.mxu1 %vm3743_vm0, %v3742_v0 }
  0x4c   :  { %3153 = vmatprep.subr.bf16.mxu1 %v3742_v0 }
  0x4f   :  { %3154 = vmatpush3.bf16.msra.mxu1 %v3839_v5 }
  0x50   :  { %3167 = vmatprep.subr.bf16.mxu1 %v3742_v0 }
  0xb9   :  { %v86_v11 = vpop.permute.xlu0 %85 }
  0xba   :  { %v92_v13 = vmul.f32 %v3858_v10, %v86_v11 }
 0x113   :  { %v179_v15 = vpop.f32.mrb[0].mxu0 }
 0x114   :  { %v185_v16 = vadd.f32 %v179_v15, %v92_v13  ;;  %v3117_v17 = vpop.f32.mrb[1].mxu0 }
 0x115   :  { %v182_v18 = vpop.f32.mrb[2].mxu0  ;;  %v266_v48 = vpop.f32.mrb[0].mxu1 }
 0x116   :  { %v190_v19 = vadd.f32 %v3865_v14, %v185_v16  ;;  %v3118_v20 = vpop.f32.mrb[3].mxu0  ;;  %v3125_v49 = vpop.f32.mrb[1].mxu1 }
 0x117   :  { %v269_v50 = vpop.f32.mrb[2].mxu1 }
 0x118   :  { %3554 = vtanh.f32 %v190_v19  ;;  %v3126_v51 = vpop.f32.mrb[3].mxu1 }
 0x11d   :  { %v3928_v52 = vpop.f32.mrb[4].mxu1 }
 0x11e   :  { %v3141_v53 = vpop.f32.mrb[5].mxu1 }
 0x11f   :  { %v405_v54 = vpop.f32.mrb[6].mxu1 }
 0x120   :  { %v3142_v55 = vpop.f32.mrb[7].mxu1 }
 0x122   :  { %v3555_v26 = vpop.eup %3554 }
 0x123   :  { %v196_v27 = vmul.f32 %v3555_v26, %v3875_v24 }
 0x125   :  { %v201_v28 = vadd.f32 %v3879_v25, %v196_v27 }
 0x127   :  { %204 = vrot.lane.b32.xlu0 %v201_v28, %s3745_s9  ;;  %v202_v31 = vmul.f32 0.0, %v201_v28 }
 0x199   :  { %v205_v29 = vpop.permute.xlu0 %204 }
 0x19a   :  { %v207_v30 = vmul.f32 %v205_v29, %v201_v28 }
 0x19c   :  { %209 = vrot.lane.b32.xlu1 %v207_v30, %s3746_s10 }
 0x20e   :  { %v210_v32 = vpop.permute.xlu1 %209 }
 0x20f   :  { %v3885_v33 = vadd.f32 %v210_v32, %v202_v31 }
 0x211   :  { %3556 = vtanh.f32 %v3885_v33 }
 0x21b   :  { %v3557_v42 = vpop.eup %3556 }
 0x21c   :  { %215 = vrot.lane.b32.xlu1 %v3557_v42, %s3746_s10 }
 0x220   :  { %94 = vperm.xlu1 %3536, %v3833_v4  }
 0x28e   :  { %v216_v45 = vpop.permute.xlu1 %215 }
 0x28f   :  { %v218_v46 = vmul.f32 %v216_v45, %v201_v28 }
 0x291   :  { %v219_v47 = vpack.c.bf16 %v218_v46, %v218_v46  ;;  %v3964_v46 = vld [vmem:[#allocation4 + $0x24] sm:$0xff]  }
 0x293   :  { %273 = vrot.lane.b32.xlu0 %v219_v47, %s3748_s11  ;;  %v3553_v47 = vld [vmem:[#allocation4 + $0x2c] ss:$0 sps:$4 sm:$0x33]  }
 0x29f   :  { %v95_v57 = vpop.permute.xlu1 %94 }
 0x2a0   :  { %v97_v59 = vmul.f32 %v95_v57, %v3858_v10 }
 0x305   :  { %v274_v56 = vpop.permute.xlu0 %273 }
 0x306   :  { %3132 = vmatmul.mubr.msk.bf16.vlgmr.msra.gmra.mrb[4].mxu0 %vm137_vm2, %v274_v56  ;;  %3156 = vmatmul.mubr.msk.bf16.vlgmr.msra.gmra.mrb[8].mxu1 %vm137_vm2, %v274_v56 }
 0x307   :  { %3168 = vmatpush3.bf16.msra.mxu1 %v3890_v36  ;;  %3147 = vmatprep.mubr.msk.bf16.mxu0 %vm3743_vm0, %v3742_v0 }
 0x308   :  { %3169 = vmatprep.subr.bf16.mxu1 %v3742_v0  ;;  %3171 = vmatprep.mubr.msk.bf16.mxu1 %vm3743_vm0, %v3742_v0 }
 0x309   :  { %3144 = vmatpush3.bf16.msra.mxu0 %v3964_v46 }
 0x30a   :  { %3145 = vmatprep.subr.bf16.mxu0 %v3742_v0 }
 0x30b   :  { %3170 = vmatpush3.bf16.msra.mxu1 %v3900_v39 }
 0x30c   :  { %3183 = vmatprep.subr.bf16.mxu1 %v3742_v0 }
 0x3d9   :  { %v324_v61 = vpop.f32.mrb[4].mxu0  ;;  %v525_v62 = vpop.f32.mrb[8].mxu1 }
 0x3da   :  { %v325_v63 = vadd.f32 %v324_v61, %v266_v48  ;;  %v531_v3 = vadd.f32 %v525_v62, %v97_v59  ;;  %v3133_v6 = vpop.f32.mrb[5].mxu0  ;;  %v3157_v11 = vpop.f32.mrb[9].mxu1  ;;  %v3969_v48 = vsel %vm141_vm1, %v3553_v47, 0  ;;  %v468_v61 = vsub.s32 0, %v3846_v7  ;;  %v61_v62 = vld [vmem:[%s4588_s4 + $0x8] sm:$0xff] }
 0x3db   :  { %v327_v13 = vpop.f32.mrb[6].mxu0  ;;  %v528_v15 = vpop.f32.mrb[10].mxu1  ;;  %3146 = vmatpush3.bf16.msra.mxu0 %v3969_v48 }
 0x3dc   :  { %v334_v16 = vadd.f32 %v3945_v60, %v325_v63  ;;  %v532_v17 = vadd.f32 %v531_v3, %v3865_v14  ;;  %v3134_v18 = vpop.f32.mrb[7].mxu0  ;;  %v3158_v19 = vpop.f32.mrb[11].mxu1  ;;  %3159 = vmatprep.subr.bf16.mxu0 %v3742_v0  ;;  %v4007_v63 = vrot.slane %v61_v62, %v468_v61 }
 0x3de   :  { %3558 = vtanh.f32 %v334_v16 }
 0x3df   :  { %3560 = vtanh.f32 %v532_v17 }
 0x3e8   :  { %v3559_v20 = vpop.eup %3558 }
 0x3e9   :  { %v3561_v22 = vpop.eup %3560  ;;  %v336_v9 = vmul.f32 %v3559_v20, %v3875_v24 }
 0x3ea   :  { %v534_v26 = vmul.f32 %v3561_v22, %v3875_v24 }
 0x3eb   :  { %v337_v27 = vadd.f32 %v336_v9, %v3879_v25 }
 0x3ec   :  { %v535_v28 = vadd.f32 %v534_v26, %v3879_v25 }
 0x3ed   :  { %340 = vrot.lane.b32.xlu0 %v337_v27, %s3745_s9  ;;  %v338_v35 = vmul.f32 0.0, %v337_v27 }
 0x3ee   :  { %538 = vrot.lane.b32.xlu1 %v535_v28, %s3745_s9  ;;  %v536_v41 = vmul.f32 %v535_v28, %v3885_v33 }
 0x45f   :  { %v341_v29 = vpop.permute.xlu0 %340 }
 0x460   :  { %v343_v30 = vmul.f32 %v341_v29, %v337_v27  ;;  %v539_v31 = vpop.permute.xlu1 %538 }
 0x461   :  { %v541_v32 = vmul.f32 %v539_v31, %v535_v28 }
 0x462   :  { %345 = vrot.lane.b32.xlu0 %v343_v30, %s3746_s10 }
 0x463   :  { %543 = vrot.lane.b32.xlu1 %v541_v32, %s3746_s10 }
 0x4d4   :  { %v346_v37 = vpop.permute.xlu0 %345 }
 0x4d5   :  { %v3958_v42 = vadd.f32 %v346_v37, %v338_v35  ;;  %v544_v44 = vpop.permute.xlu1 %543 }
 0x4d6   :  { %v3960_v45 = vadd.f32 %v544_v44, %v536_v41 }
 0x4d7   :  { %3562 = vtanh.f32 %v3958_v42 }
 0x4d8   :  { %3564 = vtanh.f32 %v3960_v45 }
 0x4e1   :  { %v3563_v33 = vpop.eup %3562 }
 0x4e2   :  { %v3565_v49 = vpop.eup %3564  ;;  %351 = vrot.lane.b32.xlu0 %v3563_v33, %s3746_s10 }
 0x4e3   :  { %549 = vrot.lane.b32.xlu1 %v3565_v49, %s3746_s10 }
 0x554   :  { %v352_v50 = vpop.permute.xlu0 %351 }
 0x555   :  { %v354_v51 = vmul.f32 %v352_v50, %v337_v27  ;;  %v550_v53 = vpop.permute.xlu1 %549 }
 0x556   :  { %v552_v54 = vmul.f32 %v550_v53, %v535_v28 }
 0x557   :  { %v355_v55 = vpack.c.bf16 %v354_v51, %v354_v51 }
 0x558   :  { %v553_v56 = vpack.c.bf16 %v552_v54, %v552_v54 }
 0x559   :  { %409 = vrot.lane.b32.xlu0 %v355_v55, %s3748_s11 }
 0x55a   :  { %595 = vrot.lane.b32.xlu1 %v553_v56, %s3748_s11 }
 0x5cb   :  { %v410_v57 = vpop.permute.xlu0 %409 }
 0x5cc   :  { %v3977_v59 = vpop.permute.xlu1 %595  ;;  %3148 = vmatmul.mubr.msk.bf16.vlgmr.msra.gmra.mrb[8].mxu0 %vm137_vm2, %v410_v57 }
 0x5cd   :  { %3160 = vmatpush3.bf16.msra.mxu0 %v3888_v34  ;;  %3172 = vmatmul.mubr.msk.bf16.vlgmr.msra.gmra.mrb[12].mxu1 %vm137_vm2, %v3977_v59 }
 0x5ce   :  { %3161 = vmatprep.subr.bf16.mxu0 %v3742_v0  ;;  %3163 = vmatprep.mubr.msk.bf16.mxu0 %vm3743_vm0, %v3742_v0 }
 0x5cf   :  { %3184 = vmatpush3.bf16.msra.mxu1 %v3964_v46  ;;  %3187 = vmatprep.mubr.msk.bf16.mxu1 %vm3743_vm0, %v3742_v0 }
 0x5d0   :  { %3185 = vmatprep.subr.bf16.mxu1 %v3742_v0 }
 0x5d1   :  { %3162 = vmatpush3.bf16.msra.mxu0 %v3895_v38 }
 0x5d2   :  { %3175 = vmatprep.subr.bf16.mxu0 %v3742_v0 }
 0x5d3   :  { %3186 = vmatpush3.bf16.msra.mxu1 %v3969_v48 }
 0x5d4   :  { %3164 = vmatmul.mubr.msk.bf16.vlgmr.msra.gmra.mrb[12].mxu0 %vm137_vm2, %v410_v57  ;;  %3199 = vmatprep.subr.bf16.mxu1 %v3742_v0 }
 0x5d5   :  { %3176 = vmatpush3.bf16.msra.mxu0 %v3903_v40  ;;  %3179 = vmatprep.mubr.msk.bf16.mxu0 %vm3743_vm0, %v3742_v0 }
 0x5d6   :  { %3177 = vmatprep.subr.bf16.mxu0 %v3742_v0 }
 0x5d9   :  { %3178 = vmatpush3.bf16.msra.mxu0 %v3915_v43 }
 0x5da   :  { %3191 = vmatprep.subr.bf16.mxu0 %v3742_v0 }
 0x69f   :  { %v460_v3 = vpop.f32.mrb[8].mxu0 }
 0x6a0   :  { %v461_v6 = vadd.f32 %v460_v3, %v3928_v52  ;;  %v634_v11 = vpop.f32.mrb[12].mxu1  ;;  %v3149_v13 = vpop.f32.mrb[9].mxu0 }
 0x6a1   :  { %v3173_v15 = vpop.f32.mrb[13].mxu1  ;;  %v463_v16 = vpop.f32.mrb[10].mxu0 }
 0x6a2   :  { %v470_v17 = vadd.f32 %v4007_v63, %v461_v6  ;;  %v637_v18 = vpop.f32.mrb[14].mxu1  ;;  %v3150_v19 = vpop.f32.mrb[11].mxu0  ;;  %v3749_v15 = vmov 2  }
 0x6a3   :  { %v3174_v20 = vpop.f32.mrb[15].mxu1  ;;  %3537 = vset.pattern.permute.xlu0 %v3749_v15 }
 0x6a4   :  { %3566 = vtanh.f32 %v470_v17 }
 0x6a7   :  { %v588_v22 = vpop.f32.mrb[12].mxu0 }
 0x6a8   :  { %v635_v9 = vadd.f32 %v634_v11, %v588_v22  ;;  %v3165_v26 = vpop.f32.mrb[13].mxu0 }
 0x6a9   :  { %v591_v27 = vpop.f32.mrb[14].mxu0 }
 0x6aa   :  { %v640_v28 = vadd.f32 %v635_v9, %v3945_v60  ;;  %v3166_v29 = vpop.f32.mrb[15].mxu0 }
 0x6ac   :  { %3568 = vtanh.f32 %v640_v28 }
 0x6ae   :  { %v3567_v30 = vpop.eup %3566 }
 0x6af   :  { %v472_v52 = vmul.f32 %v3567_v30, %v3875_v24 }
 0x6b1   :  { %v473_v31 = vadd.f32 %v472_v52, %v3879_v25 }
 0x6b3   :  { %476 = vrot.lane.b32.xlu0 %v473_v31, %s3745_s9  ;;  %v474_v49 = vmul.f32 0.0, %v473_v31 }
 0x6b6   :  { %v3569_v32 = vpop.eup %3568 }
 0x6b7   :  { %v642_v35 = vmul.f32 %v3569_v32, %v3875_v24 }
 0x6b9   :  { %v643_v37 = vadd.f32 %v642_v35, %v3879_v25 }
 0x6bb   :  { %646 = vrot.lane.b32.xlu1 %v643_v37, %s3745_s9  ;;  %v644_v53 = vmul.f32 %v643_v37, %v3958_v42 }
 0x725   :  { %v477_v41 = vpop.permute.xlu0 %476 }
 0x726   :  { %v479_v44 = vmul.f32 %v477_v41, %v473_v31 }
 0x728   :  { %481 = vrot.lane.b32.xlu0 %v479_v44, %s3746_s10 }
 0x72d   :  { %v647_v47 = vpop.permute.xlu1 %646 }
 0x72e   :  { %v649_v33 = vmul.f32 %v647_v47, %v643_v37 }
 0x730   :  { %651 = vrot.lane.b32.xlu1 %v649_v33, %s3746_s10 }
 0x79a   :  { %v482_v50 = vpop.permute.xlu0 %481 }
 0x79b   :  { %v4020_v51 = vadd.f32 %v482_v50, %v474_v49 }
 0x79d   :  { %3570 = vtanh.f32 %v4020_v51 }
 0x7a2   :  { %v652_v54 = vpop.permute.xlu1 %651 }
 0x7a3   :  { %v4024_v55 = vadd.f32 %v652_v54, %v644_v53 }
 0x7a5   :  { %3572 = vtanh.f32 %v4024_v55 }
 0x7a7   :  { %v3571_v56 = vpop.eup %3570 }
 0x7a8   :  { %487 = vrot.lane.b32.xlu0 %v3571_v56, %s3746_s10 }
 0x7af   :  { %v3573_v57 = vpop.eup %3572 }
 0x7b0   :  { %657 = vrot.lane.b32.xlu1 %v3573_v57, %s3746_s10 }
 0x81a   :  { %v488_v62 = vpop.permute.xlu0 %487 }
 0x81b   :  { %v490_v3 = vmul.f32 %v488_v62, %v473_v31 }
 0x81d   :  { %v662_v6 = vpack.c.bf16 %v490_v3, %v490_v3 }
 0x81f   :  { %664 = vrot.lane.b32.xlu0 %v662_v6, %s3748_s11 }
 0x822   :  { %v658_v11 = vpop.permute.xlu1 %657 }
 0x823   :  { %v660_v13 = vmul.f32 %v658_v11, %v643_v37  ;;  %99 = vperm.xlu0 %3537, %v3833_v4  }
 0x825   :  { %v661_v42 = vpack.c.bf16 %v660_v13, %v660_v13 }
 0x827   :  { %710 = vrot.lane.b32.xlu1 %v661_v42, %s3748_s11 }
 0x891   :  { %v665_v16 = vpop.permute.xlu0 %664 }
 0x892   :  { %3180 = vmatmul.mubr.msk.bf16.vlgmr.msra.gmra.mrb[16].mxu0 %vm137_vm2, %v665_v16 }
 0x893   :  { %3192 = vmatpush3.bf16.msra.mxu0 %v3831_v2  ;;  %3195 = vmatprep.mubr.msk.bf16.mxu0 %vm3743_vm0, %v3742_v0 }
 0x894   :  { %3193 = vmatprep.subr.bf16.mxu0 %v3742_v0 }
 0x897   :  { %3194 = vmatpush3.bf16.msra.mxu0 %v3839_v5 }
 0x898   :  { %3207 = vmatprep.subr.bf16.mxu0 %v3742_v0 }
 0x899   :  { %v711_v17 = vpop.permute.xlu1 %710 }
 0x89a   :  { %3188 = vmatmul.mubr.msk.bf16.vlgmr.msra.gmra.mrb[16].mxu1 %vm137_vm2, %v711_v17  ;;  %3196 = vmatmul.mubr.msk.bf16.vlgmr.msra.gmra.mrb[20].mxu0 %vm137_vm2, %v3977_v59 }
 0x89b   :  { %3200 = vmatpush3.bf16.msra.mxu1 %v3888_v34  ;;  %3203 = vmatprep.mubr.msk.bf16.mxu1 %vm3743_vm0, %v3742_v0 }
 0x89c   :  { %3201 = vmatprep.subr.bf16.mxu1 %v3742_v0  ;;  %3208 = vmatpush3.bf16.msra.mxu0 %v3890_v36 }
 0x89d   :  { %3209 = vmatprep.subr.bf16.mxu0 %v3742_v0  ;;  %3211 = vmatprep.mubr.msk.bf16.mxu0 %vm3743_vm0, %v3742_v0 }
 0x89f   :  { %3202 = vmatpush3.bf16.msra.mxu1 %v3895_v38 }
 0x8a0   :  { %3215 = vmatprep.subr.bf16.mxu1 %v3742_v0  ;;  %3210 = vmatpush3.bf16.msra.mxu0 %v3900_v39 }
 0x8a1   :  { %3223 = vmatprep.subr.bf16.mxu0 %v3742_v0 }
 0x8a2   :  { %3204 = vmatmul.mubr.msk.bf16.vlgmr.msra.gmra.mrb[20].mxu1 %vm137_vm2, %v711_v17  ;;  %v100_v20 = vpop.permute.xlu0 %99 }
 0x8a3   :  { %3216 = vmatpush3.bf16.msra.mxu1 %v3903_v40  ;;  %3219 = vmatprep.mubr.msk.bf16.mxu1 %vm3743_vm0, %v3742_v0  ;;  %v102_v9 = vmul.f32 %v100_v20, %v3858_v10 }
 0x8a4   :  { %3217 = vmatprep.subr.bf16.mxu1 %v3742_v0 }
 0x8a7   :  { %3218 = vmatpush3.bf16.msra.mxu1 %v3915_v43 }
 0x8a8   :  { %3231 = vmatprep.subr.bf16.mxu1 %v3742_v0 }
 0x965   :  { %v703_v59 = vpop.f32.mrb[16].mxu0 }
 0x966   :  { %v3181_v18 = vpop.f32.mrb[17].mxu0 }
 0x967   :  { %v706_v19 = vpop.f32.mrb[18].mxu0 }
 0x968   :  { %v3182_v22 = vpop.f32.mrb[19].mxu0 }
 0x96d   :  { %v749_v26 = vpop.f32.mrb[16].mxu1  ;;  %v810_v27 = vpop.f32.mrb[20].mxu0 }
 0x96e   :  { %v750_v28 = vadd.f32 %v749_v26, %v703_v59  ;;  %v816_v29 = vadd.f32 %v810_v27, %v102_v9  ;;  %v3189_v30 = vpop.f32.mrb[17].mxu1  ;;  %v3197_v52 = vpop.f32.mrb[21].mxu0  ;;  %v3750_v26 = vmov 3  }
 0x96f   :  { %v752_v31 = vpop.f32.mrb[18].mxu1  ;;  %v813_v32 = vpop.f32.mrb[22].mxu0  ;;  %3538 = vset.pattern.permute.xlu0 %v3750_v26 }
 0x970   :  { %v755_v35 = vadd.f32 %v750_v28, %v4007_v63  ;;  %v817_v37 = vadd.f32 %v816_v29, %v3865_v14  ;;  %v3190_v41 = vpop.f32.mrb[19].mxu1  ;;  %v3198_v44 = vpop.f32.mrb[23].mxu0 }
 0x972   :  { %3574 = vtanh.f32 %v755_v35 }
 0x973   :  { %3576 = vtanh.f32 %v817_v37 }
 0x975   :  { %v4064_v47 = vpop.f32.mrb[20].mxu1 }
 0x976   :  { %v3205_v33 = vpop.f32.mrb[21].mxu1 }
 0x977   :  { %v876_v49 = vpop.f32.mrb[22].mxu1 }
 0x978   :  { %v3206_v50 = vpop.f32.mrb[23].mxu1 }
 0x97c   :  { %v3575_v53 = vpop.eup %3574 }
 0x97d   :  { %v3577_v54 = vpop.eup %3576  ;;  %v757_v56 = vmul.f32 %v3575_v53, %v3875_v24 }
 0x97e   :  { %v819_v62 = vmul.f32 %v3577_v54, %v3875_v24 }
 0x97f   :  { %v758_v57 = vadd.f32 %v757_v56, %v3879_v25 }
 0x980   :  { %v820_v3 = vadd.f32 %v819_v62, %v3879_v25 }
 0x981   :  { %761 = vrot.lane.b32.xlu1 %v758_v57, %s3745_s9  ;;  %v759_v42 = vmul.f32 %v758_v57, %v4020_v51 }
 0x982   :  { %v821_v59 = vmul.f32 %v820_v3, %v3960_v45 }
 0x985   :  { %823 = vrot.lane.b32.xlu1 %v820_v3, %s3745_s9 }
 0x9f3   :  { %v762_v6 = vpop.permute.xlu1 %761 }
 0x9f4   :  { %v764_v11 = vmul.f32 %v762_v6, %v758_v57 }
 0x9f6   :  { %766 = vrot.lane.b32.xlu0 %v764_v11, %s3746_s10 }
 0x9f7   :  { %v824_v13 = vpop.permute.xlu1 %823 }
 0x9f8   :  { %v826_v15 = vmul.f32 %v824_v13, %v820_v3 }
 0x9fa   :  { %828 = vrot.lane.b32.xlu1 %v826_v15, %s3746_s10 }
 0xa68   :  { %v767_v16 = vpop.permute.xlu0 %766 }
 0xa69   :  { %v4075_v17 = vadd.f32 %v767_v16, %v759_v42 }
 0xa6b   :  { %3578 = vtanh.f32 %v4075_v17 }
 0xa6c   :  { %v829_v18 = vpop.permute.xlu1 %828 }
 0xa6d   :  { %v4079_v19 = vadd.f32 %v829_v18, %v821_v59 }
 0xa6f   :  { %3580 = vtanh.f32 %v4079_v19 }
 0xa75   :  { %v3579_v20 = vpop.eup %3578 }
 0xa76   :  { %772 = vrot.lane.b32.xlu0 %v3579_v20, %s3746_s10 }
 0xa79   :  { %v3581_v22 = vpop.eup %3580 }
 0xa7a   :  { %834 = vrot.lane.b32.xlu1 %v3581_v22, %s3746_s10 }
 0xae8   :  { %v773_v9 = vpop.permute.xlu0 %772 }
 0xae9   :  { %v775_v51 = vmul.f32 %v773_v9, %v758_v57 }
 0xaeb   :  { %v947_v27 = vpack.c.bf16 %v775_v51, %v775_v51 }
 0xaec   :  { %v835_v28 = vpop.permute.xlu1 %834 }
 0xaed   :  { %v837_v29 = vmul.f32 %v835_v28, %v820_v3  ;;  %949 = vrot.lane.b32.xlu1 %v947_v27, %s3748_s11 }
 0xaef   :  { %v838_v45 = vpack.c.bf16 %v837_v29, %v837_v29 }
 0xaf1   :  { %880 = vrot.lane.b32.xlu0 %v838_v45, %s3748_s11 }
 0xaf5   :  { %104 = vperm.xlu0 %3538, %v3833_v4  }
 0xb5f   :  { %v950_v30 = vpop.permute.xlu1 %949 }
 0xb60   :  { %3220 = vmatmul.mubr.msk.bf16.vlgmr.msra.gmra.mrb[24].mxu1 %vm137_vm2, %v950_v30 }
 0xb61   :  { %3232 = vmatpush3.bf16.msra.mxu1 %v3831_v2  ;;  %3235 = vmatprep.mubr.msk.bf16.mxu1 %vm3743_vm0, %v3742_v0 }
 0xb62   :  { %3233 = vmatprep.subr.bf16.mxu1 %v3742_v0 }
 0xb63   :  { %v881_v52 = vpop.permute.xlu0 %880 }
 0xb64   :  { %3212 = vmatmul.mubr.msk.bf16.vlgmr.msra.gmra.mrb[24].mxu0 %vm137_vm2, %v881_v52 }
 0xb65   :  { %3234 = vmatpush3.bf16.msra.mxu1 %v3839_v5  ;;  %3224 = vmatpush3.bf16.msra.mxu0 %v3964_v46 }
 0xb66   :  { %3225 = vmatprep.subr.bf16.mxu0 %v3742_v0  ;;  %3247 = vmatprep.subr.bf16.mxu1 %v3742_v0 }
 0xb67   :  { %3227 = vmatprep.mubr.msk.bf16.mxu0 %vm3743_vm0, %v3742_v0 }
 0xb68   :  { %3236 = vmatmul.mubr.msk.bf16.vlgmr.msra.gmra.mrb[28].mxu1 %vm137_vm2, %v881_v52 }
 0xb69   :  { %3226 = vmatpush3.bf16.msra.mxu0 %v3969_v48  ;;  %3248 = vmatpush3.bf16.msra.mxu1 %v3890_v36 }
 0xb6a   :  { %3239 = vmatprep.subr.bf16.mxu0 %v3742_v0  ;;  %3249 = vmatprep.subr.bf16.mxu1 %v3742_v0 }
 0xb6b   :  { %3251 = vmatprep.mubr.msk.bf16.mxu1 %vm3743_vm0, %v3742_v0 }
 0xb6d   :  { %3250 = vmatpush3.bf16.msra.mxu1 %v3900_v39 }
 0xb6e   :  { %3263 = vmatprep.subr.bf16.mxu1 %v3742_v0 }
 0xb74   :  { %v105_v37 = vpop.permute.xlu0 %104 }
 0xb75   :  { %v107_v50 = vmul.f32 %v105_v37, %v3858_v10 }
 0xc33   :  { %v4108_v31 = vpop.f32.mrb[24].mxu1 }
 0xc34   :  { %v3221_v32 = vpop.f32.mrb[25].mxu1 }
 0xc35   :  { %v991_v35 = vpop.f32.mrb[26].mxu1 }
 0xc36   :  { %v3222_v41 = vpop.f32.mrb[27].mxu1 }
 0xc37   :  { %v919_v44 = vpop.f32.mrb[24].mxu0 }
 0xc38   :  { %v920_v33 = vadd.f32 %v919_v44, %v4064_v47  ;;  %v3213_v49 = vpop.f32.mrb[25].mxu0 }
 0xc39   :  { %v922_v53 = vpop.f32.mrb[26].mxu0 }
 0xc3a   :  { %v925_v54 = vadd.f32 %v920_v33, %v3945_v60  ;;  %v3214_v56 = vpop.f32.mrb[27].mxu0 }
 0xc3b   :  { %v1095_v57 = vpop.f32.mrb[28].mxu1 }
 0xc3c   :  { %3582 = vtanh.f32 %v925_v54  ;;  %v1101_v62 = vadd.f32 %v1095_v57, %v107_v50  ;;  %v3237_v3 = vpop.f32.mrb[29].mxu1 }
 0xc3d   :  { %v1098_v6 = vpop.f32.mrb[30].mxu1 }
 0xc3e   :  { %v1102_v11 = vadd.f32 %v1101_v62, %v3865_v14  ;;  %v3238_v13 = vpop.f32.mrb[31].mxu1 }
 0xc40   :  { %3584 = vtanh.f32 %v1102_v11 }
 0xc46   :  { %v3583_v15 = vpop.eup %3582 }
 0xc47   :  { %v927_v42 = vmul.f32 %v3583_v15, %v3875_v24 }
 0xc49   :  { %v928_v47 = vadd.f32 %v927_v42, %v3879_v25 }
 0xc4a   :  { %v3585_v16 = vpop.eup %3584 }
 0xc4b   :  { %931 = vrot.lane.b32.xlu1 %v928_v47, %s3745_s9  ;;  %v1104_v59 = vmul.f32 %v3585_v16, %v3875_v24  ;;  %v929_v26 = vmul.f32 %v928_v47, %v4024_v55 }
 0xc4d   :  { %v1105_v18 = vadd.f32 %v1104_v59, %v3879_v25 }
 0xc4f   :  { %1108 = vrot.lane.b32.xlu1 %v1105_v18, %s3745_s9  ;;  %v1106_v29 = vmul.f32 %v1105_v18, %v4079_v19 }
 0xcbd   :  { %v932_v20 = vpop.permute.xlu1 %931 }
 0xcbe   :  { %v934_v22 = vmul.f32 %v932_v20, %v928_v47 }
 0xcc0   :  { %936 = vrot.lane.b32.xlu0 %v934_v22, %s3746_s10 }
 0xcc1   :  { %v1109_v9 = vpop.permute.xlu1 %1108 }
 0xcc2   :  { %v1111_v51 = vmul.f32 %v1109_v9, %v1105_v18 }
 0xcc4   :  { %1113 = vrot.lane.b32.xlu1 %v1111_v51, %s3746_s10 }
 0xd32   :  { %v937_v27 = vpop.permute.xlu0 %936 }
 0xd33   :  { %v4123_v28 = vadd.f32 %v937_v27, %v929_v26 }
 0xd35   :  { %3586 = vtanh.f32 %v4123_v28 }
 0xd36   :  { %v1114_v45 = vpop.permute.xlu1 %1113 }
 0xd37   :  { %v4127_v30 = vadd.f32 %v1114_v45, %v1106_v29 }
 0xd39   :  { %3588 = vtanh.f32 %v4127_v30 }
 0xd3f   :  { %v3587_v52 = vpop.eup %3586 }
 0xd40   :  { %942 = vrot.lane.b32.xlu0 %v3587_v52, %s3746_s10 }
 0xd43   :  { %v3589_v32 = vpop.eup %3588 }
 0xd44   :  { %1119 = vrot.lane.b32.xlu1 %v3589_v32, %s3746_s10 }
 0xdb2   :  { %v943_v35 = vpop.permute.xlu0 %942 }
 0xdb3   :  { %v945_v55 = vmul.f32 %v943_v35, %v928_v47 }
 0xdb5   :  { %v946_v37 = vpack.c.bf16 %v945_v55, %v945_v55 }
 0xdb6   :  { %v1120_v41 = vpop.permute.xlu1 %1119 }
 0xdb7   :  { %v1122_v44 = vmul.f32 %v1120_v41, %v1105_v18  ;;  %995 = vrot.lane.b32.xlu0 %v946_v37, %s3748_s11 }
 0xdb9   :  { %v1123_v33 = vpack.c.bf16 %v1122_v44, %v1122_v44 }
 0xdbb   :  { %1165 = vrot.lane.b32.xlu1 %v1123_v33, %s3748_s11 }
 0xe29   :  { %v996_v19 = vpop.permute.xlu0 %995 }
 0xe2a   :  { %3228 = vmatmul.mubr.msk.bf16.vlgmr.msra.gmra.mrb[28].mxu0 %vm137_vm2, %v996_v19 }
 0xe2b   :  { %3240 = vmatpush3.bf16.msra.mxu0 %v3888_v34  ;;  %3243 = vmatprep.mubr.msk.bf16.mxu0 %vm3743_vm0, %v3742_v0 }
 0xe2c   :  { %3241 = vmatprep.subr.bf16.mxu0 %v3742_v0 }
 0xe2d   :  { %v4139_v49 = vpop.permute.xlu1 %1165 }
 0xe2e   :  { %3252 = vmatmul.mubr.msk.bf16.vlgmr.msra.gmra.mrb[32].mxu1 %vm137_vm2, %v4139_v49 }
 0xe2f   :  { %3242 = vmatpush3.bf16.msra.mxu0 %v3895_v38  ;;  %3264 = vmatpush3.bf16.msra.mxu1 %v3964_v46 }
 0xe30   :  { %3255 = vmatprep.subr.bf16.mxu0 %v3742_v0  ;;  %3265 = vmatprep.subr.bf16.mxu1 %v3742_v0 }
 0xe31   :  { %3267 = vmatprep.mubr.msk.bf16.mxu1 %vm3743_vm0, %v3742_v0 }
 0xe32   :  { %3244 = vmatmul.mubr.msk.bf16.vlgmr.msra.gmra.mrb[32].mxu0 %vm137_vm2, %v996_v19 }
 0xe33   :  { %3256 = vmatpush3.bf16.msra.mxu0 %v3903_v40  ;;  %3259 = vmatprep.mubr.msk.bf16.mxu0 %vm3743_vm0, %v3742_v0 }
 0xe34   :  { %3257 = vmatprep.subr.bf16.mxu0 %v3742_v0  ;;  %3266 = vmatpush3.bf16.msra.mxu1 %v3969_v48 }
 0xe35   :  { %3279 = vmatprep.subr.bf16.mxu1 %v3742_v0 }
 0xe37   :  { %3258 = vmatpush3.bf16.msra.mxu0 %v3915_v43 }
 0xe38   :  { %3271 = vmatprep.subr.bf16.mxu0 %v3742_v0 }
 0xefd   :  { %v1034_v50 = vpop.f32.mrb[28].mxu0 }
 0xefe   :  { %v1035_v53 = vadd.f32 %v1034_v50, %v4108_v31  ;;  %v3229_v54 = vpop.f32.mrb[29].mxu0 }
 0xeff   :  { %v1037_v56 = vpop.f32.mrb[30].mxu0 }
 0xf00   :  { %v1040_v57 = vadd.f32 %v1035_v53, %v4007_v63  ;;  %v3230_v62 = vpop.f32.mrb[31].mxu0 }
 0xf01   :  { %v1204_v3 = vpop.f32.mrb[32].mxu1 }
 0xf02   :  { %3590 = vtanh.f32 %v1040_v57  ;;  %v3253_v6 = vpop.f32.mrb[33].mxu1  ;;  %v3751_v57 = vmov 4  }
 0xf03   :  { %v1207_v11 = vpop.f32.mrb[34].mxu1  ;;  %3539 = vset.pattern.permute.xlu0 %v3751_v57 }
 0xf04   :  { %v3254_v13 = vpop.f32.mrb[35].mxu1 }
 0xf05   :  { %v1158_v15 = vpop.f32.mrb[32].mxu0 }
 0xf06   :  { %v1205_v42 = vadd.f32 %v1204_v3, %v1158_v15  ;;  %v3245_v47 = vpop.f32.mrb[33].mxu0 }
 0xf07   :  { %v1161_v16 = vpop.f32.mrb[34].mxu0 }
 0xf08   :  { %v1210_v59 = vadd.f32 %v1205_v42, %v3945_v60  ;;  %v3246_v18 = vpop.f32.mrb[35].mxu0 }
 0xf0a   :  { %3592 = vtanh.f32 %v1210_v59 }
 0xf0c   :  { %v3591_v20 = vpop.eup %3590 }
 0xf0d   :  { %v1042_v31 = vmul.f32 %v3591_v20, %v3875_v24 }
 0xf0f   :  { %v1043_v22 = vadd.f32 %v1042_v31, %v3879_v25 }
 0xf11   :  { %1046 = vrot.lane.b32.xlu0 %v1043_v22, %s3745_s9  ;;  %v1044_v32 = vmul.f32 %v1043_v22, %v4075_v17 }
 0xf14   :  { %v3593_v9 = vpop.eup %3592 }
 0xf15   :  { %v1212_v51 = vmul.f32 %v3593_v9, %v3875_v24 }
 0xf17   :  { %v1213_v26 = vadd.f32 %v1212_v51, %v3879_v25 }
 0xf19   :  { %1216 = vrot.lane.b32.xlu1 %v1213_v26, %s3745_s9  ;;  %v1214_v37 = vmul.f32 %v1213_v26, %v4123_v28 }
 0xf83   :  { %v1047_v27 = vpop.permute.xlu0 %1046 }
 0xf84   :  { %v1049_v29 = vmul.f32 %v1047_v27, %v1043_v22 }
 0xf86   :  { %1051 = vrot.lane.b32.xlu0 %v1049_v29, %s3746_s10 }
 0xf8b   :  { %v1217_v45 = vpop.permute.xlu1 %1216 }
 0xf8c   :  { %v1219_v52 = vmul.f32 %v1217_v45, %v1213_v26 }
 0xf8e   :  { %1221 = vrot.lane.b32.xlu1 %v1219_v52, %s3746_s10 }
 0xff8   :  { %v1052_v35 = vpop.permute.xlu0 %1051 }
 0xff9   :  { %v4170_v55 = vadd.f32 %v1052_v35, %v1044_v32 }
 0xffb   :  { %3594 = vtanh.f32 %v4170_v55 }
0x1000   :  { %v1222_v41 = vpop.permute.xlu1 %1221 }
0x1001   :  { %v4174_v44 = vadd.f32 %v1222_v41, %v1214_v37 }
0x1003   :  { %3596 = vtanh.f32 %v4174_v44 }
0x1005   :  { %v3595_v33 = vpop.eup %3594 }
0x1006   :  { %1057 = vrot.lane.b32.xlu0 %v3595_v33, %s3746_s10 }
0x100d   :  { %v3597_v19 = vpop.eup %3596 }
0x100e   :  { %1227 = vrot.lane.b32.xlu1 %v3597_v19, %s3746_s10 }
0x1078   :  { %v1058_v50 = vpop.permute.xlu0 %1057 }
0x1079   :  { %v1060_v17 = vmul.f32 %v1058_v50, %v1043_v22 }
0x107b   :  { %v1232_v53 = vpack.c.bf16 %v1060_v17, %v1060_v17 }
0x107d   :  { %1234 = vrot.lane.b32.xlu0 %v1232_v53, %s3748_s11 }
0x1080   :  { %v1228_v54 = vpop.permute.xlu1 %1227 }
0x1081   :  { %v1230_v56 = vmul.f32 %v1228_v54, %v1213_v26  ;;  %109 = vperm.xlu0 %3539, %v3833_v4  }
0x1083   :  { %v1231_v28 = vpack.c.bf16 %v1230_v56, %v1230_v56 }
0x1085   :  { %1280 = vrot.lane.b32.xlu1 %v1231_v28, %s3748_s11 }
0x10ef   :  { %v1235_v62 = vpop.permute.xlu0 %1234 }
0x10f0   :  { %3260 = vmatmul.mubr.msk.bf16.vlgmr.msra.gmra.mrb[36].mxu0 %vm137_vm2, %v1235_v62 }
0x10f1   :  { %3272 = vmatpush3.bf16.msra.mxu0 %v3831_v2  ;;  %3275 = vmatprep.mubr.msk.bf16.mxu0 %vm3743_vm0, %v3742_v0 }
0x10f2   :  { %3273 = vmatprep.subr.bf16.mxu0 %v3742_v0 }
0x10f5   :  { %3274 = vmatpush3.bf16.msra.mxu0 %v3839_v5 }
0x10f6   :  { %3287 = vmatprep.subr.bf16.mxu0 %v3742_v0 }
0x10f7   :  { %v1281_v3 = vpop.permute.xlu1 %1280 }
0x10f8   :  { %3268 = vmatmul.mubr.msk.bf16.vlgmr.msra.gmra.mrb[36].mxu1 %vm137_vm2, %v1281_v3  ;;  %3276 = vmatmul.mubr.msk.bf16.vlgmr.msra.gmra.mrb[40].mxu0 %vm137_vm2, %v4139_v49 }
0x10f9   :  { %3280 = vmatpush3.bf16.msra.mxu1 %v3888_v34  ;;  %3283 = vmatprep.mubr.msk.bf16.mxu1 %vm3743_vm0, %v3742_v0 }
0x10fa   :  { %3281 = vmatprep.subr.bf16.mxu1 %v3742_v0  ;;  %3288 = vmatpush3.bf16.msra.mxu0 %v3890_v36 }
0x10fb   :  { %3289 = vmatprep.subr.bf16.mxu0 %v3742_v0  ;;  %3291 = vmatprep.mubr.msk.bf16.mxu0 %vm3743_vm0, %v3742_v0 }
0x10fd   :  { %3282 = vmatpush3.bf16.msra.mxu1 %v3895_v38 }
0x10fe   :  { %3295 = vmatprep.subr.bf16.mxu1 %v3742_v0  ;;  %3290 = vmatpush3.bf16.msra.mxu0 %v3900_v39 }
0x10ff   :  { %3303 = vmatprep.subr.bf16.mxu0 %v3742_v0 }
0x1100   :  { %3284 = vmatmul.mubr.msk.bf16.vlgmr.msra.gmra.mrb[40].mxu1 %vm137_vm2, %v1281_v3  ;;  %v110_v36 = vpop.permute.xlu0 %109 }
0x1101   :  { %3296 = vmatpush3.bf16.msra.mxu1 %v3903_v40  ;;  %3299 = vmatprep.mubr.msk.bf16.mxu1 %vm3743_vm0, %v3742_v0  ;;  %v112_v6 = vmul.f32 %v110_v36, %v3858_v10 }
0x1102   :  { %3297 = vmatprep.subr.bf16.mxu1 %v3742_v0 }
0x1105   :  { %3298 = vmatpush3.bf16.msra.mxu1 %v3915_v43 }
0x1106   :  { %3311 = vmatprep.subr.bf16.mxu1 %v3742_v0 }
0x11c3   :  { %v1273_v2 = vpop.f32.mrb[36].mxu0 }
0x11c4   :  { %v3261_v4 = vpop.f32.mrb[37].mxu0 }
0x11c5   :  { %v1276_v34 = vpop.f32.mrb[38].mxu0  ;;  %v3752_v4 = vmov 5  }
0x11c6   :  { %v3262_v49 = vpop.f32.mrb[39].mxu0  ;;  %3540 = vset.pattern.permute.xlu0 %v3752_v4 }
0x11cb   :  { %v1319_v11 = vpop.f32.mrb[36].mxu1  ;;  %v1380_v13 = vpop.f32.mrb[40].mxu0 }
0x11cc   :  { %v1320_v15 = vadd.f32 %v1319_v11, %v1273_v2  ;;  %v1386_v40 = vadd.f32 %v1380_v13, %v112_v6  ;;  %v3269_v42 = vpop.f32.mrb[37].mxu1  ;;  %v3277_v47 = vpop.f32.mrb[41].mxu0  ;;  %v4236_v6 = vld [vmem:[#allocation2] sm:$0xff]  ;;  %v4240_v13 = vld [vmem:[#allocation4] sm:$0xff]  }
0x11cd   :  { %v1322_v16 = vpop.f32.mrb[38].mxu1  ;;  %v1383_v59 = vpop.f32.mrb[42].mxu0 }
0x11ce   :  { %v1325_v18 = vadd.f32 %v1320_v15, %v4007_v63  ;;  %v1387_v20 = vadd.f32 %v1386_v40, %v3865_v14  ;;  %v3270_v31 = vpop.f32.mrb[39].mxu1  ;;  %v3278_v22 = vpop.f32.mrb[43].mxu0  ;;  %v4255_v40 = vld [vmem:[#allocation4 + $0xc] sm:$0xff]  }
0x11d0   :  { %3598 = vtanh.f32 %v1325_v18 }
0x11d1   :  { %3600 = vtanh.f32 %v1387_v20 }
0x11d3   :  { %v4214_v9 = vpop.f32.mrb[40].mxu1 }
0x11d4   :  { %v3285_v51 = vpop.f32.mrb[41].mxu1 }
0x11d5   :  { %v1446_v26 = vpop.f32.mrb[42].mxu1 }
0x11d6   :  { %v3286_v27 = vpop.f32.mrb[43].mxu1 }
0x11da   :  { %v3599_v29 = vpop.eup %3598 }
0x11db   :  { %v3601_v45 = vpop.eup %3600  ;;  %v1327_v52 = vmul.f32 %v3599_v29, %v3875_v24 }
0x11dc   :  { %v1389_v35 = vmul.f32 %v3601_v45, %v3875_v24 }
0x11dd   :  { %v1328_v32 = vadd.f32 %v1327_v52, %v3879_v25 }
0x11de   :  { %v1390_v37 = vadd.f32 %v1389_v35, %v3879_v25 }
0x11df   :  { %1331 = vrot.lane.b32.xlu1 %v1328_v32, %s3745_s9  ;;  %v1329_v17 = vmul.f32 %v1328_v32, %v4170_v55 }
0x11e0   :  { %v1391_v56 = vmul.f32 %v1390_v37, %v4127_v30 }
0x11e3   :  { %1393 = vrot.lane.b32.xlu1 %v1390_v37, %s3745_s9 }
0x1251   :  { %v1332_v41 = vpop.permute.xlu1 %1331 }
0x1252   :  { %v1334_v33 = vmul.f32 %v1332_v41, %v1328_v32 }
0x1254   :  { %1336 = vrot.lane.b32.xlu0 %v1334_v33, %s3746_s10 }
0x1255   :  { %v1394_v19 = vpop.permute.xlu1 %1393 }
0x1256   :  { %v1396_v50 = vmul.f32 %v1394_v19, %v1390_v37 }
0x1258   :  { %1398 = vrot.lane.b32.xlu1 %v1396_v50, %s3746_s10 }
0x12c6   :  { %v1337_v53 = vpop.permute.xlu0 %1336 }
0x12c7   :  { %v4225_v54 = vadd.f32 %v1337_v53, %v1329_v17 }
0x12c9   :  { %3602 = vtanh.f32 %v4225_v54 }
0x12ca   :  { %v1399_v57 = vpop.permute.xlu1 %1398 }
0x12cb   :  { %v4229_v28 = vadd.f32 %v1399_v57, %v1391_v56 }
0x12cd   :  { %3604 = vtanh.f32 %v4229_v28 }
0x12d3   :  { %v3603_v62 = vpop.eup %3602 }
0x12d4   :  { %1342 = vrot.lane.b32.xlu0 %v3603_v62, %s3746_s10 }
0x12d7   :  { %v3605_v3 = vpop.eup %3604 }
0x12d8   :  { %1404 = vrot.lane.b32.xlu1 %v3605_v3, %s3746_s10 }
0x1346   :  { %v1343_v2 = vpop.permute.xlu0 %1342 }
0x1347   :  { %v1345_v55 = vmul.f32 %v1343_v2, %v1328_v32 }
0x1349   :  { %v1517_v34 = vpack.c.bf16 %v1345_v55, %v1345_v55 }
0x134a   :  { %v1405_v36 = vpop.permute.xlu1 %1404 }
0x134b   :  { %v1407_v49 = vmul.f32 %v1405_v36, %v1390_v37  ;;  %1519 = vrot.lane.b32.xlu1 %v1517_v34, %s3748_s11 }
0x134d   :  { %v1408_v30 = vpack.c.bf16 %v1407_v49, %v1407_v49 }
0x134f   :  { %1450 = vrot.lane.b32.xlu0 %v1408_v30, %s3748_s11 }
0x1353   :  { %114 = vperm.xlu0 %3540, %v4236_v6  }
0x13bd   :  { %v1520_v11 = vpop.permute.xlu1 %1519 }
0x13be   :  { %3300 = vmatmul.mubr.msk.bf16.vlgmr.msra.gmra.mrb[44].mxu1 %vm137_vm2, %v1520_v11 }
0x13bf   :  { %3312 = vmatpush3.bf16.msra.mxu1 %v4240_v13  ;;  %3315 = vmatprep.mubr.msk.bf16.mxu1 %vm3743_vm0, %v3742_v0 }
0x13c0   :  { %3313 = vmatprep.subr.bf16.mxu1 %v3742_v0 }
0x13c1   :  { %v1451_v15 = vpop.permute.xlu0 %1450 }
0x13c2   :  { %3292 = vmatmul.mubr.msk.bf16.vlgmr.msra.gmra.mrb[44].mxu0 %vm137_vm2, %v1451_v15 }
0x13c3   :  { %3314 = vmatpush3.bf16.msra.mxu1 %v3839_v5  ;;  %3304 = vmatpush3.bf16.msra.mxu0 %v3964_v46 }
0x13c4   :  { %3305 = vmatprep.subr.bf16.mxu0 %v3742_v0  ;;  %3327 = vmatprep.subr.bf16.mxu1 %v3742_v0 }
0x13c5   :  { %3307 = vmatprep.mubr.msk.bf16.mxu0 %vm3743_vm0, %v3742_v0 }
0x13c6   :  { %3316 = vmatmul.mubr.msk.bf16.vlgmr.msra.gmra.mrb[48].mxu1 %vm137_vm2, %v1451_v15 }
0x13c7   :  { %3306 = vmatpush3.bf16.msra.mxu0 %v3969_v48  ;;  %3328 = vmatpush3.bf16.msra.mxu1 %v4255_v40 }
0x13c8   :  { %3319 = vmatprep.subr.bf16.mxu0 %v3742_v0  ;;  %3329 = vmatprep.subr.bf16.mxu1 %v3742_v0 }
0x13c9   :  { %3331 = vmatprep.mubr.msk.bf16.mxu1 %vm3743_vm0, %v3742_v0 }
0x13cb   :  { %3330 = vmatpush3.bf16.msra.mxu1 %v3900_v39 }
0x13cc   :  { %3343 = vmatprep.subr.bf16.mxu1 %v3742_v0 }
0x13d2   :  { %v115_v59 = vpop.permute.xlu0 %114 }
0x13d3   :  { %v117_v51 = vmul.f32 %v115_v59, %v3858_v10 }
0x1491   :  { %v4264_v42 = vpop.f32.mrb[44].mxu1 }
0x1492   :  { %v3301_v47 = vpop.f32.mrb[45].mxu1 }
0x1493   :  { %v1561_v16 = vpop.f32.mrb[46].mxu1 }
0x1494   :  { %v3302_v18 = vpop.f32.mrb[47].mxu1 }
0x1495   :  { %v1489_v20 = vpop.f32.mrb[44].mxu0 }
0x1496   :  { %v1490_v31 = vadd.f32 %v1489_v20, %v4214_v9  ;;  %v3293_v22 = vpop.f32.mrb[45].mxu0  ;;  %v4291_v20 = vld [vmem:[#allocation4 + $0x18] sm:$0xff]  }
0x1497   :  { %v1492_v26 = vpop.f32.mrb[46].mxu0  ;;  %v4308_v22 = vld [vmem:[#allocation4 + $0x30] sm:$0xff]  }
0x1498   :  { %v1495_v27 = vadd.f32 %v1490_v31, %v3945_v60  ;;  %v3294_v29 = vpop.f32.mrb[47].mxu0 }
0x1499   :  { %v1665_v45 = vpop.f32.mrb[48].mxu1 }
0x149a   :  { %3606 = vtanh.f32 %v1495_v27  ;;  %v1671_v52 = vadd.f32 %v1665_v45, %v117_v51  ;;  %v3317_v32 = vpop.f32.mrb[49].mxu1 }
0x149b   :  { %v1668_v35 = vpop.f32.mrb[50].mxu1 }
0x149c   :  { %v1672_v37 = vadd.f32 %v1671_v52, %v3865_v14  ;;  %v3318_v41 = vpop.f32.mrb[51].mxu1 }
0x149e   :  { %3608 = vtanh.f32 %v1672_v37 }
0x14a4   :  { %v3607_v33 = vpop.eup %3606 }
0x14a5   :  { %v1497_v19 = vmul.f32 %v3607_v33, %v3875_v24 }
0x14a7   :  { %v1498_v9 = vadd.f32 %v1497_v19, %v3879_v25 }
0x14a8   :  { %v3609_v50 = vpop.eup %3608 }
0x14a9   :  { %1501 = vrot.lane.b32.xlu1 %v1498_v9, %s3745_s9  ;;  %v1674_v17 = vmul.f32 %v3609_v50, %v3875_v24  ;;  %v1499_v2 = vmul.f32 %v1498_v9, %v4174_v44 }
0x14ab   :  { %v1675_v53 = vadd.f32 %v1674_v17, %v3879_v25 }
0x14ad   :  { %1678 = vrot.lane.b32.xlu1 %v1675_v53, %s3745_s9  ;;  %v1676_v34 = vmul.f32 %v1675_v53, %v4229_v28 }
0x151b   :  { %v1502_v56 = vpop.permute.xlu1 %1501 }
0x151c   :  { %v1504_v57 = vmul.f32 %v1502_v56, %v1498_v9 }
0x151e   :  { %1506 = vrot.lane.b32.xlu0 %v1504_v57, %s3746_s10 }
0x151f   :  { %v1679_v62 = vpop.permute.xlu1 %1678 }
0x1520   :  { %v1681_v3 = vmul.f32 %v1679_v62, %v1675_v53 }
0x1522   :  { %1683 = vrot.lane.b32.xlu1 %v1681_v3, %s3746_s10 }
0x1590   :  { %v1507_v55 = vpop.permute.xlu0 %1506 }
0x1591   :  { %v4279_v4 = vadd.f32 %v1507_v55, %v1499_v2 }
0x1593   :  { %3610 = vtanh.f32 %v4279_v4 }
0x1594   :  { %v1684_v36 = vpop.permute.xlu1 %1683 }
0x1595   :  { %v4283_v49 = vadd.f32 %v1684_v36, %v1676_v34 }
0x1597   :  { %3612 = vtanh.f32 %v4283_v49 }
0x159d   :  { %v3611_v30 = vpop.eup %3610 }
0x159e   :  { %1512 = vrot.lane.b32.xlu0 %v3611_v30, %s3746_s10 }
0x15a1   :  { %v3613_v11 = vpop.eup %3612 }
0x15a2   :  { %1689 = vrot.lane.b32.xlu1 %v3613_v11, %s3746_s10 }
0x1610   :  { %v1513_v15 = vpop.permute.xlu0 %1512 }
0x1611   :  { %v1515_v44 = vmul.f32 %v1513_v15, %v1498_v9 }
0x1613   :  { %v1516_v47 = vpack.c.bf16 %v1515_v44, %v1515_v44 }
0x1614   :  { %v1690_v16 = vpop.permute.xlu1 %1689 }
0x1615   :  { %v1692_v59 = vmul.f32 %v1690_v16, %v1675_v53  ;;  %1565 = vrot.lane.b32.xlu0 %v1516_v47, %s3748_s11 }
0x1617   :  { %v1693_v18 = vpack.c.bf16 %v1692_v59, %v1692_v59 }
0x1619   :  { %1735 = vrot.lane.b32.xlu1 %v1693_v18, %s3748_s11 }
0x1687   :  { %v1566_v28 = vpop.permute.xlu0 %1565 }
0x1688   :  { %3308 = vmatmul.mubr.msk.bf16.vlgmr.msra.gmra.mrb[48].mxu0 %vm137_vm2, %v1566_v28 }
0x1689   :  { %3320 = vmatpush3.bf16.msra.mxu0 %v4291_v20  ;;  %3323 = vmatprep.mubr.msk.bf16.mxu0 %vm3743_vm0, %v3742_v0 }
0x168a   :  { %3321 = vmatprep.subr.bf16.mxu0 %v3742_v0 }
0x168b   :  { %v4297_v31 = vpop.permute.xlu1 %1735 }
0x168c   :  { %3332 = vmatmul.mubr.msk.bf16.vlgmr.msra.gmra.mrb[52].mxu1 %vm137_vm2, %v4297_v31 }
0x168d   :  { %3322 = vmatpush3.bf16.msra.mxu0 %v3895_v38  ;;  %3344 = vmatpush3.bf16.msra.mxu1 %v3964_v46 }
0x168e   :  { %3335 = vmatprep.subr.bf16.mxu0 %v3742_v0  ;;  %3345 = vmatprep.subr.bf16.mxu1 %v3742_v0 }
0x168f   :  { %3347 = vmatprep.mubr.msk.bf16.mxu1 %vm3743_vm0, %v3742_v0 }
0x1690   :  { %3324 = vmatmul.mubr.msk.bf16.vlgmr.msra.gmra.mrb[52].mxu0 %vm137_vm2, %v1566_v28 }
0x1691   :  { %3336 = vmatpush3.bf16.msra.mxu0 %v4308_v22  ;;  %3339 = vmatprep.mubr.msk.bf16.mxu0 %vm3743_vm0, %v3742_v0 }
0x1692   :  { %3337 = vmatprep.subr.bf16.mxu0 %v3742_v0  ;;  %3346 = vmatpush3.bf16.msra.mxu1 %v3969_v48 }
0x1693   :  { %3359 = vmatprep.subr.bf16.mxu1 %v3742_v0 }
0x1695   :  { %3338 = vmatpush3.bf16.msra.mxu0 %v3915_v43 }
0x1696   :  { %3351 = vmatprep.subr.bf16.mxu0 %v3742_v0 }
0x175b   :  { %v1604_v46 = vpop.f32.mrb[48].mxu0 }
0x175c   :  { %v1605_v51 = vadd.f32 %v1604_v46, %v4264_v42  ;;  %v3309_v26 = vpop.f32.mrb[49].mxu0 }
0x175d   :  { %v1607_v27 = vpop.f32.mrb[50].mxu0 }
0x175e   :  { %v1610_v29 = vadd.f32 %v1605_v51, %v4007_v63  ;;  %v3310_v45 = vpop.f32.mrb[51].mxu0  ;;  %v3753_v27 = vmov 6  }
0x175f   :  { %v1774_v52 = vpop.f32.mrb[52].mxu1  ;;  %3541 = vset.pattern.permute.xlu0 %v3753_v27 }
0x1760   :  { %3614 = vtanh.f32 %v1610_v29  ;;  %v3333_v32 = vpop.f32.mrb[53].mxu1 }
0x1761   :  { %v1777_v35 = vpop.f32.mrb[54].mxu1 }
0x1762   :  { %v3334_v37 = vpop.f32.mrb[55].mxu1 }
0x1763   :  { %v1728_v41 = vpop.f32.mrb[52].mxu0 }
0x1764   :  { %v1775_v33 = vadd.f32 %v1774_v52, %v1728_v41  ;;  %v3325_v19 = vpop.f32.mrb[53].mxu0 }
0x1765   :  { %v1731_v9 = vpop.f32.mrb[54].mxu0 }
0x1766   :  { %v1780_v50 = vadd.f32 %v1775_v33, %v3945_v60  ;;  %v3326_v17 = vpop.f32.mrb[55].mxu0 }
0x1768   :  { %3616 = vtanh.f32 %v1780_v50 }
0x176a   :  { %v3615_v53 = vpop.eup %3614 }
0x176b   :  { %v1612_v42 = vmul.f32 %v3615_v53, %v3875_v24 }
0x176d   :  { %v1613_v56 = vadd.f32 %v1612_v42, %v3879_v25 }
0x176f   :  { %1616 = vrot.lane.b32.xlu0 %v1613_v56, %s3745_s9  ;;  %v1614_v30 = vmul.f32 %v1613_v56, %v4225_v54 }
0x1772   :  { %v3617_v57 = vpop.eup %3616 }
0x1773   :  { %v1782_v62 = vmul.f32 %v3617_v57, %v3875_v24 }
0x1775   :  { %v1783_v3 = vadd.f32 %v1782_v62, %v3879_v25 }
0x1777   :  { %1786 = vrot.lane.b32.xlu1 %v1783_v3, %s3745_s9  ;;  %v1784_v44 = vmul.f32 %v1783_v3, %v4279_v4 }
0x17e1   :  { %v1617_v2 = vpop.permute.xlu0 %1616 }
0x17e2   :  { %v1619_v55 = vmul.f32 %v1617_v2, %v1613_v56 }
0x17e4   :  { %1621 = vrot.lane.b32.xlu0 %v1619_v55, %s3746_s10 }
0x17e9   :  { %v1787_v34 = vpop.permute.xlu1 %1786 }
0x17ea   :  { %v1789_v36 = vmul.f32 %v1787_v34, %v1783_v3 }
0x17ec   :  { %1791 = vrot.lane.b32.xlu1 %v1789_v36, %s3746_s10 }
0x1856   :  { %v1622_v11 = vpop.permute.xlu0 %1621 }
0x1857   :  { %v4330_v15 = vadd.f32 %v1622_v11, %v1614_v30 }
0x1859   :  { %3618 = vtanh.f32 %v4330_v15 }
0x185e   :  { %v1792_v47 = vpop.permute.xlu1 %1791 }
0x185f   :  { %v4334_v16 = vadd.f32 %v1792_v47, %v1784_v44 }
0x1861   :  { %3620 = vtanh.f32 %v4334_v16 }
0x1863   :  { %v3619_v59 = vpop.eup %3618 }
0x1864   :  { %1627 = vrot.lane.b32.xlu0 %v3619_v59, %s3746_s10 }
0x186b   :  { %v3621_v18 = vpop.eup %3620 }
0x186c   :  { %1797 = vrot.lane.b32.xlu1 %v3621_v18, %s3746_s10 }
0x18d6   :  { %v1628_v28 = vpop.permute.xlu0 %1627 }
0x18d7   :  { %v1630_v54 = vmul.f32 %v1628_v28, %v1613_v56 }
0x18d9   :  { %v1802_v46 = vpack.c.bf16 %v1630_v54, %v1630_v54 }
0x18db   :  { %1804 = vrot.lane.b32.xlu0 %v1802_v46, %s3748_s11 }
0x18de   :  { %v1798_v51 = vpop.permute.xlu1 %1797 }
0x18df   :  { %v1800_v26 = vmul.f32 %v1798_v51, %v1783_v3  ;;  %119 = vperm.xlu0 %3541, %v4236_v6  }
0x18e1   :  { %v1801_v4 = vpack.c.bf16 %v1800_v26, %v1800_v26 }
0x18e3   :  { %1850 = vrot.lane.b32.xlu1 %v1801_v4, %s3748_s11 }
0x194d   :  { %v1805_v29 = vpop.permute.xlu0 %1804 }
0x194e   :  { %3340 = vmatmul.mubr.msk.bf16.vlgmr.msra.gmra.mrb[56].mxu0 %vm137_vm2, %v1805_v29 }
0x194f   :  { %3352 = vmatpush3.bf16.msra.mxu0 %v4240_v13  ;;  %3355 = vmatprep.mubr.msk.bf16.mxu0 %vm3743_vm0, %v3742_v0 }
0x1950   :  { %3353 = vmatprep.subr.bf16.mxu0 %v3742_v0 }
0x1953   :  { %3354 = vmatpush3.bf16.msra.mxu0 %v3839_v5 }
0x1954   :  { %3367 = vmatprep.subr.bf16.mxu0 %v3742_v0 }
0x1955   :  { %v1851_v45 = vpop.permute.xlu1 %1850 }
0x1956   :  { %3348 = vmatmul.mubr.msk.bf16.vlgmr.msra.gmra.mrb[56].mxu1 %vm137_vm2, %v1851_v45  ;;  %3356 = vmatmul.mubr.msk.bf16.vlgmr.msra.gmra.mrb[60].mxu0 %vm137_vm2, %v4297_v31 }
0x1957   :  { %3360 = vmatpush3.bf16.msra.mxu1 %v4291_v20  ;;  %3363 = vmatprep.mubr.msk.bf16.mxu1 %vm3743_vm0, %v3742_v0 }
0x1958   :  { %3361 = vmatprep.subr.bf16.mxu1 %v3742_v0  ;;  %3368 = vmatpush3.bf16.msra.mxu0 %v4255_v40 }
0x1959   :  { %3369 = vmatprep.subr.bf16.mxu0 %v3742_v0  ;;  %3371 = vmatprep.mubr.msk.bf16.mxu0 %vm3743_vm0, %v3742_v0 }
0x195b   :  { %3362 = vmatpush3.bf16.msra.mxu1 %v3895_v38 }
0x195c   :  { %3375 = vmatprep.subr.bf16.mxu1 %v3742_v0  ;;  %3370 = vmatpush3.bf16.msra.mxu0 %v3900_v39 }
0x195d   :  { %3383 = vmatprep.subr.bf16.mxu0 %v3742_v0 }
0x195e   :  { %3364 = vmatmul.mubr.msk.bf16.vlgmr.msra.gmra.mrb[60].mxu1 %vm137_vm2, %v1851_v45  ;;  %v120_v35 = vpop.permute.xlu0 %119 }
0x195f   :  { %3376 = vmatpush3.bf16.msra.mxu1 %v4308_v22  ;;  %3379 = vmatprep.mubr.msk.bf16.mxu1 %vm3743_vm0, %v3742_v0  ;;  %v122_v41 = vmul.f32 %v120_v35, %v3858_v10 }
0x1960   :  { %3377 = vmatprep.subr.bf16.mxu1 %v3742_v0 }
0x1963   :  { %3378 = vmatpush3.bf16.msra.mxu1 %v3915_v43 }
0x1964   :  { %3391 = vmatprep.subr.bf16.mxu1 %v3742_v0 }
0x1a21   :  { %v1843_v31 = vpop.f32.mrb[56].mxu0 }
0x1a22   :  { %v3341_v52 = vpop.f32.mrb[57].mxu0 }
0x1a23   :  { %v1846_v32 = vpop.f32.mrb[58].mxu0 }
0x1a24   :  { %v3342_v37 = vpop.f32.mrb[59].mxu0 }
0x1a29   :  { %v1889_v33 = vpop.f32.mrb[56].mxu1  ;;  %v1950_v19 = vpop.f32.mrb[60].mxu0 }
0x1a2a   :  { %v1890_v9 = vadd.f32 %v1889_v33, %v1843_v31  ;;  %v1956_v50 = vadd.f32 %v1950_v19, %v122_v41  ;;  %v3349_v17 = vpop.f32.mrb[57].mxu1  ;;  %v3357_v53 = vpop.f32.mrb[61].mxu0  ;;  %v3754_v41 = vmov 7  }
0x1a2b   :  { %v1892_v42 = vpop.f32.mrb[58].mxu1  ;;  %v1953_v56 = vpop.f32.mrb[62].mxu0  ;;  %3542 = vset.pattern.permute.xlu0 %v3754_v41  ;;  %v4405_v53 = vld [vmem:[#allocation4 + $0x24] sm:$0xff]  }
0x1a2c   :  { %v1895_v57 = vadd.f32 %v1890_v9, %v4007_v63  ;;  %v1957_v62 = vadd.f32 %v1956_v50, %v3865_v14  ;;  %v3350_v3 = vpop.f32.mrb[59].mxu1  ;;  %v3358_v2 = vpop.f32.mrb[63].mxu0 }
0x1a2e   :  { %3622 = vtanh.f32 %v1895_v57 }
0x1a2f   :  { %3624 = vtanh.f32 %v1957_v62 }
0x1a31   :  { %v4374_v55 = vpop.f32.mrb[60].mxu1 }
0x1a32   :  { %v3365_v34 = vpop.f32.mrb[61].mxu1 }
0x1a33   :  { %v2016_v36 = vpop.f32.mrb[62].mxu1 }
0x1a34   :  { %v3366_v30 = vpop.f32.mrb[63].mxu1 }
0x1a38   :  { %v3623_v11 = vpop.eup %3622 }
0x1a39   :  { %v3625_v44 = vpop.eup %3624  ;;  %v1897_v47 = vmul.f32 %v3623_v11, %v3875_v24 }
0x1a3a   :  { %v1959_v18 = vmul.f32 %v3625_v44, %v3875_v24 }
0x1a3b   :  { %v1898_v59 = vadd.f32 %v1897_v47, %v3879_v25 }
0x1a3c   :  { %v1960_v28 = vadd.f32 %v1959_v18, %v3879_v25 }
0x1a3d   :  { %1901 = vrot.lane.b32.xlu1 %v1898_v59, %s3745_s9  ;;  %v1899_v27 = vmul.f32 %v1898_v59, %v4330_v15 }
0x1a3e   :  { %v1961_v45 = vmul.f32 %v1960_v28, %v4283_v49 }
0x1a41   :  { %1963 = vrot.lane.b32.xlu1 %v1960_v28, %s3745_s9 }
0x1aaf   :  { %v1902_v54 = vpop.permute.xlu1 %1901 }
0x1ab0   :  { %v1904_v46 = vmul.f32 %v1902_v54, %v1898_v59 }
0x1ab2   :  { %1906 = vrot.lane.b32.xlu0 %v1904_v46, %s3746_s10 }
0x1ab3   :  { %v1964_v51 = vpop.permute.xlu1 %1963 }
0x1ab4   :  { %v1966_v26 = vmul.f32 %v1964_v51, %v1960_v28 }
0x1ab6   :  { %1968 = vrot.lane.b32.xlu1 %v1966_v26, %s3746_s10 }
0x1b24   :  { %v1907_v4 = vpop.permute.xlu0 %1906 }
0x1b25   :  { %v4385_v29 = vadd.f32 %v1907_v4, %v1899_v27 }
0x1b27   :  { %3626 = vtanh.f32 %v4385_v29 }
0x1b28   :  { %v1969_v31 = vpop.permute.xlu1 %1968 }
0x1b29   :  { %v4389_v52 = vadd.f32 %v1969_v31, %v1961_v45 }
0x1b2b   :  { %3628 = vtanh.f32 %v4389_v52 }
0x1b31   :  { %v3627_v32 = vpop.eup %3626 }
0x1b32   :  { %1912 = vrot.lane.b32.xlu0 %v3627_v32, %s3746_s10 }
0x1b35   :  { %v3629_v35 = vpop.eup %3628 }
0x1b36   :  { %1974 = vrot.lane.b32.xlu1 %v3629_v35, %s3746_s10 }
0x1ba4   :  { %v1913_v37 = vpop.permute.xlu0 %1912 }
0x1ba5   :  { %v1915_v15 = vmul.f32 %v1913_v37, %v1898_v59 }
0x1ba7   :  { %v2087_v33 = vpack.c.bf16 %v1915_v15, %v1915_v15 }
0x1ba8   :  { %v1975_v19 = vpop.permute.xlu1 %1974 }
0x1ba9   :  { %v1977_v9 = vmul.f32 %v1975_v19, %v1960_v28  ;;  %2089 = vrot.lane.b32.xlu1 %v2087_v33, %s3748_s11 }
0x1bab   :  { %v1978_v49 = vpack.c.bf16 %v1977_v9, %v1977_v9 }
0x1bad   :  { %2020 = vrot.lane.b32.xlu0 %v1978_v49, %s3748_s11 }
0x1bb1   :  { %124 = vperm.xlu0 %3542, %v4236_v6  }
0x1bb5   :  { %3543 = vset.pattern.permute.xlu0 %v3744_v1 }
0x1c1b   :  { %v2090_v50 = vpop.permute.xlu1 %2089 }
0x1c1c   :  { %3380 = vmatmul.mubr.msk.bf16.vlgmr.msra.gmra.mrb[64].mxu1 %vm137_vm2, %v2090_v50 }
0x1c1d   :  { %3392 = vmatpush3.bf16.msra.mxu1 %v4240_v13  ;;  %3395 = vmatprep.mubr.msk.bf16.mxu1 %vm3743_vm0, %v3742_v0 }
0x1c1e   :  { %3393 = vmatprep.subr.bf16.mxu1 %v3742_v0 }
0x1c1f   :  { %v2021_v17 = vpop.permute.xlu0 %2020 }
0x1c20   :  { %3372 = vmatmul.mubr.msk.bf16.vlgmr.msra.gmra.mrb[64].mxu0 %vm137_vm2, %v2021_v17 }
0x1c21   :  { %3394 = vmatpush3.bf16.msra.mxu1 %v3839_v5  ;;  %3384 = vmatpush3.bf16.msra.mxu0 %v4405_v53 }
0x1c22   :  { %3385 = vmatprep.subr.bf16.mxu0 %v3742_v0  ;;  %3407 = vmatprep.subr.bf16.mxu1 %v3742_v0 }
0x1c23   :  { %3387 = vmatprep.mubr.msk.bf16.mxu0 %vm3743_vm0, %v3742_v0 }
0x1c24   :  { %3396 = vmatmul.mubr.msk.bf16.vlgmr.msra.gmra.mrb[68].mxu1 %vm137_vm2, %v2021_v17 }
0x1c25   :  { %3386 = vmatpush3.bf16.msra.mxu0 %v3969_v48  ;;  %3408 = vmatpush3.bf16.msra.mxu1 %v4255_v40 }
0x1c26   :  { %3399 = vmatprep.subr.bf16.mxu0 %v3742_v0  ;;  %3409 = vmatprep.subr.bf16.mxu1 %v3742_v0 }
0x1c27   :  { %3411 = vmatprep.mubr.msk.bf16.mxu1 %vm3743_vm0, %v3742_v0 }
0x1c29   :  { %3410 = vmatpush3.bf16.msra.mxu1 %v3900_v39 }
0x1c2a   :  { %3423 = vmatprep.subr.bf16.mxu1 %v3742_v0 }
0x1c30   :  { %v125_v13 = vpop.permute.xlu0 %124 }
0x1c31   :  { %v127_v62 = vmul.f32 %v125_v13, %v3858_v10 }
0x1cef   :  { %v4421_v1 = vpop.f32.mrb[64].mxu1 }
0x1cf0   :  { %v3381_v5 = vpop.f32.mrb[65].mxu1 }
0x1cf1   :  { %v2131_v6 = vpop.f32.mrb[66].mxu1 }
0x1cf2   :  { %v3382_v42 = vpop.f32.mrb[67].mxu1 }
0x1cf3   :  { %v2059_v56 = vpop.f32.mrb[64].mxu0 }
0x1cf4   :  { %v2060_v40 = vadd.f32 %v2059_v56, %v4374_v55  ;;  %v3373_v57 = vpop.f32.mrb[65].mxu0 }
0x1cf5   :  { %v2062_v3 = vpop.f32.mrb[66].mxu0 }
0x1cf6   :  { %v2065_v2 = vadd.f32 %v2060_v40, %v3945_v60  ;;  %v3374_v34 = vpop.f32.mrb[67].mxu0 }
0x1cf7   :  { %v2235_v36 = vpop.f32.mrb[68].mxu1 }
0x1cf8   :  { %3630 = vtanh.f32 %v2065_v2  ;;  %v2241_v39 = vadd.f32 %v2235_v36, %v127_v62  ;;  %v3397_v30 = vpop.f32.mrb[69].mxu1 }
0x1cf9   :  { %v2238_v11 = vpop.f32.mrb[70].mxu1 }
0x1cfa   :  { %v2242_v44 = vadd.f32 %v2241_v39, %v3865_v14  ;;  %v3398_v47 = vpop.f32.mrb[71].mxu1 }
0x1cfc   :  { %3632 = vtanh.f32 %v2242_v44 }
0x1d02   :  { %v3631_v59 = vpop.eup %3630 }
0x1d03   :  { %v2067_v18 = vmul.f32 %v3631_v59, %v3875_v24 }
0x1d05   :  { %v2068_v55 = vadd.f32 %v2067_v18, %v3879_v25 }
0x1d06   :  { %v3633_v28 = vpop.eup %3632 }
0x1d07   :  { %2071 = vrot.lane.b32.xlu1 %v2068_v55, %s3745_s9  ;;  %v2244_v10 = vmul.f32 %v3633_v28, %v3875_v24  ;;  %v2069_v27 = vmul.f32 %v2068_v55, %v4334_v16 }
0x1d09   :  { %v2245_v54 = vadd.f32 %v2244_v10, %v3879_v25 }
0x1d0b   :  { %2248 = vrot.lane.b32.xlu1 %v2245_v54, %s3745_s9  ;;  %v2246_v31 = vmul.f32 %v2245_v54, %v4389_v52 }
0x1d79   :  { %v2072_v46 = vpop.permute.xlu1 %2071 }
0x1d7a   :  { %v2074_v51 = vmul.f32 %v2072_v46, %v2068_v55 }
0x1d7c   :  { %2076 = vrot.lane.b32.xlu0 %v2074_v51, %s3746_s10 }
0x1d7d   :  { %v2249_v14 = vpop.permute.xlu1 %2248 }
0x1d7e   :  { %v2251_v26 = vmul.f32 %v2249_v14, %v2245_v54 }
0x1d80   :  { %2253 = vrot.lane.b32.xlu1 %v2251_v26, %s3746_s10 }
0x1dee   :  { %v2077_v4 = vpop.permute.xlu0 %2076 }
0x1def   :  { %v4436_v45 = vadd.f32 %v2077_v4, %v2069_v27 }
0x1df1   :  { %3634 = vtanh.f32 %v4436_v45 }
0x1df2   :  { %v2254_v32 = vpop.permute.xlu1 %2253 }
0x1df3   :  { %v2256_v35 = vadd.f32 %v2254_v32, %v2246_v31 }
0x1df5   :  { %3636 = vtanh.f32 %v2256_v35 }
0x1dfb   :  { %v3635_v37 = vpop.eup %3634 }
0x1dfc   :  { %2082 = vrot.lane.b32.xlu0 %v3635_v37, %s3746_s10 }
0x1dff   :  { %v3637_v15 = vpop.eup %3636 }
0x1e00   :  { %2259 = vrot.lane.b32.xlu1 %v3637_v15, %s3746_s10 }
0x1e6e   :  { %v2083_v41 = vpop.permute.xlu0 %2082 }
0x1e6f   :  { %v2085_v33 = vmul.f32 %v2083_v41, %v2068_v55 }
0x1e71   :  { %v2086_v19 = vpack.c.bf16 %v2085_v33, %v2085_v33 }
0x1e72   :  { %v2260_v16 = vpop.permute.xlu1 %2259 }
0x1e73   :  { %v2262_v9 = vmul.f32 %v2260_v16, %v2245_v54  ;;  %2135 = vrot.lane.b32.xlu0 %v2086_v19, %s3748_s11 }
0x1e75   :  { %v2263_v49 = vpack.c.bf16 %v2262_v9, %v2262_v9 }
0x1e77   :  { %2305 = vrot.lane.b32.xlu1 %v2263_v49, %s3748_s11 }
0x1ee5   :  { %v2136_v52 = vpop.permute.xlu0 %2135 }
0x1ee6   :  { %3388 = vmatmul.mubr.msk.bf16.vlgmr.msra.gmra.mrb[68].mxu0 %vm137_vm2, %v2136_v52 }
0x1ee7   :  { %3400 = vmatpush3.bf16.msra.mxu0 %v4291_v20  ;;  %3403 = vmatprep.mubr.msk.bf16.mxu0 %vm3743_vm0, %v3742_v0 }
0x1ee8   :  { %3401 = vmatprep.subr.bf16.mxu0 %v3742_v0 }
0x1ee9   :  { %v2306_v50 = vpop.permute.xlu1 %2305 }
0x1eea   :  { %3412 = vmatmul.mubr.msk.bf16.vlgmr.msra.gmra.mrb[72].mxu1 %vm137_vm2, %v2306_v50 }
0x1eeb   :  { %3402 = vmatpush3.bf16.msra.mxu0 %v3895_v38  ;;  %3424 = vmatpush3.bf16.msra.mxu1 %v4405_v53 }
0x1eec   :  { %3415 = vmatprep.subr.bf16.mxu0 %v3742_v0  ;;  %3425 = vmatprep.subr.bf16.mxu1 %v3742_v0 }
0x1eed   :  { %3427 = vmatprep.mubr.msk.bf16.mxu1 %vm3743_vm0, %v3742_v0 }
0x1eee   :  { %3404 = vmatmul.mubr.msk.bf16.vlgmr.msra.gmra.mrb[72].mxu0 %vm137_vm2, %v2136_v52 }
0x1eef   :  { %3416 = vmatpush3.bf16.msra.mxu0 %v4308_v22  ;;  %3419 = vmatprep.mubr.msk.bf16.mxu0 %vm3743_vm0, %v3742_v0 }
0x1ef0   :  { %3417 = vmatprep.subr.bf16.mxu0 %v3742_v0  ;;  %3426 = vmatpush3.bf16.msra.mxu1 %v3969_v48 }
0x1ef3   :  { %3418 = vmatpush3.bf16.msra.mxu0 %v3915_v43 }
0x1ef4   :  { %3431 = vmatprep.subr.mxu0 %v3742_v0 }
0x1fb9   :  { %v2174_v38 = vpop.f32.mrb[68].mxu0 }
0x1fba   :  { %v2175_v20 = vadd.f32 %v2174_v38, %v4421_v1  ;;  %v3389_v17 = vpop.f32.mrb[69].mxu0 }
0x1fbb   :  { %v2177_v53 = vpop.f32.mrb[70].mxu0 }
0x1fbc   :  { %v2180_v5 = vadd.f32 %v2175_v20, %v4007_v63  ;;  %v3390_v6 = vpop.f32.mrb[71].mxu0 }
0x1fbd   :  { %v2344_v22 = vpop.f32.mrb[72].mxu1 }
0x1fbe   :  { %3638 = vtanh.f32 %v2180_v5  ;;  %v3413_v13 = vpop.f32.mrb[73].mxu1  ;;  %v4492_v5 = vsub.s32 4, %v3846_v7 }
0x1fbf   :  { %v2347_v42 = vpop.f32.mrb[74].mxu1 }
0x1fc0   :  { %v3414_v56 = vpop.f32.mrb[75].mxu1  ;;  %v2514_v42 = vld [vmem:[%s4585_s1] sm:$0xff] }
0x1fc1   :  { %v2298_v40 = vpop.f32.mrb[72].mxu0  ;;  %v3663_v56 = vld [vmem:[%s4588_s4] sm:$0xff] }
0x1fc2   :  { %v2345_v57 = vadd.f32 %v2344_v22, %v2298_v40  ;;  %v3405_v48 = vpop.f32.mrb[73].mxu0  ;;  %v2515_v40 = vmul.f32 0.01, %v2514_v42 }
0x1fc3   :  { %v2301_v62 = vpop.f32.mrb[74].mxu0 }
0x1fc4   :  { %v2350_v43 = vadd.f32 %v2345_v57, %v3945_v60  ;;  %v3406_v3 = vpop.f32.mrb[75].mxu0  ;;  %v2516_v57 = vmax.f32 %v2514_v42, %v2515_v40 }
0x1fc6   :  { %3640 = vtanh.f32 %v2350_v43 }
0x1fc8   :  { %v3639_v2 = vpop.eup %3638 }
0x1fc9   :  { %v2182_v1 = vmul.f32 %v3639_v2, %v3875_v24 }
0x1fcb   :  { %v2183_v34 = vadd.f32 %v2182_v1, %v3879_v25 }
0x1fcd   :  { %2186 = vrot.lane.b32.xlu0 %v2183_v34, %s3745_s9  ;;  %v2184_v59 = vmul.f32 %v2183_v34, %v4385_v29 }
0x1fd0   :  { %v3641_v36 = vpop.eup %3640 }
0x1fd1   :  { %v2352_v39 = vmul.f32 %v3641_v36, %v3875_v24 }
0x1fd3   :  { %v2353_v30 = vadd.f32 %v2352_v39, %v3879_v25 }
0x1fd5   :  { %2356 = vrot.lane.b32.xlu1 %v2353_v30, %s3745_s9  ;;  %v2354_v28 = vmul.f32 %v2353_v30, %v4436_v45 }
0x203f   :  { %v2187_v11 = vpop.permute.xlu0 %2186 }
0x2040   :  { %v2189_v44 = vmul.f32 %v2187_v11, %v2183_v34 }
0x2042   :  { %2191 = vrot.lane.b32.xlu0 %v2189_v44, %s3746_s10 }
0x2047   :  { %v2357_v60 = vpop.permute.xlu1 %2356 }
0x2048   :  { %v2359_v47 = vmul.f32 %v2357_v60, %v2353_v30 }
0x204a   :  { %2361 = vrot.lane.b32.xlu1 %v2359_v47, %s3746_s10  ;;  %v2647_v47 = vld [vmem:[#allocation6] sm:$0xff] }
0x20b4   :  { %v2192_v18 = vpop.permute.xlu0 %2191 }
0x20b5   :  { %v2194_v55 = vadd.f32 %v2192_v18, %v2184_v59  ;;  %v2648_v59 = vld [vmem:[#allocation6 + $0x8] sm:$0xff] }
0x20b6   :  { %v3483_v18 = vpack.c.bf16 %v2648_v59, %v2647_v47  ;;  %v2770_v47 = vld [vmem:[#allocation6 + $0x50] sm:$0xff]  ;;  %v2771_v59 = vld [vmem:[#allocation6 + $0x58] sm:$0xff] }
0x20b7   :  { %3642 = vtanh.f32 %v2194_v55 }
0x20bc   :  { %v2362_v10 = vpop.permute.xlu1 %2361 }
0x20bd   :  { %v2364_v54 = vadd.f32 %v2362_v10, %v2354_v28  ;;  %v2649_v28 = vld [vmem:[#allocation6 + $0x10] sm:$0xff]  ;;  %v2650_v10 = vld [vmem:[#allocation6 + $0x18] sm:$0xff] }
0x20bf   :  { %3644 = vtanh.f32 %v2364_v54  ;;  %v3486_v54 = vpack.c.bf16 %v2650_v10, %v2649_v28  ;;  %v2772_v28 = vld [vmem:[#allocation6 + $0x60] sm:$0xff]  ;;  %v2773_v10 = vld [vmem:[#allocation6 + $0x68] sm:$0xff] }
0x20c1   :  { %v3643_v46 = vpop.eup %3642 }
0x20c2   :  { %2197 = vrot.lane.b32.xlu0 %v3643_v46, %s3746_s10  ;;  %v2651_v46 = vld [vmem:[#allocation6 + $0x20] sm:$0xff] }
0x20c9   :  { %v3645_v51 = vpop.eup %3644 }
0x20ca   :  { %2367 = vrot.lane.b32.xlu1 %v3645_v51, %s3746_s10  ;;  %v2652_v51 = vld [vmem:[#allocation6 + $0x28] sm:$0xff] }
0x2134   :  { %v2198_v14 = vpop.permute.xlu0 %2197 }
0x2135   :  { %v2200_v26 = vmul.f32 %v2198_v14, %v2183_v34  ;;  %v3489_v14 = vpack.c.bf16 %v2652_v51, %v2651_v46  ;;  %v2774_v46 = vld [vmem:[#allocation6 + $0x70] sm:$0xff] }
0x2137   :  { %v2372_v27 = vpack.c.bf16 %v2200_v26, %v2200_v26  ;;  %v2653_v26 = vld [vmem:[#allocation6 + $0x30] sm:$0xff] }
0x2139   :  { %2374 = vrot.lane.b32.xlu0 %v2372_v27, %s3748_s11  ;;  %v2654_v27 = vld [vmem:[#allocation6 + $0x38] sm:$0xff] }
0x213c   :  { %v2368_v29 = vpop.permute.xlu1 %2367 }
0x213d   :  { %v2370_v4 = vmul.f32 %v2368_v29, %v2353_v30  ;;  %v3492_v29 = vpack.c.bf16 %v2654_v27, %v2653_v26  ;;  %v2777_v26 = vld [vmem:[#allocation6 + $0x88] sm:$0xff] }
0x213f   :  { %v2371_v31 = vpack.c.bf16 %v2370_v4, %v2370_v4  ;;  %v2655_v4 = vld [vmem:[#allocation6 + $0x40] sm:$0xff] }
0x2141   :  { %2420 = vrot.lane.b32.xlu1 %v2371_v31, %s3748_s11  ;;  %v2656_v31 = vld [vmem:[#allocation6 + $0x48] sm:$0xff] }
0x21ab   :  { %v2375_v45 = vpop.permute.xlu0 %2374 }
0x21ac   :  { %3420 = vmatmul.mubr.msk.bf16.vlgmr.msra.gmra.mrb[76].mxu0 %vm137_vm2, %v2375_v45  ;;  %v3495_v45 = vpack.c.bf16 %v2656_v31, %v2655_v4  ;;  %v2779_v4 = vld [vmem:[#allocation6 + $0x98] sm:$0xff] }
0x21ad   :  { %3433 = vmatprep.mubr.msk.f32.mxu0 %vm3743_vm0, %v3742_v0  ;;  %3432 = vmatpush3.msk.msra.mxu0 %vm2531_vm3, %v3663_v56 }
0x21b3   :  { %v2421_v32 = vpop.permute.xlu1 %2420 }
0x21b4   :  { %3428 = vmatmul.mubr.msk.bf16.vlgmr.msra.gmra.mrb[76].mxu1 %vm137_vm2, %v2421_v32  ;;  %3434 = vmatmul.mubr.msk.f32.vlgmr.msra.gmra.mrb[80].mxu0 %vm2527_vm4, %v2516_v57  ;;  %v4525_v32 = vsub.s32 3, %v3846_v7 }
0x21b5   :  { %3456 = vmatprep.mubr.msk.f32.mxu1 %vm3743_vm0, %v3742_v0  ;;  %3479 = vmatprep.mubr.msk.f32.mxu0 %vm3743_vm0, %v3742_v0 }
0x227f   :  { %v2413_v35 = vpop.f32.mrb[76].mxu0 }
0x2280   :  { %v3421_v37 = vpop.f32.mrb[77].mxu0 }
0x2281   :  { %v2416_v15 = vpop.f32.mrb[78].mxu0 }
0x2282   :  { %v3422_v41 = vpop.f32.mrb[79].mxu0 }
0x2283   :  { %v2609_v41 = vrot.slane %v3663_v56, %v4492_v5 }
0x2287   :  { %v2459_v33 = vpop.f32.mrb[76].mxu1  ;;  %v2601_v44 = vpop.f32.mrb[80].mxu0 }
0x2288   :  { %v2460_v19 = vadd.f32 %v2459_v33, %v2413_v35  ;;  %v3429_v16 = vpop.f32.mrb[77].mxu1  ;;  %v3435_v60 = vpop.f32.mrb[81].mxu0  ;;  %v2525_v35 = vrot.slane %v3663_v56, %v4525_v32 }
0x2289   :  { %v2462_v9 = vpop.f32.mrb[78].mxu1 }
0x228a   :  { %v2465_v49 = vadd.f32 %v2460_v19, %v4007_v63  ;;  %v3430_v52 = vpop.f32.mrb[79].mxu1  ;;  %v4498_v63 = vld [vmem:[%s4588_s4 + $0x10] sm:$0x3f]  ;;  %v4531_v19 = vsel %vm2509_vm5, 1.0, %v3742_v0 }
0x228b   :  { %v2489_v6 = vrot.slane %v4498_v63, %v4492_v5  ;;  %v4515_v34 = vrot.slane %v4498_v63, %v3849_v8 }
0x228c   :  { %3646 = vtanh.f32 %v2465_v49 }
0x2296   :  { %v3647_v50 = vpop.eup %3646 }
0x2297   :  { %v2467_v38 = vmul.f32 %v3647_v50, %v3875_v24 }
0x2299   :  { %v2468_v20 = vadd.f32 %v2467_v38, %v3879_v25 }
0x229b   :  { %2471 = vrot.lane.b32.xlu0 %v2468_v20, %s3745_s9  ;;  %v2469_v24 = vmul.f32 %v2468_v20, %v2194_v55  ;;  %v3756_v55 = vmov 0.0|0.0  }
0x229c   :  { %3482 = vmatprep.subr.bf16.mxu1 %v3756_v55  ;;  %3497 = vmatprep.subr.bf16.mxu0 %v3756_v55 }
0x229d   :  { %3484 = vmatpush3.bf16.msra.mxu1 %v3483_v18  ;;  %v3498_v18 = vpack.c.bf16 %v2771_v59, %v2770_v47 }
0x229e   :  { %3485 = vmatprep.subr.bf16.mxu1 %v3756_v55 }
0x229f   :  { %3499 = vmatpush3.bf16.msra.mxu0 %v3498_v18 }
0x22a0   :  { %3500 = vmatprep.subr.bf16.mxu0 %v3756_v55 }
0x22a1   :  { %3487 = vmatpush3.bf16.msra.mxu1 %v3486_v54  ;;  %v3501_v54 = vpack.c.bf16 %v2773_v10, %v2772_v28 }
0x22a2   :  { %3488 = vmatprep.subr.bf16.mxu1 %v3756_v55 }
0x22a3   :  { %3502 = vmatpush3.bf16.msra.mxu0 %v3501_v54 }
0x22a4   :  { %3503 = vmatprep.subr.bf16.mxu0 %v3756_v55 }
0x22a5   :  { %3490 = vmatpush3.bf16.msra.mxu1 %v3489_v14  ;;  %v2776_v14 = vld [vmem:[#allocation6 + $0x80] sm:$0xff] }
0x22a6   :  { %3491 = vmatprep.subr.bf16.mxu1 %v3756_v55  ;;  %v3507_v27 = vpack.c.bf16 %v2777_v26, %v2776_v14 }
0x22a9   :  { %3493 = vmatpush3.bf16.msra.mxu1 %v3492_v29  ;;  %v2778_v29 = vld [vmem:[#allocation6 + $0x90] sm:$0xff] }
0x22aa   :  { %3494 = vmatprep.subr.bf16.mxu1 %v3756_v55  ;;  %v3510_v31 = vpack.c.bf16 %v2779_v4, %v2778_v29 }
0x22ad   :  { %3496 = vmatpush3.bf16.msra.mxu1 %v3495_v45 }
0x230d   :  { %v2472_v17 = vpop.permute.xlu0 %2471 }
0x230e   :  { %v2474_v53 = vmul.f32 %v2472_v17, %v2468_v20 }
0x2310   :  { %2476 = vrot.lane.b32.xlu1 %v2474_v53, %s3746_s10 }
0x2314   :  { %2491 = vrot.lane.b32.xlu1 %v2489_v6, %s3755_s16 }
0x2382   :  { %v2477_v25 = vpop.permute.xlu1 %2476 }
0x2383   :  { %v2479_v22 = vadd.f32 %v2477_v25, %v2469_v24 }
0x2385   :  { %3648 = vtanh.f32 %v2479_v22 }
0x2386   :  { %v2492_v62 = vpop.permute.xlu1 %2491 }
0x238f   :  { %v3649_v13 = vpop.eup %3648 }
0x2390   :  { %2482 = vrot.lane.b32.xlu0 %v3649_v13, %s3746_s10 }
0x2402   :  { %v2483_v48 = vpop.permute.xlu0 %2482 }
0x2403   :  { %v2485_v43 = vmul.f32 %v2483_v48, %v2468_v20 }
0x2405   :  { %v2494_v3 = vmul.f32 %v2492_v62, %v2485_v43 }
0x2407   :  { %2496 = vrot.lane.b32.xlu0 %v2494_v3, %s3748_s11  ;;  %v4540_v3 = vld [vmem:[%s4588_s4 + $0x8] sm:$0xff]  ;;  %s3757_s4 = smov 127  }
0x2408   :  { %v2660_v45 = vrot.slane %v4540_v3, %v194_v21 }
0x2479   :  { %v2497_v2 = vpop.permute.xlu0 %2496 }
0x247a   :  { %v2499_v1 = vsel %vm137_vm2, %v2497_v2, 0.0  ;;  %v2638_v2 = vrot.slane %v4540_v3, %v4525_v32 }
0x247b   :  { %2500 = vadd.xlane.f32.xlu1 %v2499_v1 }
0x2508   :  { %v2501_v36 = vpop.xlane.xlu1 %2500 }
0x2509   :  { %v2506_v39 = vadd.f32 %v4515_v34, %v2501_v36 }
0x250b   :  { %v2512_v30 = vmul.f32 0.01, %v2506_v39 }
0x250d   :  { %v2513_v11 = vmax.f32 %v2506_v39, %v2512_v30  ;;  %v2643_v39 = vrot.slane %v4540_v3, %v4492_v5  ;;  %v2775_v5 = vld [vmem:[#allocation6 + $0x78] sm:$0xff] }
0x250e   :  { %v3504_v51 = vpack.c.bf16 %v2775_v5, %v2774_v46 }
0x250f   :  { %2519 = vperm.xlu0 %3543, %v2513_v11  }
0x2510   :  { %3505 = vmatpush3.bf16.msra.mxu0 %v3504_v51 }
0x2511   :  { %3506 = vmatprep.subr.bf16.mxu0 %v3756_v55 }
0x2514   :  { %3508 = vmatpush3.bf16.msra.mxu0 %v3507_v27 }
0x2515   :  { %3509 = vmatprep.subr.bf16.mxu0 %v3756_v55 }
0x2518   :  { %3511 = vmatpush3.bf16.msra.mxu0 %v3510_v31 }
0x258e   :  { %v2520_v37 = vpop.permute.xlu0 %2519 }
0x258f   :  { %v2526_v15 = vmul.f32 %v2525_v35, %v2520_v37 }
0x2591   :  { %v2605_v33 = vadd.f32 %v2601_v44, %v2526_v15 }
0x2593   :  { %v2610_v16 = vadd.f32 %v2609_v41, %v2605_v33 }
0x2595   :  { %v2611_v9 = vmul.f32 %v4531_v19, %v2610_v16 }
0x2597   :  { %v2613_v49 = vsel %vm2612_vm6, %v2611_v9, 0.0 }
0x2598   :  { %v2614_v52 = vrot.slane %v2613_v49, 4 }
0x259a   :  { %v2615_v50 = vadd.f32 %v2614_v52, %v2613_v49 }
0x259c   :  { %v2616_v38 = vrot.slane %v2615_v50, 2 }
0x259e   :  { %v2617_v20 = vadd.f32 %v2616_v38, %v2615_v50 }
0x25a0   :  { %v2618_v17 = vrot.slane %v2617_v20, 1 }
0x25a2   :  { %v2619_v53 = vadd.f32 %v2618_v17, %v2617_v20 }
0x25a4   :  { %v2620_v6 = vmul.f32 0.25, %v2619_v53 }
0x25a6   :  { %v2621_v24 = vsub.f32 %v2610_v16, %v2620_v6 }
0x25a8   :  { %v2622_v25 = vmul.f32 %v4531_v19, %v2621_v24 }
0x25aa   :  { %v2623_v22 = vmul.f32 %v2622_v25, %v2622_v25 }
0x25ac   :  { %v2624_v0 = vsel %vm2612_vm6, %v2623_v22, 0.0 }
0x25ad   :  { %v2625_v13 = vrot.slane %v2624_v0, 4 }
0x25af   :  { %v2626_v42 = vadd.f32 %v2625_v13, %v2624_v0 }
0x25b1   :  { %v2627_v56 = vrot.slane %v2626_v42, 2 }
0x25b3   :  { %v2628_v40 = vadd.f32 %v2627_v56, %v2626_v42 }
0x25b5   :  { %v2629_v57 = vrot.slane %v2628_v40, 1 }
0x25b7   :  { %v2630_v48 = vadd.f32 %v2629_v57, %v2628_v40  ;;  %v2760_v40 = vrot.slane %v4540_v3, %v3849_v8 }
0x25b9   :  { %v2631_v62 = vmul.f32 0.25, %v2630_v48 }
0x25bb   :  { %v2632_v43 = vadd.f32 1e-05, %v2631_v62  ;;  %v2765_v62 = vrot.slane %v4540_v3, %v188_v12 }
0x25bd   :  { %3650 = vrsqrt.f32 %v2632_v43 }
0x25c7   :  { %v3651_v1 = vpop.eup %3650 }
0x25c8   :  { %v2634_v36 = vmul.f32 %v3651_v1, %v2621_v24 }
0x25ca   :  { %v2639_v30 = vmul.f32 %v2638_v2, %v2634_v36 }
0x25cc   :  { %v2644_v11 = vadd.f32 %v2643_v39, %v2639_v30  ;;  %v2783_v39 = vrot.slane %v4540_v3, %v199_v23 }
0x25ce   :  { %v2645_v44 = vmul.f32 0.01, %v2644_v11 }
0x25d0   :  { %v2646_v60 = vmax.f32 %v2644_v11, %v2645_v44 }
0x25d2   :  { %3457 = vmatmul.mubr.msk.f32.vlgmr.msra.gmra.mrb[80].mxu1 %vm2612_vm6, %v2646_v60 }
0x26a5   :  { %v2730_v35 = vpop.f32.mrb[80].mxu1 }
0x26a6   :  { %v2731_v37 = vadd.f32 %v2730_v35, %v2660_v45  ;;  %v3458_v15 = vpop.f32.mrb[81].mxu1 }
0x26a8   :  { %v2734_v41 = vmul.f32 %v4531_v19, %v2731_v37 }
0x26aa   :  { %v2735_v33 = vsel %vm2612_vm6, %v2734_v41, 0.0 }
0x26ab   :  { %v2736_v16 = vrot.slane %v2735_v33, 4 }
0x26ad   :  { %v2737_v9 = vadd.f32 %v2736_v16, %v2735_v33 }
0x26af   :  { %v2738_v49 = vrot.slane %v2737_v9, 2 }
0x26b1   :  { %v2739_v52 = vadd.f32 %v2738_v49, %v2737_v9  ;;  %v2895_v49 = vrot.slane %v4498_v63, %v4525_v32 }
0x26b3   :  { %v2740_v55 = vrot.slane %v2739_v52, 1 }
0x26b5   :  { %v2741_v50 = vadd.f32 %v2740_v55, %v2739_v52 }
0x26b7   :  { %v2742_v38 = vmul.f32 0.25, %v2741_v50 }
0x26b9   :  { %v2743_v20 = vsub.f32 %v2731_v37, %v2742_v38  ;;  %v2883_v37 = vrot.slane %v4540_v3, %v332_v58 }
0x26bb   :  { %v2744_v17 = vmul.f32 %v4531_v19, %v2743_v20 }
0x26bd   :  { %v2745_v53 = vmul.f32 %v2744_v17, %v2744_v17 }
0x26bf   :  { %v2746_v21 = vsel %vm2612_vm6, %v2745_v53, 0.0 }
0x26c0   :  { %v2747_v6 = vrot.slane %v2746_v21, 4 }
0x26c2   :  { %v2748_v24 = vadd.f32 %v2747_v6, %v2746_v21 }
0x26c4   :  { %v2749_v25 = vrot.slane %v2748_v24, 2 }
0x26c6   :  { %v2750_v22 = vadd.f32 %v2749_v25, %v2748_v24 }
0x26c8   :  { %v2751_v0 = vrot.slane %v2750_v22, 1 }
0x26ca   :  { %v2752_v13 = vadd.f32 %v2751_v0, %v2750_v22 }
0x26cc   :  { %v2753_v42 = vmul.f32 0.25, %v2752_v13 }
0x26ce   :  { %v2754_v56 = vadd.f32 1e-05, %v2753_v42 }
0x26d0   :  { %3652 = vrsqrt.f32 %v2754_v56 }
0x26da   :  { %v3653_v57 = vpop.eup %3652 }
0x26db   :  { %v2756_v48 = vmul.f32 %v3653_v57, %v2743_v20 }
0x26dd   :  { %v2761_v43 = vmul.f32 %v2760_v40, %v2756_v48 }
0x26df   :  { %v2766_v2 = vadd.f32 %v2765_v62, %v2761_v43 }
0x26e1   :  { %v2767_v1 = vmul.f32 0.01, %v2766_v2 }
0x26e3   :  { %v2768_v36 = vmax.f32 %v2766_v2, %v2767_v1 }
0x26e5   :  { %3480 = vmatmul.mubr.msk.f32.vlgmr.msra.gmra.mrb[82].mxu0 %vm2612_vm6, %v2768_v36 }
0x27b8   :  { %v2853_v30 = vpop.f32.mrb[82].mxu0 }
0x27b9   :  { %v2854_v11 = vadd.f32 %v2853_v30, %v2783_v39  ;;  %v3481_v44 = vpop.f32.mrb[83].mxu0 }
0x27bb   :  { %v2857_v8 = vmul.f32 %v4531_v19, %v2854_v11 }
0x27bd   :  { %v2858_v60 = vsel %vm2612_vm6, %v2857_v8, 0.0 }
0x27be   :  { %v2859_v47 = vrot.slane %v2858_v60, 4 }
0x27c0   :  { %v2860_v59 = vadd.f32 %v2859_v47, %v2858_v60 }
0x27c2   :  { %v2861_v12 = vrot.slane %v2860_v59, 2 }
0x27c4   :  { %v2862_v18 = vadd.f32 %v2861_v12, %v2860_v59 }
0x27c6   :  { %v2863_v28 = vrot.slane %v2862_v18, 1 }
0x27c8   :  { %v2864_v10 = vadd.f32 %v2863_v28, %v2862_v18 }
0x27ca   :  { %v2865_v54 = vmul.f32 0.25, %v2864_v10 }
0x27cc   :  { %v2866_v46 = vsub.f32 %v2854_v11, %v2865_v54 }
0x27ce   :  { %v2867_v5 = vmul.f32 %v4531_v19, %v2866_v46  ;;  %v2888_v19 = vrot.slane %v4498_v63, %v468_v61 }
0x27d0   :  { %v2868_v51 = vmul.f32 %v2867_v5, %v2867_v5 }
0x27d2   :  { %v2869_v23 = vsel %vm2612_vm6, %v2868_v51, 0.0 }
0x27d3   :  { %v2870_v14 = vrot.slane %v2869_v23, 4 }
0x27d5   :  { %v2871_v26 = vadd.f32 %v2870_v14, %v2869_v23 }
0x27d7   :  { %v2872_v27 = vrot.slane %v2871_v26, 2 }
0x27d9   :  { %v2873_v29 = vadd.f32 %v2872_v27, %v2871_v26 }
0x27db   :  { %v2874_v4 = vrot.slane %v2873_v29, 1 }
0x27dd   :  { %v2875_v31 = vadd.f32 %v2874_v4, %v2873_v29 }
0x27df   :  { %v2876_v45 = vmul.f32 0.25, %v2875_v31 }
0x27e1   :  { %v2877_v35 = vadd.f32 1e-05, %v2876_v45 }
0x27e3   :  { %3654 = vrsqrt.f32 %v2877_v35 }
0x27ed   :  { %v3655_v15 = vpop.eup %3654 }
0x27ee   :  { %v2879_v41 = vmul.f32 %v3655_v15, %v2866_v46 }
0x27f0   :  { %v2884_v33 = vmul.f32 %v2883_v37, %v2879_v41 }
0x27f2   :  { %v2889_v16 = vadd.f32 %v2888_v19, %v2884_v33 }
0x27f4   :  { %v2890_v9 = vmul.f32 0.01, %v2889_v16 }
0x27f6   :  { %v2891_v52 = vmax.f32 %v2889_v16, %v2890_v9 }
0x27f8   :  { %v2896_v55 = vmul.f32 %v2895_v49, %v2891_v52 }
0x27fa   :  { %v2897_v50 = vsel %vm2612_vm6, %v2896_v55, 0.0 }
0x27fb   :  { %2898 = vadd.xlane.f32.xlu0 %v2897_v50 }
0x2888   :  { %v2899_v38 = vpop.xlane.xlu0 %2898 }
0x2889   :  { %v2900_v58 = vadd.f32 %v2899_v38, %v4515_v34 }
0x288b   :  { %v2901_v3 = vmul.f32 0.01, %v2900_v58 }
0x288d   :  { %v2902_v20 = vmax.f32 %v2900_v58, %v2901_v3 }
0x288f   :  { %2904 = vrot.lane.b32.xlu1 %v2902_v20, %s3757_s4 }
0x2901   :  { %v2905_v7 = vpop.permute.xlu1 %2904 }
0x2902   :  { %2908 = vst.msk [vmem:[%s4589_s5] sm:$0xff] %vm2907_vm7, %v2905_v7 }
0x2903   :  { %2913 = vsyncpa [#allocation3], 1 }
0x2904   :  { %2914 = vsyncpa [#allocation5], 1 }

</bundles_post_ra>
